<compile_context>
chip_gen: v7x
topology: tpu7x:2x2x1
jax: 0.10.0
libtpu: 0.0.40
codegen_flags: <defaults>
</compile_context>

<pallas_src>
import functools
import math

import jax
import jax.numpy as jnp
import numpy as np
from jax.experimental import pallas as pl
from jax.experimental.pallas import tpu as pltpu

_SQRT2_INV = 1.0 / math.sqrt(2.0)
_LN_EPS = 1e-5


def _gelu_exact(x):
    # exact (erf-based) GELU, matching torch.nn.GELU() default
    return 0.5 * x * (1.0 + jax.lax.erf(x * _SQRT2_INV))


# ---------------------------------------------------------------------------
# the single fused kernel (everything 2-D, one grid step, batch folded)
# ---------------------------------------------------------------------------
def _decoder_block_kernel(x_ref, cross_ref, wsq_ref, wwide_ref, wff2_ref,
                          vec_ref, bwide_ref, out_ref, *,
                          n_heads, d_model, d_ff, factor, batch, len_x, len_cross):
    D, dh = d_model, d_model // n_heads
    B, L, S, F = batch, len_x, len_cross, factor

    vec = vec_ref[...]            # (F + 12 + 11, D): router rows + bias/norm rows
    bw = bwide_ref[...]           # (2, WIDE): [self-MLP b1 | padded pred bias]

    def vrow(i):                  # one (1, D) bias / gamma / beta row
        return vec[i:i + 1, :]

    # static row layout of the packed `vec` stack (must match pack_params)
    IB = F                                       # per-attention biases bq,bk,bv,bo
    NB = F + 12
    SN1_G, SN1_B, SN2_G, SN2_B, SMLP_B2 = NB, NB + 1, NB + 2, NB + 3, NB + 4
    N1_G, N1_B, N2_G, N2_B = NB + 5, NB + 6, NB + 7, NB + 8
    M1_B1, M1_B2 = NB + 9, NB + 10

    x2d = x_ref[...]              # (B*L, D)
    cr2d = cross_ref[...]         # (B*S, D)
    router = vec[0:F, :]          # (F, D), shared across the batch

    dn_qkt = (((1,), (1,)), ((), ()))            # (lq,dh) x (lk,dh) -> (lq,lk)

    def attention(a, q2d, lq, q_shared, kv2d, lk):
        """MHA #a (0 sender, 1 receiver, 2 cross). Full-width proj, merged KV."""
        wq = wsq_ref[2 * a]                      # (D, D), 1/sqrt(dh) folded in
        wo = wsq_ref[2 * a + 1]                  # (D, D)
        wkv = wwide_ref[a]                       # (D, WIDE) = [Wk | Wv | 0]
        bq, bk = vrow(IB + 4 * a), vrow(IB + 4 * a + 1)
        bv, bo = vrow(IB + 4 * a + 2), vrow(IB + 4 * a + 3)

        q = jnp.dot(q2d, wq, preferred_element_type=jnp.float32) + bq
        kv = jnp.dot(kv2d, wkv, preferred_element_type=jnp.float32)  # merged K|V
        k = kv[:, :D] + bk
        v = kv[:, D:2 * D] + bv

        outs = []
        for b in range(B):        # unrolled: B*H independent chains interleave
            qb = q if q_shared else q[b * lq:(b + 1) * lq, :]
            kb = k[b * lk:(b + 1) * lk, :]
            vb = v[b * lk:(b + 1) * lk, :]
            heads = []
            for h in range(n_heads):
                lo, hi = h * dh, (h + 1) * dh
                s = jax.lax.dot_general(qb[:, lo:hi], kb[:, lo:hi], dn_qkt,
                                        preferred_element_type=jnp.float32)
                s = s - jnp.max(s, axis=-1, keepdims=True)
                p = jnp.exp(s)
                p = p * pl.reciprocal(jnp.sum(p, axis=-1, keepdims=True),
                                      approx=True)
                heads.append(jnp.dot(p, vb[:, lo:hi],
                                     preferred_element_type=jnp.float32))
            outs.append(jnp.concatenate(heads, axis=-1))     # (lq, D) lane reassembly
        o = jnp.concatenate(outs, axis=0)                    # (B*lq, D)
        return jnp.dot(o, wo, preferred_element_type=jnp.float32) + bo

    def add_layernorm(xa, xb, gi, bi):
        h = xa + xb
        mu = jnp.mean(h, axis=-1, keepdims=True)
        var = jnp.mean((h - mu) ** 2, axis=-1, keepdims=True)
        return (h - mu) * jax.lax.rsqrt(var + _LN_EPS) * vrow(gi) + vrow(bi)

    # ---- OneStageAttentionLayer (router self-attention stage) ----
    buf = attention(0, router, F, True, x2d, L)              # (B*F, D)
    rec = attention(1, x2d, L, False, buf, F)                 # (B*L, D)
    h = add_layernorm(x2d, rec, SN1_G, SN1_B)
    hm = jnp.dot(h, wwide_ref[3],
                 preferred_element_type=jnp.float32)[:, :d_ff] + bw[0:1, :d_ff]
    hm = _gelu_exact(hm)
    hm = jnp.dot(hm, wff2_ref[...], preferred_element_type=jnp.float32) + vrow(SMLP_B2)
    h = add_layernorm(h, hm, SN2_G, SN2_B)

    # ---- cross attention + decoder tail ----
    tmp = attention(2, h, L, False, cr2d, S)
    x2 = add_layernorm(h, tmp, N1_G, N1_B)
    y = jnp.dot(x2, wsq_ref[6], preferred_element_type=jnp.float32) + vrow(M1_B1)
    y = _gelu_exact(y)
    y = jnp.dot(y, wsq_ref[7], preferred_element_type=jnp.float32) + vrow(M1_B2)
    dec = add_layernorm(x2, y, N2_G, N2_B)

    # fused output: dec @ [I | W_pred | 0] + [0 | b_pred | 0] -> [dec | pred | 0]
    out2 = jnp.dot(dec, wwide_ref[4], preferred_element_type=jnp.float32) + bw[1:2, :]
    out_ref[...] = out2.astype(out_ref.dtype)


# ---------------------------------------------------------------------------
# one-time weight packing (pure leading-axis stacks; done OUTSIDE the jit path)
# ---------------------------------------------------------------------------
def pack_params(params, n_heads):
    sa = params["self_attn"]
    D, seg_len = params["linear_pred"]["w"].shape
    d_ff = sa["mlp"]["w1"].shape[1]
    dh = D // n_heads
    scale = 1.0 / math.sqrt(dh)
    wide = max(2 * D, d_ff, D + seg_len)

    def padw(w):
        return jnp.pad(w, ((0, 0), (0, wide - w.shape[1])))

    attns = [sa["sender"], sa["receiver"], params["cross_attn"]]

    w_sq = jnp.stack([attns[0]["wq"] * scale, attns[0]["wo"],
                      attns[1]["wq"] * scale, attns[1]["wo"],
                      attns[2]["wq"] * scale, attns[2]["wo"],
                      params["mlp1"]["w1"], params["mlp1"]["w2"]])

    w_wide = jnp.stack(
        [padw(jnp.concatenate([a["wk"], a["wv"]], axis=1)) for a in attns]
        + [padw(sa["mlp"]["w1"]),
           padw(jnp.concatenate([jnp.eye(D, dtype=jnp.float32),
                                 params["linear_pred"]["w"]], axis=1))])

    vec_rows = [sa["router"]]
    for a in attns:
        vec_rows += [a["bq"] * scale, a["bk"], a["bv"], a["bo"]]
    vec_rows += [sa["norm1"]["gamma"], sa["norm1"]["beta"],
                 sa["norm2"]["gamma"], sa["norm2"]["beta"],
                 sa["mlp"]["b2"],
                 params["norm1"]["gamma"], params["norm1"]["beta"],
                 params["norm2"]["gamma"], params["norm2"]["beta"],
                 params["mlp1"]["b1"], params["mlp1"]["b2"]]
    vec = jnp.concatenate(vec_rows, axis=0)

    b_wide = jnp.concatenate(
        [padw(sa["mlp"]["b1"]),
         padw(jnp.concatenate([jnp.zeros((1, D), jnp.float32),
                               params["linear_pred"]["b"]], axis=1))], axis=0)

    return {"w_sq": w_sq, "w_wide": w_wide, "w_ff2": sa["mlp"]["w2"],
            "vec": vec, "b_wide": b_wide}


# ---------------------------------------------------------------------------
# wrapper: one pallas_call, whole-array blocks, single grid step
# ---------------------------------------------------------------------------
def decoder_block_router(x, cross, packed, *, n_heads, d_ff, seg_len, factor):
    B, L, D = x.shape
    S = cross.shape[1]
    wide = packed["w_wide"].shape[-1]

    x2 = x.reshape(B * L, D)        # free XLA reshapes outside the kernel
    c2 = cross.reshape(B * S, D)

    operands = (x2, c2, packed["w_sq"], packed["w_wide"], packed["w_ff2"],
                packed["vec"], packed["b_wide"])

    def full_spec(a):
        nd = a.ndim
        return pl.BlockSpec(a.shape, lambda i, nd=nd: (0,) * nd)

    kernel = functools.partial(
        _decoder_block_kernel, n_heads=n_heads, d_model=D, d_ff=d_ff,
        factor=factor, batch=B, len_x=L, len_cross=S)

    out = pl.pallas_call(
        kernel,
        out_shape=jax.ShapeDtypeStruct((B * L, wide), x.dtype),
        grid=(1,),
        in_specs=[full_spec(a) for a in operands],
        out_specs=pl.BlockSpec((B * L, wide), lambda i: (0, 0)),
        compiler_params=pltpu.CompilerParams(dimension_semantics=("arbitrary",)),
    )(*operands)

    out3 = out.reshape(B, L, wide)
    return out3[..., :D], out3[..., D:D + seg_len]


# ---------------------------------------------------------------------------
# pure-JAX reference (numerical sanity check, uses the raw unpacked params)
# ---------------------------------------------------------------------------
def _ref_mha(q, k, v, p, n_heads):
    B, Lq, D = q.shape
    dh = D // n_heads
    Q = q @ p["wq"] + p["bq"]
    K = k @ p["wk"] + p["bk"]
    V = v @ p["wv"] + p["bv"]
    Qh = Q.reshape(B, Lq, n_heads, dh)
    Kh = K.reshape(B, -1, n_heads, dh)
    Vh = V.reshape(B, -1, n_heads, dh)
    s = jnp.einsum("blhe,bshe->bhls", Qh, Kh) / math.sqrt(dh)
    a = jax.nn.softmax(s, axis=-1)
    o = jnp.einsum("bhls,bshd->blhd", a, Vh).reshape(B, Lq, D)
    return o @ p["wo"] + p["bo"]


def _ref_add_ln(x, r, p):
    h = x + r
    mu = jnp.mean(h, axis=-1, keepdims=True)
    var = jnp.mean((h - mu) ** 2, axis=-1, keepdims=True)
    return (h - mu) * jax.lax.rsqrt(var + _LN_EPS) * p["gamma"] + p["beta"]


def _ref_mlp(x, p):
    return _gelu_exact(x @ p["w1"] + p["b1"]) @ p["w2"] + p["b2"]


def reference_forward(x, cross, params, n_heads):
    B = x.shape[0]
    sa = params["self_attn"]
    router = jnp.broadcast_to(sa["router"][None], (B,) + sa["router"].shape)
    buf = _ref_mha(router, x, x, sa["sender"], n_heads)
    rec = _ref_mha(x, buf, buf, sa["receiver"], n_heads)
    h = _ref_add_ln(x, rec, sa["norm1"])
    h = _ref_add_ln(h, _ref_mlp(h, sa["mlp"]), sa["norm2"])
    tmp = _ref_mha(h, cross, cross, params["cross_attn"], n_heads)
    x2 = _ref_add_ln(h, tmp, params["norm1"])
    y = _ref_mlp(x2, params["mlp1"])
    dec_out = _ref_add_ln(x2, y, params["norm2"])
    layer_predict = dec_out @ params["linear_pred"]["w"] + params["linear_pred"]["b"]
    return dec_out, layer_predict


# ---------------------------------------------------------------------------
# deterministic parameter init (synthetic; no checkpoint)
# ---------------------------------------------------------------------------
def _init_linear(key, d_in, d_out):
    k1, k2 = jax.random.split(key)
    w = jax.random.normal(k1, (d_in, d_out), jnp.float32) / math.sqrt(d_in)
    b = 0.02 * jax.random.normal(k2, (1, d_out), jnp.float32)
    return w, b


def _init_attn(key, d):
    ks = jax.random.split(key, 4)
    p = {}
    for name, k in zip("qkvo", ks):
        w, b = _init_linear(k, d, d)
        p["w" + name], p["b" + name] = w, b
    return p


def _init_ln(d):
    return {"gamma": jnp.ones((1, d), jnp.float32),
            "beta": jnp.zeros((1, d), jnp.float32)}


def _init_mlp(key, d_in, d_hidden, d_out):
    k1, k2 = jax.random.split(key)
    w1, b1 = _init_linear(k1, d_in, d_hidden)
    w2, b2 = _init_linear(k2, d_hidden, d_out)
    return {"w1": w1, "b1": b1, "w2": w2, "b2": b2}


def init_params(key, d_seg, d_ff, factor, seg_len):
    ks = jax.random.split(key, 8)
    self_attn = {
        "router": jax.random.normal(ks[0], (factor, d_seg), jnp.float32),
        "sender": _init_attn(ks[1], d_seg),
        "receiver": _init_attn(ks[2], d_seg),
        "norm1": _init_ln(d_seg),
        "norm2": _init_ln(d_seg),
        "mlp": _init_mlp(ks[3], d_seg, d_ff, d_seg),
    }
    w_pred, b_pred = _init_linear(ks[6], d_seg, seg_len)
    return {
        "self_attn": self_attn,
        "cross_attn": _init_attn(ks[4], d_seg),
        "norm1": _init_ln(d_seg),
        "norm2": _init_ln(d_seg),
        "mlp1": _init_mlp(ks[5], d_seg, d_seg, d_seg),  # Linear(d,d)->GELU->Linear(d,d)
        "linear_pred": {"w": w_pred, "b": b_pred},
    }


# ---------------------------------------------------------------------------
if __name__ == "__main__":
    B, L, S, D = 2, 8, 16, 32          # batch, out_seg_num, cross seq, d_seg
    n_heads, d_ff, factor, seg_len = 4, 64, 4, 16

    key = jax.random.PRNGKey(0)
    kx, kc, kp = jax.random.split(key, 3)
    x = jax.random.normal(kx, (B, L, D), jnp.float32)
    cross = jax.random.normal(kc, (B, S, D), jnp.float32)
    params = init_params(kp, D, d_ff, factor, seg_len)

    packed = pack_params(params, n_heads)          # one-time packing, outside jit

    fwd = jax.jit(functools.partial(decoder_block_router, n_heads=n_heads,
                                    d_ff=d_ff, seg_len=seg_len, factor=factor))
    dec_out, layer_pred = fwd(x, cross, packed)
    jax.block_until_ready((dec_out, layer_pred))

    assert dec_out.shape == (B, L, D)
    assert layer_pred.shape == (B, L, seg_len)

    with jax.default_matmul_precision("highest"):
        ref_dec, ref_pred = reference_forward(x, cross, params, n_heads)
    np.testing.assert_allclose(np.asarray(dec_out), np.asarray(ref_dec),
                               atol=2e-2, rtol=2e-2)
    np.testing.assert_allclose(np.asarray(layer_pred), np.asarray(ref_pred),
                               atol=2e-2, rtol=2e-2)

    print("KERNEL_OK")
</pallas_src>

<mosaic_0001>
module attributes {stable_mosaic.version = 11 : i64} {
  func.func @_decoder_block_kernel(%arg0: i32, %arg1: memref<16x32xf32, #tpu.memory_space<vmem>>, %arg2: memref<32x32xf32, #tpu.memory_space<vmem>>, %arg3: memref<8x32x32xf32, #tpu.memory_space<vmem>>, %arg4: memref<5x32x64xf32, #tpu.memory_space<vmem>>, %arg5: memref<64x32xf32, #tpu.memory_space<vmem>>, %arg6: memref<27x32xf32, #tpu.memory_space<vmem>>, %arg7: memref<2x64xf32, #tpu.memory_space<vmem>>, %arg8: memref<16x64xf32, #tpu.memory_space<vmem>>) attributes {dimension_semantics = [#tpu.dimension_semantics<arbitrary>], iteration_bounds = array<i64: 1>, scalar_prefetch = 0 : i64, scratch_operands = 0 : i64, tpu.core_type = #tpu.core_type<tc>, window_params = [{pipeline_mode = #tpu.pipeline_mode<synchronous>, transform_indices = @transform_0, window_bounds = array<i64: 16, 32>}, {pipeline_mode = #tpu.pipeline_mode<synchronous>, transform_indices = @transform_1, window_bounds = array<i64: 32, 32>}, {pipeline_mode = #tpu.pipeline_mode<synchronous>, transform_indices = @transform_2, window_bounds = array<i64: 8, 32, 32>}, {pipeline_mode = #tpu.pipeline_mode<synchronous>, transform_indices = @transform_3, window_bounds = array<i64: 5, 32, 64>}, {pipeline_mode = #tpu.pipeline_mode<synchronous>, transform_indices = @transform_4, window_bounds = array<i64: 64, 32>}, {pipeline_mode = #tpu.pipeline_mode<synchronous>, transform_indices = @transform_5, window_bounds = array<i64: 27, 32>}, {pipeline_mode = #tpu.pipeline_mode<synchronous>, transform_indices = @transform_6, window_bounds = array<i64: 2, 64>}, {pipeline_mode = #tpu.pipeline_mode<synchronous>, transform_indices = @transform_7, window_bounds = array<i64: 16, 64>}]} {
    %c0 = arith.constant 0 : index
    %c0_0 = arith.constant 0 : index
    %0 = vector.load %arg6[%c0, %c0_0] : memref<27x32xf32, #tpu.memory_space<vmem>>, vector<27x32xf32>
    %c0_1 = arith.constant 0 : index
    %c0_2 = arith.constant 0 : index
    %1 = vector.load %arg7[%c0_1, %c0_2] : memref<2x64xf32, #tpu.memory_space<vmem>>, vector<2x64xf32>
    %c0_3 = arith.constant 0 : index
    %c0_4 = arith.constant 0 : index
    %2 = vector.load %arg1[%c0_3, %c0_4] : memref<16x32xf32, #tpu.memory_space<vmem>>, vector<16x32xf32>
    %c0_5 = arith.constant 0 : index
    %c0_6 = arith.constant 0 : index
    %3 = vector.load %arg2[%c0_5, %c0_6] : memref<32x32xf32, #tpu.memory_space<vmem>>, vector<32x32xf32>
    %4 = vector.extract_strided_slice %0 {offsets = [0, 0], sizes = [4, 32], strides = [1, 1]} : vector<27x32xf32> to vector<4x32xf32>
    %c0_7 = arith.constant 0 : index
    %c0_8 = arith.constant 0 : index
    %c0_9 = arith.constant 0 : index
    %5 = vector.load %arg3[%c0_7, %c0_8, %c0_9] : memref<8x32x32xf32, #tpu.memory_space<vmem>>, vector<1x32x32xf32>
    %6 = vector.shape_cast %5 : vector<1x32x32xf32> to vector<32x32xf32>
    %c1 = arith.constant 1 : index
    %c0_10 = arith.constant 0 : index
    %c0_11 = arith.constant 0 : index
    %7 = vector.load %arg3[%c1, %c0_10, %c0_11] : memref<8x32x32xf32, #tpu.memory_space<vmem>>, vector<1x32x32xf32>
    %8 = vector.shape_cast %7 : vector<1x32x32xf32> to vector<32x32xf32>
    %c0_12 = arith.constant 0 : index
    %c0_13 = arith.constant 0 : index
    %c0_14 = arith.constant 0 : index
    %9 = vector.load %arg4[%c0_12, %c0_13, %c0_14] : memref<5x32x64xf32, #tpu.memory_space<vmem>>, vector<1x32x64xf32>
    %10 = vector.shape_cast %9 : vector<1x32x64xf32> to vector<32x64xf32>
    %11 = vector.extract_strided_slice %0 {offsets = [4, 0], sizes = [1, 32], strides = [1, 1]} : vector<27x32xf32> to vector<1x32xf32>
    %12 = vector.extract_strided_slice %0 {offsets = [5, 0], sizes = [1, 32], strides = [1, 1]} : vector<27x32xf32> to vector<1x32xf32>
    %13 = vector.extract_strided_slice %0 {offsets = [6, 0], sizes = [1, 32], strides = [1, 1]} : vector<27x32xf32> to vector<1x32xf32>
    %14 = vector.extract_strided_slice %0 {offsets = [7, 0], sizes = [1, 32], strides = [1, 1]} : vector<27x32xf32> to vector<1x32xf32>
    %cst = arith.constant dense<0.000000e+00> : vector<4x32xf32>
    %15 = tpu.matmul %4, %6, %cst {dimension_numbers = #tpu.dot_dimension_numbers<[1], [0], [0], [1], [0, 0, 1, 1], [], []>} : vector<4x32xf32>, vector<32x32xf32>, vector<4x32xf32> -> vector<4x32xf32>
    %16 = vector.broadcast %11 : vector<1x32xf32> to vector<4x32xf32>
    %17 = arith.addf %15, %16 : vector<4x32xf32>
    %cst_15 = arith.constant dense<0.000000e+00> : vector<16x64xf32>
    %18 = tpu.matmul %2, %10, %cst_15 {dimension_numbers = #tpu.dot_dimension_numbers<[1], [0], [0], [1], [0, 0, 1, 1], [], []>} : vector<16x32xf32>, vector<32x64xf32>, vector<16x64xf32> -> vector<16x64xf32>
    %19 = vector.extract_strided_slice %18 {offsets = [0, 0], sizes = [16, 32], strides = [1, 1]} : vector<16x64xf32> to vector<16x32xf32>
    %20 = vector.broadcast %12 : vector<1x32xf32> to vector<16x32xf32>
    %21 = arith.addf %19, %20 : vector<16x32xf32>
    %22 = vector.extract_strided_slice %18 {offsets = [0, 32], sizes = [16, 32], strides = [1, 1]} : vector<16x64xf32> to vector<16x32xf32>
    %23 = vector.broadcast %13 : vector<1x32xf32> to vector<16x32xf32>
    %24 = arith.addf %22, %23 : vector<16x32xf32>
    %25 = vector.extract_strided_slice %21 {offsets = [0, 0], sizes = [8, 32], strides = [1, 1]} : vector<16x32xf32> to vector<8x32xf32>
    %26 = vector.extract_strided_slice %24 {offsets = [0, 0], sizes = [8, 32], strides = [1, 1]} : vector<16x32xf32> to vector<8x32xf32>
    %27 = vector.extract_strided_slice %17 {offsets = [0, 0], sizes = [4, 8], strides = [1, 1]} : vector<4x32xf32> to vector<4x8xf32>
    %28 = vector.extract_strided_slice %25 {offsets = [0, 0], sizes = [8, 8], strides = [1, 1]} : vector<8x32xf32> to vector<8x8xf32>
    %cst_16 = arith.constant dense<0.000000e+00> : vector<4x8xf32>
    %29 = tpu.matmul %27, %28, %cst_16 {dimension_numbers = #tpu.dot_dimension_numbers<[1], [1], [0], [0], [0, 0, 1, 0], [], []>} : vector<4x8xf32>, vector<8x8xf32>, vector<4x8xf32> -> vector<4x8xf32>
    %cst_17 = arith.constant dense<0xFF800000> : vector<4xf32>
    %30 = vector.multi_reduction <maximumf>, %29, %cst_17 [1] : vector<4x8xf32> to vector<4xf32>
    %31 = vector.shape_cast %30 : vector<4xf32> to vector<4x1xf32>
    %32 = vector.broadcast %31 : vector<4x1xf32> to vector<4x8xf32>
    %33 = arith.subf %29, %32 : vector<4x8xf32>
    %34 = math.exp %33 : vector<4x8xf32>
    %cst_18 = arith.constant dense<0.000000e+00> : vector<4xf32>
    %35 = vector.multi_reduction <add>, %34, %cst_18 [1] : vector<4x8xf32> to vector<4xf32>
    %36 = vector.shape_cast %35 : vector<4xf32> to vector<4x1xf32>
    %37 = tpu.reciprocal %36 {approx = true} : vector<4x1xf32> -> vector<4x1xf32>
    %38 = vector.broadcast %37 : vector<4x1xf32> to vector<4x8xf32>
    %39 = arith.mulf %34, %38 : vector<4x8xf32>
    %40 = vector.extract_strided_slice %26 {offsets = [0, 0], sizes = [8, 8], strides = [1, 1]} : vector<8x32xf32> to vector<8x8xf32>
    %cst_19 = arith.constant dense<0.000000e+00> : vector<4x8xf32>
    %41 = tpu.matmul %39, %40, %cst_19 {dimension_numbers = #tpu.dot_dimension_numbers<[1], [0], [0], [1], [0, 0, 1, 1], [], []>} : vector<4x8xf32>, vector<8x8xf32>, vector<4x8xf32> -> vector<4x8xf32>
    %42 = vector.extract_strided_slice %17 {offsets = [0, 8], sizes = [4, 8], strides = [1, 1]} : vector<4x32xf32> to vector<4x8xf32>
    %43 = vector.extract_strided_slice %25 {offsets = [0, 8], sizes = [8, 8], strides = [1, 1]} : vector<8x32xf32> to vector<8x8xf32>
    %cst_20 = arith.constant dense<0.000000e+00> : vector<4x8xf32>
    %44 = tpu.matmul %42, %43, %cst_20 {dimension_numbers = #tpu.dot_dimension_numbers<[1], [1], [0], [0], [0, 0, 1, 0], [], []>} : vector<4x8xf32>, vector<8x8xf32>, vector<4x8xf32> -> vector<4x8xf32>
    %cst_21 = arith.constant dense<0xFF800000> : vector<4xf32>
    %45 = vector.multi_reduction <maximumf>, %44, %cst_21 [1] : vector<4x8xf32> to vector<4xf32>
    %46 = vector.shape_cast %45 : vector<4xf32> to vector<4x1xf32>
    %47 = vector.broadcast %46 : vector<4x1xf32> to vector<4x8xf32>
    %48 = arith.subf %44, %47 : vector<4x8xf32>
    %49 = math.exp %48 : vector<4x8xf32>
    %cst_22 = arith.constant dense<0.000000e+00> : vector<4xf32>
    %50 = vector.multi_reduction <add>, %49, %cst_22 [1] : vector<4x8xf32> to vector<4xf32>
    %51 = vector.shape_cast %50 : vector<4xf32> to vector<4x1xf32>
    %52 = tpu.reciprocal %51 {approx = true} : vector<4x1xf32> -> vector<4x1xf32>
    %53 = vector.broadcast %52 : vector<4x1xf32> to vector<4x8xf32>
    %54 = arith.mulf %49, %53 : vector<4x8xf32>
    %55 = vector.extract_strided_slice %26 {offsets = [0, 8], sizes = [8, 8], strides = [1, 1]} : vector<8x32xf32> to vector<8x8xf32>
    %cst_23 = arith.constant dense<0.000000e+00> : vector<4x8xf32>
    %56 = tpu.matmul %54, %55, %cst_23 {dimension_numbers = #tpu.dot_dimension_numbers<[1], [0], [0], [1], [0, 0, 1, 1], [], []>} : vector<4x8xf32>, vector<8x8xf32>, vector<4x8xf32> -> vector<4x8xf32>
    %57 = vector.extract_strided_slice %17 {offsets = [0, 16], sizes = [4, 8], strides = [1, 1]} : vector<4x32xf32> to vector<4x8xf32>
    %58 = vector.extract_strided_slice %25 {offsets = [0, 16], sizes = [8, 8], strides = [1, 1]} : vector<8x32xf32> to vector<8x8xf32>
    %cst_24 = arith.constant dense<0.000000e+00> : vector<4x8xf32>
    %59 = tpu.matmul %57, %58, %cst_24 {dimension_numbers = #tpu.dot_dimension_numbers<[1], [1], [0], [0], [0, 0, 1, 0], [], []>} : vector<4x8xf32>, vector<8x8xf32>, vector<4x8xf32> -> vector<4x8xf32>
    %cst_25 = arith.constant dense<0xFF800000> : vector<4xf32>
    %60 = vector.multi_reduction <maximumf>, %59, %cst_25 [1] : vector<4x8xf32> to vector<4xf32>
    %61 = vector.shape_cast %60 : vector<4xf32> to vector<4x1xf32>
    %62 = vector.broadcast %61 : vector<4x1xf32> to vector<4x8xf32>
    %63 = arith.subf %59, %62 : vector<4x8xf32>
    %64 = math.exp %63 : vector<4x8xf32>
    %cst_26 = arith.constant dense<0.000000e+00> : vector<4xf32>
    %65 = vector.multi_reduction <add>, %64, %cst_26 [1] : vector<4x8xf32> to vector<4xf32>
    %66 = vector.shape_cast %65 : vector<4xf32> to vector<4x1xf32>
    %67 = tpu.reciprocal %66 {approx = true} : vector<4x1xf32> -> vector<4x1xf32>
    %68 = vector.broadcast %67 : vector<4x1xf32> to vector<4x8xf32>
    %69 = arith.mulf %64, %68 : vector<4x8xf32>
    %70 = vector.extract_strided_slice %26 {offsets = [0, 16], sizes = [8, 8], strides = [1, 1]} : vector<8x32xf32> to vector<8x8xf32>
    %cst_27 = arith.constant dense<0.000000e+00> : vector<4x8xf32>
    %71 = tpu.matmul %69, %70, %cst_27 {dimension_numbers = #tpu.dot_dimension_numbers<[1], [0], [0], [1], [0, 0, 1, 1], [], []>} : vector<4x8xf32>, vector<8x8xf32>, vector<4x8xf32> -> vector<4x8xf32>
    %72 = vector.extract_strided_slice %17 {offsets = [0, 24], sizes = [4, 8], strides = [1, 1]} : vector<4x32xf32> to vector<4x8xf32>
    %73 = vector.extract_strided_slice %25 {offsets = [0, 24], sizes = [8, 8], strides = [1, 1]} : vector<8x32xf32> to vector<8x8xf32>
    %cst_28 = arith.constant dense<0.000000e+00> : vector<4x8xf32>
    %74 = tpu.matmul %72, %73, %cst_28 {dimension_numbers = #tpu.dot_dimension_numbers<[1], [1], [0], [0], [0, 0, 1, 0], [], []>} : vector<4x8xf32>, vector<8x8xf32>, vector<4x8xf32> -> vector<4x8xf32>
    %cst_29 = arith.constant dense<0xFF800000> : vector<4xf32>
    %75 = vector.multi_reduction <maximumf>, %74, %cst_29 [1] : vector<4x8xf32> to vector<4xf32>
    %76 = vector.shape_cast %75 : vector<4xf32> to vector<4x1xf32>
    %77 = vector.broadcast %76 : vector<4x1xf32> to vector<4x8xf32>
    %78 = arith.subf %74, %77 : vector<4x8xf32>
    %79 = math.exp %78 : vector<4x8xf32>
    %cst_30 = arith.constant dense<0.000000e+00> : vector<4xf32>
    %80 = vector.multi_reduction <add>, %79, %cst_30 [1] : vector<4x8xf32> to vector<4xf32>
    %81 = vector.shape_cast %80 : vector<4xf32> to vector<4x1xf32>
    %82 = tpu.reciprocal %81 {approx = true} : vector<4x1xf32> -> vector<4x1xf32>
    %83 = vector.broadcast %82 : vector<4x1xf32> to vector<4x8xf32>
    %84 = arith.mulf %79, %83 : vector<4x8xf32>
    %85 = vector.extract_strided_slice %26 {offsets = [0, 24], sizes = [8, 8], strides = [1, 1]} : vector<8x32xf32> to vector<8x8xf32>
    %cst_31 = arith.constant dense<0.000000e+00> : vector<4x8xf32>
    %86 = tpu.matmul %84, %85, %cst_31 {dimension_numbers = #tpu.dot_dimension_numbers<[1], [0], [0], [1], [0, 0, 1, 1], [], []>} : vector<4x8xf32>, vector<8x8xf32>, vector<4x8xf32> -> vector<4x8xf32>
    %87 = tpu.concatenate %41, %56, %71, %86 in 1 : vector<4x8xf32>, vector<4x8xf32>, vector<4x8xf32>, vector<4x8xf32> -> vector<4x32xf32>
    %88 = vector.extract_strided_slice %21 {offsets = [8, 0], sizes = [8, 32], strides = [1, 1]} : vector<16x32xf32> to vector<8x32xf32>
    %89 = vector.extract_strided_slice %24 {offsets = [8, 0], sizes = [8, 32], strides = [1, 1]} : vector<16x32xf32> to vector<8x32xf32>
    %90 = vector.extract_strided_slice %17 {offsets = [0, 0], sizes = [4, 8], strides = [1, 1]} : vector<4x32xf32> to vector<4x8xf32>
    %91 = vector.extract_strided_slice %88 {offsets = [0, 0], sizes = [8, 8], strides = [1, 1]} : vector<8x32xf32> to vector<8x8xf32>
    %cst_32 = arith.constant dense<0.000000e+00> : vector<4x8xf32>
    %92 = tpu.matmul %90, %91, %cst_32 {dimension_numbers = #tpu.dot_dimension_numbers<[1], [1], [0], [0], [0, 0, 1, 0], [], []>} : vector<4x8xf32>, vector<8x8xf32>, vector<4x8xf32> -> vector<4x8xf32>
    %cst_33 = arith.constant dense<0xFF800000> : vector<4xf32>
    %93 = vector.multi_reduction <maximumf>, %92, %cst_33 [1] : vector<4x8xf32> to vector<4xf32>
    %94 = vector.shape_cast %93 : vector<4xf32> to vector<4x1xf32>
    %95 = vector.broadcast %94 : vector<4x1xf32> to vector<4x8xf32>
    %96 = arith.subf %92, %95 : vector<4x8xf32>
    %97 = math.exp %96 : vector<4x8xf32>
    %cst_34 = arith.constant dense<0.000000e+00> : vector<4xf32>
    %98 = vector.multi_reduction <add>, %97, %cst_34 [1] : vector<4x8xf32> to vector<4xf32>
    %99 = vector.shape_cast %98 : vector<4xf32> to vector<4x1xf32>
    %100 = tpu.reciprocal %99 {approx = true} : vector<4x1xf32> -> vector<4x1xf32>
    %101 = vector.broadcast %100 : vector<4x1xf32> to vector<4x8xf32>
    %102 = arith.mulf %97, %101 : vector<4x8xf32>
    %103 = vector.extract_strided_slice %89 {offsets = [0, 0], sizes = [8, 8], strides = [1, 1]} : vector<8x32xf32> to vector<8x8xf32>
    %cst_35 = arith.constant dense<0.000000e+00> : vector<4x8xf32>
    %104 = tpu.matmul %102, %103, %cst_35 {dimension_numbers = #tpu.dot_dimension_numbers<[1], [0], [0], [1], [0, 0, 1, 1], [], []>} : vector<4x8xf32>, vector<8x8xf32>, vector<4x8xf32> -> vector<4x8xf32>
    %105 = vector.extract_strided_slice %17 {offsets = [0, 8], sizes = [4, 8], strides = [1, 1]} : vector<4x32xf32> to vector<4x8xf32>
    %106 = vector.extract_strided_slice %88 {offsets = [0, 8], sizes = [8, 8], strides = [1, 1]} : vector<8x32xf32> to vector<8x8xf32>
    %cst_36 = arith.constant dense<0.000000e+00> : vector<4x8xf32>
    %107 = tpu.matmul %105, %106, %cst_36 {dimension_numbers = #tpu.dot_dimension_numbers<[1], [1], [0], [0], [0, 0, 1, 0], [], []>} : vector<4x8xf32>, vector<8x8xf32>, vector<4x8xf32> -> vector<4x8xf32>
    %cst_37 = arith.constant dense<0xFF800000> : vector<4xf32>
    %108 = vector.multi_reduction <maximumf>, %107, %cst_37 [1] : vector<4x8xf32> to vector<4xf32>
    %109 = vector.shape_cast %108 : vector<4xf32> to vector<4x1xf32>
    %110 = vector.broadcast %109 : vector<4x1xf32> to vector<4x8xf32>
    %111 = arith.subf %107, %110 : vector<4x8xf32>
    %112 = math.exp %111 : vector<4x8xf32>
    %cst_38 = arith.constant dense<0.000000e+00> : vector<4xf32>
    %113 = vector.multi_reduction <add>, %112, %cst_38 [1] : vector<4x8xf32> to vector<4xf32>
    %114 = vector.shape_cast %113 : vector<4xf32> to vector<4x1xf32>
    %115 = tpu.reciprocal %114 {approx = true} : vector<4x1xf32> -> vector<4x1xf32>
    %116 = vector.broadcast %115 : vector<4x1xf32> to vector<4x8xf32>
    %117 = arith.mulf %112, %116 : vector<4x8xf32>
    %118 = vector.extract_strided_slice %89 {offsets = [0, 8], sizes = [8, 8], strides = [1, 1]} : vector<8x32xf32> to vector<8x8xf32>
    %cst_39 = arith.constant dense<0.000000e+00> : vector<4x8xf32>
    %119 = tpu.matmul %117, %118, %cst_39 {dimension_numbers = #tpu.dot_dimension_numbers<[1], [0], [0], [1], [0, 0, 1, 1], [], []>} : vector<4x8xf32>, vector<8x8xf32>, vector<4x8xf32> -> vector<4x8xf32>
    %120 = vector.extract_strided_slice %17 {offsets = [0, 16], sizes = [4, 8], strides = [1, 1]} : vector<4x32xf32> to vector<4x8xf32>
    %121 = vector.extract_strided_slice %88 {offsets = [0, 16], sizes = [8, 8], strides = [1, 1]} : vector<8x32xf32> to vector<8x8xf32>
    %cst_40 = arith.constant dense<0.000000e+00> : vector<4x8xf32>
    %122 = tpu.matmul %120, %121, %cst_40 {dimension_numbers = #tpu.dot_dimension_numbers<[1], [1], [0], [0], [0, 0, 1, 0], [], []>} : vector<4x8xf32>, vector<8x8xf32>, vector<4x8xf32> -> vector<4x8xf32>
    %cst_41 = arith.constant dense<0xFF800000> : vector<4xf32>
    %123 = vector.multi_reduction <maximumf>, %122, %cst_41 [1] : vector<4x8xf32> to vector<4xf32>
    %124 = vector.shape_cast %123 : vector<4xf32> to vector<4x1xf32>
    %125 = vector.broadcast %124 : vector<4x1xf32> to vector<4x8xf32>
    %126 = arith.subf %122, %125 : vector<4x8xf32>
    %127 = math.exp %126 : vector<4x8xf32>
    %cst_42 = arith.constant dense<0.000000e+00> : vector<4xf32>
    %128 = vector.multi_reduction <add>, %127, %cst_42 [1] : vector<4x8xf32> to vector<4xf32>
    %129 = vector.shape_cast %128 : vector<4xf32> to vector<4x1xf32>
    %130 = tpu.reciprocal %129 {approx = true} : vector<4x1xf32> -> vector<4x1xf32>
    %131 = vector.broadcast %130 : vector<4x1xf32> to vector<4x8xf32>
    %132 = arith.mulf %127, %131 : vector<4x8xf32>
    %133 = vector.extract_strided_slice %89 {offsets = [0, 16], sizes = [8, 8], strides = [1, 1]} : vector<8x32xf32> to vector<8x8xf32>
    %cst_43 = arith.constant dense<0.000000e+00> : vector<4x8xf32>
    %134 = tpu.matmul %132, %133, %cst_43 {dimension_numbers = #tpu.dot_dimension_numbers<[1], [0], [0], [1], [0, 0, 1, 1], [], []>} : vector<4x8xf32>, vector<8x8xf32>, vector<4x8xf32> -> vector<4x8xf32>
    %135 = vector.extract_strided_slice %17 {offsets = [0, 24], sizes = [4, 8], strides = [1, 1]} : vector<4x32xf32> to vector<4x8xf32>
    %136 = vector.extract_strided_slice %88 {offsets = [0, 24], sizes = [8, 8], strides = [1, 1]} : vector<8x32xf32> to vector<8x8xf32>
    %cst_44 = arith.constant dense<0.000000e+00> : vector<4x8xf32>
    %137 = tpu.matmul %135, %136, %cst_44 {dimension_numbers = #tpu.dot_dimension_numbers<[1], [1], [0], [0], [0, 0, 1, 0], [], []>} : vector<4x8xf32>, vector<8x8xf32>, vector<4x8xf32> -> vector<4x8xf32>
    %cst_45 = arith.constant dense<0xFF800000> : vector<4xf32>
    %138 = vector.multi_reduction <maximumf>, %137, %cst_45 [1] : vector<4x8xf32> to vector<4xf32>
    %139 = vector.shape_cast %138 : vector<4xf32> to vector<4x1xf32>
    %140 = vector.broadcast %139 : vector<4x1xf32> to vector<4x8xf32>
    %141 = arith.subf %137, %140 : vector<4x8xf32>
    %142 = math.exp %141 : vector<4x8xf32>
    %cst_46 = arith.constant dense<0.000000e+00> : vector<4xf32>
    %143 = vector.multi_reduction <add>, %142, %cst_46 [1] : vector<4x8xf32> to vector<4xf32>
    %144 = vector.shape_cast %143 : vector<4xf32> to vector<4x1xf32>
    %145 = tpu.reciprocal %144 {approx = true} : vector<4x1xf32> -> vector<4x1xf32>
    %146 = vector.broadcast %145 : vector<4x1xf32> to vector<4x8xf32>
    %147 = arith.mulf %142, %146 : vector<4x8xf32>
    %148 = vector.extract_strided_slice %89 {offsets = [0, 24], sizes = [8, 8], strides = [1, 1]} : vector<8x32xf32> to vector<8x8xf32>
    %cst_47 = arith.constant dense<0.000000e+00> : vector<4x8xf32>
    %149 = tpu.matmul %147, %148, %cst_47 {dimension_numbers = #tpu.dot_dimension_numbers<[1], [0], [0], [1], [0, 0, 1, 1], [], []>} : vector<4x8xf32>, vector<8x8xf32>, vector<4x8xf32> -> vector<4x8xf32>
    %150 = tpu.concatenate %104, %119, %134, %149 in 1 : vector<4x8xf32>, vector<4x8xf32>, vector<4x8xf32>, vector<4x8xf32> -> vector<4x32xf32>
    %151 = tpu.concatenate %87, %150 in 0 : vector<4x32xf32>, vector<4x32xf32> -> vector<8x32xf32>
    %cst_48 = arith.constant dense<0.000000e+00> : vector<8x32xf32>
    %152 = tpu.matmul %151, %8, %cst_48 {dimension_numbers = #tpu.dot_dimension_numbers<[1], [0], [0], [1], [0, 0, 1, 1], [], []>} : vector<8x32xf32>, vector<32x32xf32>, vector<8x32xf32> -> vector<8x32xf32>
    %153 = vector.broadcast %14 : vector<1x32xf32> to vector<8x32xf32>
    %154 = arith.addf %152, %153 : vector<8x32xf32>
    %c2 = arith.constant 2 : index
    %c0_49 = arith.constant 0 : index
    %c0_50 = arith.constant 0 : index
    %155 = vector.load %arg3[%c2, %c0_49, %c0_50] : memref<8x32x32xf32, #tpu.memory_space<vmem>>, vector<1x32x32xf32>
    %156 = vector.shape_cast %155 : vector<1x32x32xf32> to vector<32x32xf32>
    %c3 = arith.constant 3 : index
    %c0_51 = arith.constant 0 : index
    %c0_52 = arith.constant 0 : index
    %157 = vector.load %arg3[%c3, %c0_51, %c0_52] : memref<8x32x32xf32, #tpu.memory_space<vmem>>, vector<1x32x32xf32>
    %158 = vector.shape_cast %157 : vector<1x32x32xf32> to vector<32x32xf32>
    %c1_53 = arith.constant 1 : index
    %c0_54 = arith.constant 0 : index
    %c0_55 = arith.constant 0 : index
    %159 = vector.load %arg4[%c1_53, %c0_54, %c0_55] : memref<5x32x64xf32, #tpu.memory_space<vmem>>, vector<1x32x64xf32>
    %160 = vector.shape_cast %159 : vector<1x32x64xf32> to vector<32x64xf32>
    %161 = vector.extract_strided_slice %0 {offsets = [8, 0], sizes = [1, 32], strides = [1, 1]} : vector<27x32xf32> to vector<1x32xf32>
    %162 = vector.extract_strided_slice %0 {offsets = [9, 0], sizes = [1, 32], strides = [1, 1]} : vector<27x32xf32> to vector<1x32xf32>
    %163 = vector.extract_strided_slice %0 {offsets = [10, 0], sizes = [1, 32], strides = [1, 1]} : vector<27x32xf32> to vector<1x32xf32>
    %164 = vector.extract_strided_slice %0 {offsets = [11, 0], sizes = [1, 32], strides = [1, 1]} : vector<27x32xf32> to vector<1x32xf32>
    %cst_56 = arith.constant dense<0.000000e+00> : vector<16x32xf32>
    %165 = tpu.matmul %2, %156, %cst_56 {dimension_numbers = #tpu.dot_dimension_numbers<[1], [0], [0], [1], [0, 0, 1, 1], [], []>} : vector<16x32xf32>, vector<32x32xf32>, vector<16x32xf32> -> vector<16x32xf32>
    %166 = vector.broadcast %161 : vector<1x32xf32> to vector<16x32xf32>
    %167 = arith.addf %165, %166 : vector<16x32xf32>
    %cst_57 = arith.constant dense<0.000000e+00> : vector<8x64xf32>
    %168 = tpu.matmul %154, %160, %cst_57 {dimension_numbers = #tpu.dot_dimension_numbers<[1], [0], [0], [1], [0, 0, 1, 1], [], []>} : vector<8x32xf32>, vector<32x64xf32>, vector<8x64xf32> -> vector<8x64xf32>
    %169 = vector.extract_strided_slice %168 {offsets = [0, 0], sizes = [8, 32], strides = [1, 1]} : vector<8x64xf32> to vector<8x32xf32>
    %170 = vector.broadcast %162 : vector<1x32xf32> to vector<8x32xf32>
    %171 = arith.addf %169, %170 : vector<8x32xf32>
    %172 = vector.extract_strided_slice %168 {offsets = [0, 32], sizes = [8, 32], strides = [1, 1]} : vector<8x64xf32> to vector<8x32xf32>
    %173 = vector.broadcast %163 : vector<1x32xf32> to vector<8x32xf32>
    %174 = arith.addf %172, %173 : vector<8x32xf32>
    %175 = vector.extract_strided_slice %167 {offsets = [0, 0], sizes = [8, 32], strides = [1, 1]} : vector<16x32xf32> to vector<8x32xf32>
    %176 = vector.extract_strided_slice %171 {offsets = [0, 0], sizes = [4, 32], strides = [1, 1]} : vector<8x32xf32> to vector<4x32xf32>
    %177 = vector.extract_strided_slice %174 {offsets = [0, 0], sizes = [4, 32], strides = [1, 1]} : vector<8x32xf32> to vector<4x32xf32>
    %178 = vector.extract_strided_slice %175 {offsets = [0, 0], sizes = [8, 8], strides = [1, 1]} : vector<8x32xf32> to vector<8x8xf32>
    %179 = vector.extract_strided_slice %176 {offsets = [0, 0], sizes = [4, 8], strides = [1, 1]} : vector<4x32xf32> to vector<4x8xf32>
    %cst_58 = arith.constant dense<0.000000e+00> : vector<8x4xf32>
    %180 = tpu.matmul %178, %179, %cst_58 {dimension_numbers = #tpu.dot_dimension_numbers<[1], [1], [0], [0], [0, 0, 1, 0], [], []>} : vector<8x8xf32>, vector<4x8xf32>, vector<8x4xf32> -> vector<8x4xf32>
    %cst_59 = arith.constant dense<0xFF800000> : vector<8xf32>
    %181 = vector.multi_reduction <maximumf>, %180, %cst_59 [1] : vector<8x4xf32> to vector<8xf32>
    %182 = vector.shape_cast %181 : vector<8xf32> to vector<8x1xf32>
    %183 = vector.broadcast %182 : vector<8x1xf32> to vector<8x4xf32>
    %184 = arith.subf %180, %183 : vector<8x4xf32>
    %185 = math.exp %184 : vector<8x4xf32>
    %cst_60 = arith.constant dense<0.000000e+00> : vector<8xf32>
    %186 = vector.multi_reduction <add>, %185, %cst_60 [1] : vector<8x4xf32> to vector<8xf32>
    %187 = vector.shape_cast %186 : vector<8xf32> to vector<8x1xf32>
    %188 = tpu.reciprocal %187 {approx = true} : vector<8x1xf32> -> vector<8x1xf32>
    %189 = vector.broadcast %188 : vector<8x1xf32> to vector<8x4xf32>
    %190 = arith.mulf %185, %189 : vector<8x4xf32>
    %191 = vector.extract_strided_slice %177 {offsets = [0, 0], sizes = [4, 8], strides = [1, 1]} : vector<4x32xf32> to vector<4x8xf32>
    %cst_61 = arith.constant dense<0.000000e+00> : vector<8x8xf32>
    %192 = tpu.matmul %190, %191, %cst_61 {dimension_numbers = #tpu.dot_dimension_numbers<[1], [0], [0], [1], [0, 0, 1, 1], [], []>} : vector<8x4xf32>, vector<4x8xf32>, vector<8x8xf32> -> vector<8x8xf32>
    %193 = vector.extract_strided_slice %175 {offsets = [0, 8], sizes = [8, 8], strides = [1, 1]} : vector<8x32xf32> to vector<8x8xf32>
    %194 = vector.extract_strided_slice %176 {offsets = [0, 8], sizes = [4, 8], strides = [1, 1]} : vector<4x32xf32> to vector<4x8xf32>
    %cst_62 = arith.constant dense<0.000000e+00> : vector<8x4xf32>
    %195 = tpu.matmul %193, %194, %cst_62 {dimension_numbers = #tpu.dot_dimension_numbers<[1], [1], [0], [0], [0, 0, 1, 0], [], []>} : vector<8x8xf32>, vector<4x8xf32>, vector<8x4xf32> -> vector<8x4xf32>
    %cst_63 = arith.constant dense<0xFF800000> : vector<8xf32>
    %196 = vector.multi_reduction <maximumf>, %195, %cst_63 [1] : vector<8x4xf32> to vector<8xf32>
    %197 = vector.shape_cast %196 : vector<8xf32> to vector<8x1xf32>
    %198 = vector.broadcast %197 : vector<8x1xf32> to vector<8x4xf32>
    %199 = arith.subf %195, %198 : vector<8x4xf32>
    %200 = math.exp %199 : vector<8x4xf32>
    %cst_64 = arith.constant dense<0.000000e+00> : vector<8xf32>
    %201 = vector.multi_reduction <add>, %200, %cst_64 [1] : vector<8x4xf32> to vector<8xf32>
    %202 = vector.shape_cast %201 : vector<8xf32> to vector<8x1xf32>
    %203 = tpu.reciprocal %202 {approx = true} : vector<8x1xf32> -> vector<8x1xf32>
    %204 = vector.broadcast %203 : vector<8x1xf32> to vector<8x4xf32>
    %205 = arith.mulf %200, %204 : vector<8x4xf32>
    %206 = vector.extract_strided_slice %177 {offsets = [0, 8], sizes = [4, 8], strides = [1, 1]} : vector<4x32xf32> to vector<4x8xf32>
    %cst_65 = arith.constant dense<0.000000e+00> : vector<8x8xf32>
    %207 = tpu.matmul %205, %206, %cst_65 {dimension_numbers = #tpu.dot_dimension_numbers<[1], [0], [0], [1], [0, 0, 1, 1], [], []>} : vector<8x4xf32>, vector<4x8xf32>, vector<8x8xf32> -> vector<8x8xf32>
    %208 = vector.extract_strided_slice %175 {offsets = [0, 16], sizes = [8, 8], strides = [1, 1]} : vector<8x32xf32> to vector<8x8xf32>
    %209 = vector.extract_strided_slice %176 {offsets = [0, 16], sizes = [4, 8], strides = [1, 1]} : vector<4x32xf32> to vector<4x8xf32>
    %cst_66 = arith.constant dense<0.000000e+00> : vector<8x4xf32>
    %210 = tpu.matmul %208, %209, %cst_66 {dimension_numbers = #tpu.dot_dimension_numbers<[1], [1], [0], [0], [0, 0, 1, 0], [], []>} : vector<8x8xf32>, vector<4x8xf32>, vector<8x4xf32> -> vector<8x4xf32>
    %cst_67 = arith.constant dense<0xFF800000> : vector<8xf32>
    %211 = vector.multi_reduction <maximumf>, %210, %cst_67 [1] : vector<8x4xf32> to vector<8xf32>
    %212 = vector.shape_cast %211 : vector<8xf32> to vector<8x1xf32>
    %213 = vector.broadcast %212 : vector<8x1xf32> to vector<8x4xf32>
    %214 = arith.subf %210, %213 : vector<8x4xf32>
    %215 = math.exp %214 : vector<8x4xf32>
    %cst_68 = arith.constant dense<0.000000e+00> : vector<8xf32>
    %216 = vector.multi_reduction <add>, %215, %cst_68 [1] : vector<8x4xf32> to vector<8xf32>
    %217 = vector.shape_cast %216 : vector<8xf32> to vector<8x1xf32>
    %218 = tpu.reciprocal %217 {approx = true} : vector<8x1xf32> -> vector<8x1xf32>
    %219 = vector.broadcast %218 : vector<8x1xf32> to vector<8x4xf32>
    %220 = arith.mulf %215, %219 : vector<8x4xf32>
    %221 = vector.extract_strided_slice %177 {offsets = [0, 16], sizes = [4, 8], strides = [1, 1]} : vector<4x32xf32> to vector<4x8xf32>
    %cst_69 = arith.constant dense<0.000000e+00> : vector<8x8xf32>
    %222 = tpu.matmul %220, %221, %cst_69 {dimension_numbers = #tpu.dot_dimension_numbers<[1], [0], [0], [1], [0, 0, 1, 1], [], []>} : vector<8x4xf32>, vector<4x8xf32>, vector<8x8xf32> -> vector<8x8xf32>
    %223 = vector.extract_strided_slice %175 {offsets = [0, 24], sizes = [8, 8], strides = [1, 1]} : vector<8x32xf32> to vector<8x8xf32>
    %224 = vector.extract_strided_slice %176 {offsets = [0, 24], sizes = [4, 8], strides = [1, 1]} : vector<4x32xf32> to vector<4x8xf32>
    %cst_70 = arith.constant dense<0.000000e+00> : vector<8x4xf32>
    %225 = tpu.matmul %223, %224, %cst_70 {dimension_numbers = #tpu.dot_dimension_numbers<[1], [1], [0], [0], [0, 0, 1, 0], [], []>} : vector<8x8xf32>, vector<4x8xf32>, vector<8x4xf32> -> vector<8x4xf32>
    %cst_71 = arith.constant dense<0xFF800000> : vector<8xf32>
    %226 = vector.multi_reduction <maximumf>, %225, %cst_71 [1] : vector<8x4xf32> to vector<8xf32>
    %227 = vector.shape_cast %226 : vector<8xf32> to vector<8x1xf32>
    %228 = vector.broadcast %227 : vector<8x1xf32> to vector<8x4xf32>
    %229 = arith.subf %225, %228 : vector<8x4xf32>
    %230 = math.exp %229 : vector<8x4xf32>
    %cst_72 = arith.constant dense<0.000000e+00> : vector<8xf32>
    %231 = vector.multi_reduction <add>, %230, %cst_72 [1] : vector<8x4xf32> to vector<8xf32>
    %232 = vector.shape_cast %231 : vector<8xf32> to vector<8x1xf32>
    %233 = tpu.reciprocal %232 {approx = true} : vector<8x1xf32> -> vector<8x1xf32>
    %234 = vector.broadcast %233 : vector<8x1xf32> to vector<8x4xf32>
    %235 = arith.mulf %230, %234 : vector<8x4xf32>
    %236 = vector.extract_strided_slice %177 {offsets = [0, 24], sizes = [4, 8], strides = [1, 1]} : vector<4x32xf32> to vector<4x8xf32>
    %cst_73 = arith.constant dense<0.000000e+00> : vector<8x8xf32>
    %237 = tpu.matmul %235, %236, %cst_73 {dimension_numbers = #tpu.dot_dimension_numbers<[1], [0], [0], [1], [0, 0, 1, 1], [], []>} : vector<8x4xf32>, vector<4x8xf32>, vector<8x8xf32> -> vector<8x8xf32>
    %238 = tpu.concatenate %192, %207, %222, %237 in 1 : vector<8x8xf32>, vector<8x8xf32>, vector<8x8xf32>, vector<8x8xf32> -> vector<8x32xf32>
    %239 = vector.extract_strided_slice %167 {offsets = [8, 0], sizes = [8, 32], strides = [1, 1]} : vector<16x32xf32> to vector<8x32xf32>
    %240 = vector.extract_strided_slice %171 {offsets = [4, 0], sizes = [4, 32], strides = [1, 1]} : vector<8x32xf32> to vector<4x32xf32>
    %241 = vector.extract_strided_slice %174 {offsets = [4, 0], sizes = [4, 32], strides = [1, 1]} : vector<8x32xf32> to vector<4x32xf32>
    %242 = vector.extract_strided_slice %239 {offsets = [0, 0], sizes = [8, 8], strides = [1, 1]} : vector<8x32xf32> to vector<8x8xf32>
    %243 = vector.extract_strided_slice %240 {offsets = [0, 0], sizes = [4, 8], strides = [1, 1]} : vector<4x32xf32> to vector<4x8xf32>
    %cst_74 = arith.constant dense<0.000000e+00> : vector<8x4xf32>
    %244 = tpu.matmul %242, %243, %cst_74 {dimension_numbers = #tpu.dot_dimension_numbers<[1], [1], [0], [0], [0, 0, 1, 0], [], []>} : vector<8x8xf32>, vector<4x8xf32>, vector<8x4xf32> -> vector<8x4xf32>
    %cst_75 = arith.constant dense<0xFF800000> : vector<8xf32>
    %245 = vector.multi_reduction <maximumf>, %244, %cst_75 [1] : vector<8x4xf32> to vector<8xf32>
    %246 = vector.shape_cast %245 : vector<8xf32> to vector<8x1xf32>
    %247 = vector.broadcast %246 : vector<8x1xf32> to vector<8x4xf32>
    %248 = arith.subf %244, %247 : vector<8x4xf32>
    %249 = math.exp %248 : vector<8x4xf32>
    %cst_76 = arith.constant dense<0.000000e+00> : vector<8xf32>
    %250 = vector.multi_reduction <add>, %249, %cst_76 [1] : vector<8x4xf32> to vector<8xf32>
    %251 = vector.shape_cast %250 : vector<8xf32> to vector<8x1xf32>
    %252 = tpu.reciprocal %251 {approx = true} : vector<8x1xf32> -> vector<8x1xf32>
    %253 = vector.broadcast %252 : vector<8x1xf32> to vector<8x4xf32>
    %254 = arith.mulf %249, %253 : vector<8x4xf32>
    %255 = vector.extract_strided_slice %241 {offsets = [0, 0], sizes = [4, 8], strides = [1, 1]} : vector<4x32xf32> to vector<4x8xf32>
    %cst_77 = arith.constant dense<0.000000e+00> : vector<8x8xf32>
    %256 = tpu.matmul %254, %255, %cst_77 {dimension_numbers = #tpu.dot_dimension_numbers<[1], [0], [0], [1], [0, 0, 1, 1], [], []>} : vector<8x4xf32>, vector<4x8xf32>, vector<8x8xf32> -> vector<8x8xf32>
    %257 = vector.extract_strided_slice %239 {offsets = [0, 8], sizes = [8, 8], strides = [1, 1]} : vector<8x32xf32> to vector<8x8xf32>
    %258 = vector.extract_strided_slice %240 {offsets = [0, 8], sizes = [4, 8], strides = [1, 1]} : vector<4x32xf32> to vector<4x8xf32>
    %cst_78 = arith.constant dense<0.000000e+00> : vector<8x4xf32>
    %259 = tpu.matmul %257, %258, %cst_78 {dimension_numbers = #tpu.dot_dimension_numbers<[1], [1], [0], [0], [0, 0, 1, 0], [], []>} : vector<8x8xf32>, vector<4x8xf32>, vector<8x4xf32> -> vector<8x4xf32>
    %cst_79 = arith.constant dense<0xFF800000> : vector<8xf32>
    %260 = vector.multi_reduction <maximumf>, %259, %cst_79 [1] : vector<8x4xf32> to vector<8xf32>
    %261 = vector.shape_cast %260 : vector<8xf32> to vector<8x1xf32>
    %262 = vector.broadcast %261 : vector<8x1xf32> to vector<8x4xf32>
    %263 = arith.subf %259, %262 : vector<8x4xf32>
    %264 = math.exp %263 : vector<8x4xf32>
    %cst_80 = arith.constant dense<0.000000e+00> : vector<8xf32>
    %265 = vector.multi_reduction <add>, %264, %cst_80 [1] : vector<8x4xf32> to vector<8xf32>
    %266 = vector.shape_cast %265 : vector<8xf32> to vector<8x1xf32>
    %267 = tpu.reciprocal %266 {approx = true} : vector<8x1xf32> -> vector<8x1xf32>
    %268 = vector.broadcast %267 : vector<8x1xf32> to vector<8x4xf32>
    %269 = arith.mulf %264, %268 : vector<8x4xf32>
    %270 = vector.extract_strided_slice %241 {offsets = [0, 8], sizes = [4, 8], strides = [1, 1]} : vector<4x32xf32> to vector<4x8xf32>
    %cst_81 = arith.constant dense<0.000000e+00> : vector<8x8xf32>
    %271 = tpu.matmul %269, %270, %cst_81 {dimension_numbers = #tpu.dot_dimension_numbers<[1], [0], [0], [1], [0, 0, 1, 1], [], []>} : vector<8x4xf32>, vector<4x8xf32>, vector<8x8xf32> -> vector<8x8xf32>
    %272 = vector.extract_strided_slice %239 {offsets = [0, 16], sizes = [8, 8], strides = [1, 1]} : vector<8x32xf32> to vector<8x8xf32>
    %273 = vector.extract_strided_slice %240 {offsets = [0, 16], sizes = [4, 8], strides = [1, 1]} : vector<4x32xf32> to vector<4x8xf32>
    %cst_82 = arith.constant dense<0.000000e+00> : vector<8x4xf32>
    %274 = tpu.matmul %272, %273, %cst_82 {dimension_numbers = #tpu.dot_dimension_numbers<[1], [1], [0], [0], [0, 0, 1, 0], [], []>} : vector<8x8xf32>, vector<4x8xf32>, vector<8x4xf32> -> vector<8x4xf32>
    %cst_83 = arith.constant dense<0xFF800000> : vector<8xf32>
    %275 = vector.multi_reduction <maximumf>, %274, %cst_83 [1] : vector<8x4xf32> to vector<8xf32>
    %276 = vector.shape_cast %275 : vector<8xf32> to vector<8x1xf32>
    %277 = vector.broadcast %276 : vector<8x1xf32> to vector<8x4xf32>
    %278 = arith.subf %274, %277 : vector<8x4xf32>
    %279 = math.exp %278 : vector<8x4xf32>
    %cst_84 = arith.constant dense<0.000000e+00> : vector<8xf32>
    %280 = vector.multi_reduction <add>, %279, %cst_84 [1] : vector<8x4xf32> to vector<8xf32>
    %281 = vector.shape_cast %280 : vector<8xf32> to vector<8x1xf32>
    %282 = tpu.reciprocal %281 {approx = true} : vector<8x1xf32> -> vector<8x1xf32>
    %283 = vector.broadcast %282 : vector<8x1xf32> to vector<8x4xf32>
    %284 = arith.mulf %279, %283 : vector<8x4xf32>
    %285 = vector.extract_strided_slice %241 {offsets = [0, 16], sizes = [4, 8], strides = [1, 1]} : vector<4x32xf32> to vector<4x8xf32>
    %cst_85 = arith.constant dense<0.000000e+00> : vector<8x8xf32>
    %286 = tpu.matmul %284, %285, %cst_85 {dimension_numbers = #tpu.dot_dimension_numbers<[1], [0], [0], [1], [0, 0, 1, 1], [], []>} : vector<8x4xf32>, vector<4x8xf32>, vector<8x8xf32> -> vector<8x8xf32>
    %287 = vector.extract_strided_slice %239 {offsets = [0, 24], sizes = [8, 8], strides = [1, 1]} : vector<8x32xf32> to vector<8x8xf32>
    %288 = vector.extract_strided_slice %240 {offsets = [0, 24], sizes = [4, 8], strides = [1, 1]} : vector<4x32xf32> to vector<4x8xf32>
    %cst_86 = arith.constant dense<0.000000e+00> : vector<8x4xf32>
    %289 = tpu.matmul %287, %288, %cst_86 {dimension_numbers = #tpu.dot_dimension_numbers<[1], [1], [0], [0], [0, 0, 1, 0], [], []>} : vector<8x8xf32>, vector<4x8xf32>, vector<8x4xf32> -> vector<8x4xf32>
    %cst_87 = arith.constant dense<0xFF800000> : vector<8xf32>
    %290 = vector.multi_reduction <maximumf>, %289, %cst_87 [1] : vector<8x4xf32> to vector<8xf32>
    %291 = vector.shape_cast %290 : vector<8xf32> to vector<8x1xf32>
    %292 = vector.broadcast %291 : vector<8x1xf32> to vector<8x4xf32>
    %293 = arith.subf %289, %292 : vector<8x4xf32>
    %294 = math.exp %293 : vector<8x4xf32>
    %cst_88 = arith.constant dense<0.000000e+00> : vector<8xf32>
    %295 = vector.multi_reduction <add>, %294, %cst_88 [1] : vector<8x4xf32> to vector<8xf32>
    %296 = vector.shape_cast %295 : vector<8xf32> to vector<8x1xf32>
    %297 = tpu.reciprocal %296 {approx = true} : vector<8x1xf32> -> vector<8x1xf32>
    %298 = vector.broadcast %297 : vector<8x1xf32> to vector<8x4xf32>
    %299 = arith.mulf %294, %298 : vector<8x4xf32>
    %300 = vector.extract_strided_slice %241 {offsets = [0, 24], sizes = [4, 8], strides = [1, 1]} : vector<4x32xf32> to vector<4x8xf32>
    %cst_89 = arith.constant dense<0.000000e+00> : vector<8x8xf32>
    %301 = tpu.matmul %299, %300, %cst_89 {dimension_numbers = #tpu.dot_dimension_numbers<[1], [0], [0], [1], [0, 0, 1, 1], [], []>} : vector<8x4xf32>, vector<4x8xf32>, vector<8x8xf32> -> vector<8x8xf32>
    %302 = tpu.concatenate %256, %271, %286, %301 in 1 : vector<8x8xf32>, vector<8x8xf32>, vector<8x8xf32>, vector<8x8xf32> -> vector<8x32xf32>
    %303 = tpu.concatenate %238, %302 in 0 : vector<8x32xf32>, vector<8x32xf32> -> vector<16x32xf32>
    %cst_90 = arith.constant dense<0.000000e+00> : vector<16x32xf32>
    %304 = tpu.matmul %303, %158, %cst_90 {dimension_numbers = #tpu.dot_dimension_numbers<[1], [0], [0], [1], [0, 0, 1, 1], [], []>} : vector<16x32xf32>, vector<32x32xf32>, vector<16x32xf32> -> vector<16x32xf32>
    %305 = vector.broadcast %164 : vector<1x32xf32> to vector<16x32xf32>
    %306 = arith.addf %304, %305 : vector<16x32xf32>
    %307 = arith.addf %2, %306 : vector<16x32xf32>
    %cst_91 = arith.constant dense<0.000000e+00> : vector<16xf32>
    %308 = vector.multi_reduction <add>, %307, %cst_91 [1] : vector<16x32xf32> to vector<16xf32>
    %309 = vector.shape_cast %308 : vector<16xf32> to vector<16x1xf32>
    %cst_92 = arith.constant 3.200000e+01 : f32
    %310 = vector.broadcast %cst_92 : f32 to vector<16x1xf32>
    %311 = arith.divf %309, %310 : vector<16x1xf32>
    %312 = vector.broadcast %311 : vector<16x1xf32> to vector<16x32xf32>
    %313 = arith.subf %307, %312 : vector<16x32xf32>
    %314 = arith.mulf %313, %313 : vector<16x32xf32>
    %cst_93 = arith.constant dense<0.000000e+00> : vector<16xf32>
    %315 = vector.multi_reduction <add>, %314, %cst_93 [1] : vector<16x32xf32> to vector<16xf32>
    %316 = vector.shape_cast %315 : vector<16xf32> to vector<16x1xf32>
    %cst_94 = arith.constant 3.200000e+01 : f32
    %317 = vector.broadcast %cst_94 : f32 to vector<16x1xf32>
    %318 = arith.divf %316, %317 : vector<16x1xf32>
    %319 = vector.broadcast %311 : vector<16x1xf32> to vector<16x32xf32>
    %320 = arith.subf %307, %319 : vector<16x32xf32>
    %cst_95 = arith.constant 9.99999974E-6 : f32
    %321 = vector.broadcast %cst_95 : f32 to vector<16x1xf32>
    %322 = arith.addf %318, %321 : vector<16x1xf32>
    %323 = math.rsqrt %322 : vector<16x1xf32>
    %324 = vector.broadcast %323 : vector<16x1xf32> to vector<16x32xf32>
    %325 = arith.mulf %320, %324 : vector<16x32xf32>
    %326 = vector.extract_strided_slice %0 {offsets = [16, 0], sizes = [1, 32], strides = [1, 1]} : vector<27x32xf32> to vector<1x32xf32>
    %327 = vector.broadcast %326 : vector<1x32xf32> to vector<16x32xf32>
    %328 = arith.mulf %325, %327 : vector<16x32xf32>
    %329 = vector.extract_strided_slice %0 {offsets = [17, 0], sizes = [1, 32], strides = [1, 1]} : vector<27x32xf32> to vector<1x32xf32>
    %330 = vector.broadcast %329 : vector<1x32xf32> to vector<16x32xf32>
    %331 = arith.addf %328, %330 : vector<16x32xf32>
    %c3_96 = arith.constant 3 : index
    %c0_97 = arith.constant 0 : index
    %c0_98 = arith.constant 0 : index
    %332 = vector.load %arg4[%c3_96, %c0_97, %c0_98] : memref<5x32x64xf32, #tpu.memory_space<vmem>>, vector<1x32x64xf32>
    %333 = vector.shape_cast %332 : vector<1x32x64xf32> to vector<32x64xf32>
    %cst_99 = arith.constant dense<0.000000e+00> : vector<16x64xf32>
    %334 = tpu.matmul %331, %333, %cst_99 {dimension_numbers = #tpu.dot_dimension_numbers<[1], [0], [0], [1], [0, 0, 1, 1], [], []>} : vector<16x32xf32>, vector<32x64xf32>, vector<16x64xf32> -> vector<16x64xf32>
    %335 = vector.extract_strided_slice %1 {offsets = [0, 0], sizes = [1, 64], strides = [1, 1]} : vector<2x64xf32> to vector<1x64xf32>
    %336 = vector.broadcast %335 : vector<1x64xf32> to vector<16x64xf32>
    %337 = arith.addf %334, %336 : vector<16x64xf32>
    %cst_100 = arith.constant 5.000000e-01 : f32
    %338 = vector.broadcast %cst_100 : f32 to vector<16x64xf32>
    %339 = arith.mulf %338, %337 : vector<16x64xf32>
    %cst_101 = arith.constant 0.707106769 : f32
    %340 = vector.broadcast %cst_101 : f32 to vector<16x64xf32>
    %341 = arith.mulf %337, %340 : vector<16x64xf32>
    %342 = math.erf %341 : vector<16x64xf32>
    %cst_102 = arith.constant 1.000000e+00 : f32
    %343 = vector.broadcast %cst_102 : f32 to vector<16x64xf32>
    %344 = arith.addf %343, %342 : vector<16x64xf32>
    %345 = arith.mulf %339, %344 : vector<16x64xf32>
    %c0_103 = arith.constant 0 : index
    %c0_104 = arith.constant 0 : index
    %346 = vector.load %arg5[%c0_103, %c0_104] : memref<64x32xf32, #tpu.memory_space<vmem>>, vector<64x32xf32>
    %cst_105 = arith.constant dense<0.000000e+00> : vector<16x32xf32>
    %347 = tpu.matmul %345, %346, %cst_105 {dimension_numbers = #tpu.dot_dimension_numbers<[1], [0], [0], [1], [0, 0, 1, 1], [], []>} : vector<16x64xf32>, vector<64x32xf32>, vector<16x32xf32> -> vector<16x32xf32>
    %348 = vector.extract_strided_slice %0 {offsets = [20, 0], sizes = [1, 32], strides = [1, 1]} : vector<27x32xf32> to vector<1x32xf32>
    %349 = vector.broadcast %348 : vector<1x32xf32> to vector<16x32xf32>
    %350 = arith.addf %347, %349 : vector<16x32xf32>
    %351 = arith.addf %331, %350 : vector<16x32xf32>
    %cst_106 = arith.constant dense<0.000000e+00> : vector<16xf32>
    %352 = vector.multi_reduction <add>, %351, %cst_106 [1] : vector<16x32xf32> to vector<16xf32>
    %353 = vector.shape_cast %352 : vector<16xf32> to vector<16x1xf32>
    %cst_107 = arith.constant 3.200000e+01 : f32
    %354 = vector.broadcast %cst_107 : f32 to vector<16x1xf32>
    %355 = arith.divf %353, %354 : vector<16x1xf32>
    %356 = vector.broadcast %355 : vector<16x1xf32> to vector<16x32xf32>
    %357 = arith.subf %351, %356 : vector<16x32xf32>
    %358 = arith.mulf %357, %357 : vector<16x32xf32>
    %cst_108 = arith.constant dense<0.000000e+00> : vector<16xf32>
    %359 = vector.multi_reduction <add>, %358, %cst_108 [1] : vector<16x32xf32> to vector<16xf32>
    %360 = vector.shape_cast %359 : vector<16xf32> to vector<16x1xf32>
    %cst_109 = arith.constant 3.200000e+01 : f32
    %361 = vector.broadcast %cst_109 : f32 to vector<16x1xf32>
    %362 = arith.divf %360, %361 : vector<16x1xf32>
    %363 = vector.broadcast %355 : vector<16x1xf32> to vector<16x32xf32>
    %364 = arith.subf %351, %363 : vector<16x32xf32>
    %cst_110 = arith.constant 9.99999974E-6 : f32
    %365 = vector.broadcast %cst_110 : f32 to vector<16x1xf32>
    %366 = arith.addf %362, %365 : vector<16x1xf32>
    %367 = math.rsqrt %366 : vector<16x1xf32>
    %368 = vector.broadcast %367 : vector<16x1xf32> to vector<16x32xf32>
    %369 = arith.mulf %364, %368 : vector<16x32xf32>
    %370 = vector.extract_strided_slice %0 {offsets = [18, 0], sizes = [1, 32], strides = [1, 1]} : vector<27x32xf32> to vector<1x32xf32>
    %371 = vector.broadcast %370 : vector<1x32xf32> to vector<16x32xf32>
    %372 = arith.mulf %369, %371 : vector<16x32xf32>
    %373 = vector.extract_strided_slice %0 {offsets = [19, 0], sizes = [1, 32], strides = [1, 1]} : vector<27x32xf32> to vector<1x32xf32>
    %374 = vector.broadcast %373 : vector<1x32xf32> to vector<16x32xf32>
    %375 = arith.addf %372, %374 : vector<16x32xf32>
    %c4 = arith.constant 4 : index
    %c0_111 = arith.constant 0 : index
    %c0_112 = arith.constant 0 : index
    %376 = vector.load %arg3[%c4, %c0_111, %c0_112] : memref<8x32x32xf32, #tpu.memory_space<vmem>>, vector<1x32x32xf32>
    %377 = vector.shape_cast %376 : vector<1x32x32xf32> to vector<32x32xf32>
    %c5 = arith.constant 5 : index
    %c0_113 = arith.constant 0 : index
    %c0_114 = arith.constant 0 : index
    %378 = vector.load %arg3[%c5, %c0_113, %c0_114] : memref<8x32x32xf32, #tpu.memory_space<vmem>>, vector<1x32x32xf32>
    %379 = vector.shape_cast %378 : vector<1x32x32xf32> to vector<32x32xf32>
    %c2_115 = arith.constant 2 : index
    %c0_116 = arith.constant 0 : index
    %c0_117 = arith.constant 0 : index
    %380 = vector.load %arg4[%c2_115, %c0_116, %c0_117] : memref<5x32x64xf32, #tpu.memory_space<vmem>>, vector<1x32x64xf32>
    %381 = vector.shape_cast %380 : vector<1x32x64xf32> to vector<32x64xf32>
    %382 = vector.extract_strided_slice %0 {offsets = [12, 0], sizes = [1, 32], strides = [1, 1]} : vector<27x32xf32> to vector<1x32xf32>
    %383 = vector.extract_strided_slice %0 {offsets = [13, 0], sizes = [1, 32], strides = [1, 1]} : vector<27x32xf32> to vector<1x32xf32>
    %384 = vector.extract_strided_slice %0 {offsets = [14, 0], sizes = [1, 32], strides = [1, 1]} : vector<27x32xf32> to vector<1x32xf32>
    %385 = vector.extract_strided_slice %0 {offsets = [15, 0], sizes = [1, 32], strides = [1, 1]} : vector<27x32xf32> to vector<1x32xf32>
    %cst_118 = arith.constant dense<0.000000e+00> : vector<16x32xf32>
    %386 = tpu.matmul %375, %377, %cst_118 {dimension_numbers = #tpu.dot_dimension_numbers<[1], [0], [0], [1], [0, 0, 1, 1], [], []>} : vector<16x32xf32>, vector<32x32xf32>, vector<16x32xf32> -> vector<16x32xf32>
    %387 = vector.broadcast %382 : vector<1x32xf32> to vector<16x32xf32>
    %388 = arith.addf %386, %387 : vector<16x32xf32>
    %cst_119 = arith.constant dense<0.000000e+00> : vector<32x64xf32>
    %389 = tpu.matmul %3, %381, %cst_119 {dimension_numbers = #tpu.dot_dimension_numbers<[1], [0], [0], [1], [0, 0, 1, 1], [], []>} : vector<32x32xf32>, vector<32x64xf32>, vector<32x64xf32> -> vector<32x64xf32>
    %390 = vector.extract_strided_slice %389 {offsets = [0, 0], sizes = [32, 32], strides = [1, 1]} : vector<32x64xf32> to vector<32x32xf32>
    %391 = vector.broadcast %383 : vector<1x32xf32> to vector<32x32xf32>
    %392 = arith.addf %390, %391 : vector<32x32xf32>
    %393 = vector.extract_strided_slice %389 {offsets = [0, 32], sizes = [32, 32], strides = [1, 1]} : vector<32x64xf32> to vector<32x32xf32>
    %394 = vector.broadcast %384 : vector<1x32xf32> to vector<32x32xf32>
    %395 = arith.addf %393, %394 : vector<32x32xf32>
    %396 = vector.extract_strided_slice %388 {offsets = [0, 0], sizes = [8, 32], strides = [1, 1]} : vector<16x32xf32> to vector<8x32xf32>
    %397 = vector.extract_strided_slice %392 {offsets = [0, 0], sizes = [16, 32], strides = [1, 1]} : vector<32x32xf32> to vector<16x32xf32>
    %398 = vector.extract_strided_slice %395 {offsets = [0, 0], sizes = [16, 32], strides = [1, 1]} : vector<32x32xf32> to vector<16x32xf32>
    %399 = vector.extract_strided_slice %396 {offsets = [0, 0], sizes = [8, 8], strides = [1, 1]} : vector<8x32xf32> to vector<8x8xf32>
    %400 = vector.extract_strided_slice %397 {offsets = [0, 0], sizes = [16, 8], strides = [1, 1]} : vector<16x32xf32> to vector<16x8xf32>
    %cst_120 = arith.constant dense<0.000000e+00> : vector<8x16xf32>
    %401 = tpu.matmul %399, %400, %cst_120 {dimension_numbers = #tpu.dot_dimension_numbers<[1], [1], [0], [0], [0, 0, 1, 0], [], []>} : vector<8x8xf32>, vector<16x8xf32>, vector<8x16xf32> -> vector<8x16xf32>
    %cst_121 = arith.constant dense<0xFF800000> : vector<8xf32>
    %402 = vector.multi_reduction <maximumf>, %401, %cst_121 [1] : vector<8x16xf32> to vector<8xf32>
    %403 = vector.shape_cast %402 : vector<8xf32> to vector<8x1xf32>
    %404 = vector.broadcast %403 : vector<8x1xf32> to vector<8x16xf32>
    %405 = arith.subf %401, %404 : vector<8x16xf32>
    %406 = math.exp %405 : vector<8x16xf32>
    %cst_122 = arith.constant dense<0.000000e+00> : vector<8xf32>
    %407 = vector.multi_reduction <add>, %406, %cst_122 [1] : vector<8x16xf32> to vector<8xf32>
    %408 = vector.shape_cast %407 : vector<8xf32> to vector<8x1xf32>
    %409 = tpu.reciprocal %408 {approx = true} : vector<8x1xf32> -> vector<8x1xf32>
    %410 = vector.broadcast %409 : vector<8x1xf32> to vector<8x16xf32>
    %411 = arith.mulf %406, %410 : vector<8x16xf32>
    %412 = vector.extract_strided_slice %398 {offsets = [0, 0], sizes = [16, 8], strides = [1, 1]} : vector<16x32xf32> to vector<16x8xf32>
    %cst_123 = arith.constant dense<0.000000e+00> : vector<8x8xf32>
    %413 = tpu.matmul %411, %412, %cst_123 {dimension_numbers = #tpu.dot_dimension_numbers<[1], [0], [0], [1], [0, 0, 1, 1], [], []>} : vector<8x16xf32>, vector<16x8xf32>, vector<8x8xf32> -> vector<8x8xf32>
    %414 = vector.extract_strided_slice %396 {offsets = [0, 8], sizes = [8, 8], strides = [1, 1]} : vector<8x32xf32> to vector<8x8xf32>
    %415 = vector.extract_strided_slice %397 {offsets = [0, 8], sizes = [16, 8], strides = [1, 1]} : vector<16x32xf32> to vector<16x8xf32>
    %cst_124 = arith.constant dense<0.000000e+00> : vector<8x16xf32>
    %416 = tpu.matmul %414, %415, %cst_124 {dimension_numbers = #tpu.dot_dimension_numbers<[1], [1], [0], [0], [0, 0, 1, 0], [], []>} : vector<8x8xf32>, vector<16x8xf32>, vector<8x16xf32> -> vector<8x16xf32>
    %cst_125 = arith.constant dense<0xFF800000> : vector<8xf32>
    %417 = vector.multi_reduction <maximumf>, %416, %cst_125 [1] : vector<8x16xf32> to vector<8xf32>
    %418 = vector.shape_cast %417 : vector<8xf32> to vector<8x1xf32>
    %419 = vector.broadcast %418 : vector<8x1xf32> to vector<8x16xf32>
    %420 = arith.subf %416, %419 : vector<8x16xf32>
    %421 = math.exp %420 : vector<8x16xf32>
    %cst_126 = arith.constant dense<0.000000e+00> : vector<8xf32>
    %422 = vector.multi_reduction <add>, %421, %cst_126 [1] : vector<8x16xf32> to vector<8xf32>
    %423 = vector.shape_cast %422 : vector<8xf32> to vector<8x1xf32>
    %424 = tpu.reciprocal %423 {approx = true} : vector<8x1xf32> -> vector<8x1xf32>
    %425 = vector.broadcast %424 : vector<8x1xf32> to vector<8x16xf32>
    %426 = arith.mulf %421, %425 : vector<8x16xf32>
    %427 = vector.extract_strided_slice %398 {offsets = [0, 8], sizes = [16, 8], strides = [1, 1]} : vector<16x32xf32> to vector<16x8xf32>
    %cst_127 = arith.constant dense<0.000000e+00> : vector<8x8xf32>
    %428 = tpu.matmul %426, %427, %cst_127 {dimension_numbers = #tpu.dot_dimension_numbers<[1], [0], [0], [1], [0, 0, 1, 1], [], []>} : vector<8x16xf32>, vector<16x8xf32>, vector<8x8xf32> -> vector<8x8xf32>
    %429 = vector.extract_strided_slice %396 {offsets = [0, 16], sizes = [8, 8], strides = [1, 1]} : vector<8x32xf32> to vector<8x8xf32>
    %430 = vector.extract_strided_slice %397 {offsets = [0, 16], sizes = [16, 8], strides = [1, 1]} : vector<16x32xf32> to vector<16x8xf32>
    %cst_128 = arith.constant dense<0.000000e+00> : vector<8x16xf32>
    %431 = tpu.matmul %429, %430, %cst_128 {dimension_numbers = #tpu.dot_dimension_numbers<[1], [1], [0], [0], [0, 0, 1, 0], [], []>} : vector<8x8xf32>, vector<16x8xf32>, vector<8x16xf32> -> vector<8x16xf32>
    %cst_129 = arith.constant dense<0xFF800000> : vector<8xf32>
    %432 = vector.multi_reduction <maximumf>, %431, %cst_129 [1] : vector<8x16xf32> to vector<8xf32>
    %433 = vector.shape_cast %432 : vector<8xf32> to vector<8x1xf32>
    %434 = vector.broadcast %433 : vector<8x1xf32> to vector<8x16xf32>
    %435 = arith.subf %431, %434 : vector<8x16xf32>
    %436 = math.exp %435 : vector<8x16xf32>
    %cst_130 = arith.constant dense<0.000000e+00> : vector<8xf32>
    %437 = vector.multi_reduction <add>, %436, %cst_130 [1] : vector<8x16xf32> to vector<8xf32>
    %438 = vector.shape_cast %437 : vector<8xf32> to vector<8x1xf32>
    %439 = tpu.reciprocal %438 {approx = true} : vector<8x1xf32> -> vector<8x1xf32>
    %440 = vector.broadcast %439 : vector<8x1xf32> to vector<8x16xf32>
    %441 = arith.mulf %436, %440 : vector<8x16xf32>
    %442 = vector.extract_strided_slice %398 {offsets = [0, 16], sizes = [16, 8], strides = [1, 1]} : vector<16x32xf32> to vector<16x8xf32>
    %cst_131 = arith.constant dense<0.000000e+00> : vector<8x8xf32>
    %443 = tpu.matmul %441, %442, %cst_131 {dimension_numbers = #tpu.dot_dimension_numbers<[1], [0], [0], [1], [0, 0, 1, 1], [], []>} : vector<8x16xf32>, vector<16x8xf32>, vector<8x8xf32> -> vector<8x8xf32>
    %444 = vector.extract_strided_slice %396 {offsets = [0, 24], sizes = [8, 8], strides = [1, 1]} : vector<8x32xf32> to vector<8x8xf32>
    %445 = vector.extract_strided_slice %397 {offsets = [0, 24], sizes = [16, 8], strides = [1, 1]} : vector<16x32xf32> to vector<16x8xf32>
    %cst_132 = arith.constant dense<0.000000e+00> : vector<8x16xf32>
    %446 = tpu.matmul %444, %445, %cst_132 {dimension_numbers = #tpu.dot_dimension_numbers<[1], [1], [0], [0], [0, 0, 1, 0], [], []>} : vector<8x8xf32>, vector<16x8xf32>, vector<8x16xf32> -> vector<8x16xf32>
    %cst_133 = arith.constant dense<0xFF800000> : vector<8xf32>
    %447 = vector.multi_reduction <maximumf>, %446, %cst_133 [1] : vector<8x16xf32> to vector<8xf32>
    %448 = vector.shape_cast %447 : vector<8xf32> to vector<8x1xf32>
    %449 = vector.broadcast %448 : vector<8x1xf32> to vector<8x16xf32>
    %450 = arith.subf %446, %449 : vector<8x16xf32>
    %451 = math.exp %450 : vector<8x16xf32>
    %cst_134 = arith.constant dense<0.000000e+00> : vector<8xf32>
    %452 = vector.multi_reduction <add>, %451, %cst_134 [1] : vector<8x16xf32> to vector<8xf32>
    %453 = vector.shape_cast %452 : vector<8xf32> to vector<8x1xf32>
    %454 = tpu.reciprocal %453 {approx = true} : vector<8x1xf32> -> vector<8x1xf32>
    %455 = vector.broadcast %454 : vector<8x1xf32> to vector<8x16xf32>
    %456 = arith.mulf %451, %455 : vector<8x16xf32>
    %457 = vector.extract_strided_slice %398 {offsets = [0, 24], sizes = [16, 8], strides = [1, 1]} : vector<16x32xf32> to vector<16x8xf32>
    %cst_135 = arith.constant dense<0.000000e+00> : vector<8x8xf32>
    %458 = tpu.matmul %456, %457, %cst_135 {dimension_numbers = #tpu.dot_dimension_numbers<[1], [0], [0], [1], [0, 0, 1, 1], [], []>} : vector<8x16xf32>, vector<16x8xf32>, vector<8x8xf32> -> vector<8x8xf32>
    %459 = tpu.concatenate %413, %428, %443, %458 in 1 : vector<8x8xf32>, vector<8x8xf32>, vector<8x8xf32>, vector<8x8xf32> -> vector<8x32xf32>
    %460 = vector.extract_strided_slice %388 {offsets = [8, 0], sizes = [8, 32], strides = [1, 1]} : vector<16x32xf32> to vector<8x32xf32>
    %461 = vector.extract_strided_slice %392 {offsets = [16, 0], sizes = [16, 32], strides = [1, 1]} : vector<32x32xf32> to vector<16x32xf32>
    %462 = vector.extract_strided_slice %395 {offsets = [16, 0], sizes = [16, 32], strides = [1, 1]} : vector<32x32xf32> to vector<16x32xf32>
    %463 = vector.extract_strided_slice %460 {offsets = [0, 0], sizes = [8, 8], strides = [1, 1]} : vector<8x32xf32> to vector<8x8xf32>
    %464 = vector.extract_strided_slice %461 {offsets = [0, 0], sizes = [16, 8], strides = [1, 1]} : vector<16x32xf32> to vector<16x8xf32>
    %cst_136 = arith.constant dense<0.000000e+00> : vector<8x16xf32>
    %465 = tpu.matmul %463, %464, %cst_136 {dimension_numbers = #tpu.dot_dimension_numbers<[1], [1], [0], [0], [0, 0, 1, 0], [], []>} : vector<8x8xf32>, vector<16x8xf32>, vector<8x16xf32> -> vector<8x16xf32>
    %cst_137 = arith.constant dense<0xFF800000> : vector<8xf32>
    %466 = vector.multi_reduction <maximumf>, %465, %cst_137 [1] : vector<8x16xf32> to vector<8xf32>
    %467 = vector.shape_cast %466 : vector<8xf32> to vector<8x1xf32>
    %468 = vector.broadcast %467 : vector<8x1xf32> to vector<8x16xf32>
    %469 = arith.subf %465, %468 : vector<8x16xf32>
    %470 = math.exp %469 : vector<8x16xf32>
    %cst_138 = arith.constant dense<0.000000e+00> : vector<8xf32>
    %471 = vector.multi_reduction <add>, %470, %cst_138 [1] : vector<8x16xf32> to vector<8xf32>
    %472 = vector.shape_cast %471 : vector<8xf32> to vector<8x1xf32>
    %473 = tpu.reciprocal %472 {approx = true} : vector<8x1xf32> -> vector<8x1xf32>
    %474 = vector.broadcast %473 : vector<8x1xf32> to vector<8x16xf32>
    %475 = arith.mulf %470, %474 : vector<8x16xf32>
    %476 = vector.extract_strided_slice %462 {offsets = [0, 0], sizes = [16, 8], strides = [1, 1]} : vector<16x32xf32> to vector<16x8xf32>
    %cst_139 = arith.constant dense<0.000000e+00> : vector<8x8xf32>
    %477 = tpu.matmul %475, %476, %cst_139 {dimension_numbers = #tpu.dot_dimension_numbers<[1], [0], [0], [1], [0, 0, 1, 1], [], []>} : vector<8x16xf32>, vector<16x8xf32>, vector<8x8xf32> -> vector<8x8xf32>
    %478 = vector.extract_strided_slice %460 {offsets = [0, 8], sizes = [8, 8], strides = [1, 1]} : vector<8x32xf32> to vector<8x8xf32>
    %479 = vector.extract_strided_slice %461 {offsets = [0, 8], sizes = [16, 8], strides = [1, 1]} : vector<16x32xf32> to vector<16x8xf32>
    %cst_140 = arith.constant dense<0.000000e+00> : vector<8x16xf32>
    %480 = tpu.matmul %478, %479, %cst_140 {dimension_numbers = #tpu.dot_dimension_numbers<[1], [1], [0], [0], [0, 0, 1, 0], [], []>} : vector<8x8xf32>, vector<16x8xf32>, vector<8x16xf32> -> vector<8x16xf32>
    %cst_141 = arith.constant dense<0xFF800000> : vector<8xf32>
    %481 = vector.multi_reduction <maximumf>, %480, %cst_141 [1] : vector<8x16xf32> to vector<8xf32>
    %482 = vector.shape_cast %481 : vector<8xf32> to vector<8x1xf32>
    %483 = vector.broadcast %482 : vector<8x1xf32> to vector<8x16xf32>
    %484 = arith.subf %480, %483 : vector<8x16xf32>
    %485 = math.exp %484 : vector<8x16xf32>
    %cst_142 = arith.constant dense<0.000000e+00> : vector<8xf32>
    %486 = vector.multi_reduction <add>, %485, %cst_142 [1] : vector<8x16xf32> to vector<8xf32>
    %487 = vector.shape_cast %486 : vector<8xf32> to vector<8x1xf32>
    %488 = tpu.reciprocal %487 {approx = true} : vector<8x1xf32> -> vector<8x1xf32>
    %489 = vector.broadcast %488 : vector<8x1xf32> to vector<8x16xf32>
    %490 = arith.mulf %485, %489 : vector<8x16xf32>
    %491 = vector.extract_strided_slice %462 {offsets = [0, 8], sizes = [16, 8], strides = [1, 1]} : vector<16x32xf32> to vector<16x8xf32>
    %cst_143 = arith.constant dense<0.000000e+00> : vector<8x8xf32>
    %492 = tpu.matmul %490, %491, %cst_143 {dimension_numbers = #tpu.dot_dimension_numbers<[1], [0], [0], [1], [0, 0, 1, 1], [], []>} : vector<8x16xf32>, vector<16x8xf32>, vector<8x8xf32> -> vector<8x8xf32>
    %493 = vector.extract_strided_slice %460 {offsets = [0, 16], sizes = [8, 8], strides = [1, 1]} : vector<8x32xf32> to vector<8x8xf32>
    %494 = vector.extract_strided_slice %461 {offsets = [0, 16], sizes = [16, 8], strides = [1, 1]} : vector<16x32xf32> to vector<16x8xf32>
    %cst_144 = arith.constant dense<0.000000e+00> : vector<8x16xf32>
    %495 = tpu.matmul %493, %494, %cst_144 {dimension_numbers = #tpu.dot_dimension_numbers<[1], [1], [0], [0], [0, 0, 1, 0], [], []>} : vector<8x8xf32>, vector<16x8xf32>, vector<8x16xf32> -> vector<8x16xf32>
    %cst_145 = arith.constant dense<0xFF800000> : vector<8xf32>
    %496 = vector.multi_reduction <maximumf>, %495, %cst_145 [1] : vector<8x16xf32> to vector<8xf32>
    %497 = vector.shape_cast %496 : vector<8xf32> to vector<8x1xf32>
    %498 = vector.broadcast %497 : vector<8x1xf32> to vector<8x16xf32>
    %499 = arith.subf %495, %498 : vector<8x16xf32>
    %500 = math.exp %499 : vector<8x16xf32>
    %cst_146 = arith.constant dense<0.000000e+00> : vector<8xf32>
    %501 = vector.multi_reduction <add>, %500, %cst_146 [1] : vector<8x16xf32> to vector<8xf32>
    %502 = vector.shape_cast %501 : vector<8xf32> to vector<8x1xf32>
    %503 = tpu.reciprocal %502 {approx = true} : vector<8x1xf32> -> vector<8x1xf32>
    %504 = vector.broadcast %503 : vector<8x1xf32> to vector<8x16xf32>
    %505 = arith.mulf %500, %504 : vector<8x16xf32>
    %506 = vector.extract_strided_slice %462 {offsets = [0, 16], sizes = [16, 8], strides = [1, 1]} : vector<16x32xf32> to vector<16x8xf32>
    %cst_147 = arith.constant dense<0.000000e+00> : vector<8x8xf32>
    %507 = tpu.matmul %505, %506, %cst_147 {dimension_numbers = #tpu.dot_dimension_numbers<[1], [0], [0], [1], [0, 0, 1, 1], [], []>} : vector<8x16xf32>, vector<16x8xf32>, vector<8x8xf32> -> vector<8x8xf32>
    %508 = vector.extract_strided_slice %460 {offsets = [0, 24], sizes = [8, 8], strides = [1, 1]} : vector<8x32xf32> to vector<8x8xf32>
    %509 = vector.extract_strided_slice %461 {offsets = [0, 24], sizes = [16, 8], strides = [1, 1]} : vector<16x32xf32> to vector<16x8xf32>
    %cst_148 = arith.constant dense<0.000000e+00> : vector<8x16xf32>
    %510 = tpu.matmul %508, %509, %cst_148 {dimension_numbers = #tpu.dot_dimension_numbers<[1], [1], [0], [0], [0, 0, 1, 0], [], []>} : vector<8x8xf32>, vector<16x8xf32>, vector<8x16xf32> -> vector<8x16xf32>
    %cst_149 = arith.constant dense<0xFF800000> : vector<8xf32>
    %511 = vector.multi_reduction <maximumf>, %510, %cst_149 [1] : vector<8x16xf32> to vector<8xf32>
    %512 = vector.shape_cast %511 : vector<8xf32> to vector<8x1xf32>
    %513 = vector.broadcast %512 : vector<8x1xf32> to vector<8x16xf32>
    %514 = arith.subf %510, %513 : vector<8x16xf32>
    %515 = math.exp %514 : vector<8x16xf32>
    %cst_150 = arith.constant dense<0.000000e+00> : vector<8xf32>
    %516 = vector.multi_reduction <add>, %515, %cst_150 [1] : vector<8x16xf32> to vector<8xf32>
    %517 = vector.shape_cast %516 : vector<8xf32> to vector<8x1xf32>
    %518 = tpu.reciprocal %517 {approx = true} : vector<8x1xf32> -> vector<8x1xf32>
    %519 = vector.broadcast %518 : vector<8x1xf32> to vector<8x16xf32>
    %520 = arith.mulf %515, %519 : vector<8x16xf32>
    %521 = vector.extract_strided_slice %462 {offsets = [0, 24], sizes = [16, 8], strides = [1, 1]} : vector<16x32xf32> to vector<16x8xf32>
    %cst_151 = arith.constant dense<0.000000e+00> : vector<8x8xf32>
    %522 = tpu.matmul %520, %521, %cst_151 {dimension_numbers = #tpu.dot_dimension_numbers<[1], [0], [0], [1], [0, 0, 1, 1], [], []>} : vector<8x16xf32>, vector<16x8xf32>, vector<8x8xf32> -> vector<8x8xf32>
    %523 = tpu.concatenate %477, %492, %507, %522 in 1 : vector<8x8xf32>, vector<8x8xf32>, vector<8x8xf32>, vector<8x8xf32> -> vector<8x32xf32>
    %524 = tpu.concatenate %459, %523 in 0 : vector<8x32xf32>, vector<8x32xf32> -> vector<16x32xf32>
    %cst_152 = arith.constant dense<0.000000e+00> : vector<16x32xf32>
    %525 = tpu.matmul %524, %379, %cst_152 {dimension_numbers = #tpu.dot_dimension_numbers<[1], [0], [0], [1], [0, 0, 1, 1], [], []>} : vector<16x32xf32>, vector<32x32xf32>, vector<16x32xf32> -> vector<16x32xf32>
    %526 = vector.broadcast %385 : vector<1x32xf32> to vector<16x32xf32>
    %527 = arith.addf %525, %526 : vector<16x32xf32>
    %528 = arith.addf %375, %527 : vector<16x32xf32>
    %cst_153 = arith.constant dense<0.000000e+00> : vector<16xf32>
    %529 = vector.multi_reduction <add>, %528, %cst_153 [1] : vector<16x32xf32> to vector<16xf32>
    %530 = vector.shape_cast %529 : vector<16xf32> to vector<16x1xf32>
    %cst_154 = arith.constant 3.200000e+01 : f32
    %531 = vector.broadcast %cst_154 : f32 to vector<16x1xf32>
    %532 = arith.divf %530, %531 : vector<16x1xf32>
    %533 = vector.broadcast %532 : vector<16x1xf32> to vector<16x32xf32>
    %534 = arith.subf %528, %533 : vector<16x32xf32>
    %535 = arith.mulf %534, %534 : vector<16x32xf32>
    %cst_155 = arith.constant dense<0.000000e+00> : vector<16xf32>
    %536 = vector.multi_reduction <add>, %535, %cst_155 [1] : vector<16x32xf32> to vector<16xf32>
    %537 = vector.shape_cast %536 : vector<16xf32> to vector<16x1xf32>
    %cst_156 = arith.constant 3.200000e+01 : f32
    %538 = vector.broadcast %cst_156 : f32 to vector<16x1xf32>
    %539 = arith.divf %537, %538 : vector<16x1xf32>
    %540 = vector.broadcast %532 : vector<16x1xf32> to vector<16x32xf32>
    %541 = arith.subf %528, %540 : vector<16x32xf32>
    %cst_157 = arith.constant 9.99999974E-6 : f32
    %542 = vector.broadcast %cst_157 : f32 to vector<16x1xf32>
    %543 = arith.addf %539, %542 : vector<16x1xf32>
    %544 = math.rsqrt %543 : vector<16x1xf32>
    %545 = vector.broadcast %544 : vector<16x1xf32> to vector<16x32xf32>
    %546 = arith.mulf %541, %545 : vector<16x32xf32>
    %547 = vector.extract_strided_slice %0 {offsets = [21, 0], sizes = [1, 32], strides = [1, 1]} : vector<27x32xf32> to vector<1x32xf32>
    %548 = vector.broadcast %547 : vector<1x32xf32> to vector<16x32xf32>
    %549 = arith.mulf %546, %548 : vector<16x32xf32>
    %550 = vector.extract_strided_slice %0 {offsets = [22, 0], sizes = [1, 32], strides = [1, 1]} : vector<27x32xf32> to vector<1x32xf32>
    %551 = vector.broadcast %550 : vector<1x32xf32> to vector<16x32xf32>
    %552 = arith.addf %549, %551 : vector<16x32xf32>
    %c6 = arith.constant 6 : index
    %c0_158 = arith.constant 0 : index
    %c0_159 = arith.constant 0 : index
    %553 = vector.load %arg3[%c6, %c0_158, %c0_159] : memref<8x32x32xf32, #tpu.memory_space<vmem>>, vector<1x32x32xf32>
    %554 = vector.shape_cast %553 : vector<1x32x32xf32> to vector<32x32xf32>
    %cst_160 = arith.constant dense<0.000000e+00> : vector<16x32xf32>
    %555 = tpu.matmul %552, %554, %cst_160 {dimension_numbers = #tpu.dot_dimension_numbers<[1], [0], [0], [1], [0, 0, 1, 1], [], []>} : vector<16x32xf32>, vector<32x32xf32>, vector<16x32xf32> -> vector<16x32xf32>
    %556 = vector.extract_strided_slice %0 {offsets = [25, 0], sizes = [1, 32], strides = [1, 1]} : vector<27x32xf32> to vector<1x32xf32>
    %557 = vector.broadcast %556 : vector<1x32xf32> to vector<16x32xf32>
    %558 = arith.addf %555, %557 : vector<16x32xf32>
    %cst_161 = arith.constant 5.000000e-01 : f32
    %559 = vector.broadcast %cst_161 : f32 to vector<16x32xf32>
    %560 = arith.mulf %559, %558 : vector<16x32xf32>
    %cst_162 = arith.constant 0.707106769 : f32
    %561 = vector.broadcast %cst_162 : f32 to vector<16x32xf32>
    %562 = arith.mulf %558, %561 : vector<16x32xf32>
    %563 = math.erf %562 : vector<16x32xf32>
    %cst_163 = arith.constant 1.000000e+00 : f32
    %564 = vector.broadcast %cst_163 : f32 to vector<16x32xf32>
    %565 = arith.addf %564, %563 : vector<16x32xf32>
    %566 = arith.mulf %560, %565 : vector<16x32xf32>
    %c7 = arith.constant 7 : index
    %c0_164 = arith.constant 0 : index
    %c0_165 = arith.constant 0 : index
    %567 = vector.load %arg3[%c7, %c0_164, %c0_165] : memref<8x32x32xf32, #tpu.memory_space<vmem>>, vector<1x32x32xf32>
    %568 = vector.shape_cast %567 : vector<1x32x32xf32> to vector<32x32xf32>
    %cst_166 = arith.constant dense<0.000000e+00> : vector<16x32xf32>
    %569 = tpu.matmul %566, %568, %cst_166 {dimension_numbers = #tpu.dot_dimension_numbers<[1], [0], [0], [1], [0, 0, 1, 1], [], []>} : vector<16x32xf32>, vector<32x32xf32>, vector<16x32xf32> -> vector<16x32xf32>
    %570 = vector.extract_strided_slice %0 {offsets = [26, 0], sizes = [1, 32], strides = [1, 1]} : vector<27x32xf32> to vector<1x32xf32>
    %571 = vector.broadcast %570 : vector<1x32xf32> to vector<16x32xf32>
    %572 = arith.addf %569, %571 : vector<16x32xf32>
    %573 = arith.addf %552, %572 : vector<16x32xf32>
    %cst_167 = arith.constant dense<0.000000e+00> : vector<16xf32>
    %574 = vector.multi_reduction <add>, %573, %cst_167 [1] : vector<16x32xf32> to vector<16xf32>
    %575 = vector.shape_cast %574 : vector<16xf32> to vector<16x1xf32>
    %cst_168 = arith.constant 3.200000e+01 : f32
    %576 = vector.broadcast %cst_168 : f32 to vector<16x1xf32>
    %577 = arith.divf %575, %576 : vector<16x1xf32>
    %578 = vector.broadcast %577 : vector<16x1xf32> to vector<16x32xf32>
    %579 = arith.subf %573, %578 : vector<16x32xf32>
    %580 = arith.mulf %579, %579 : vector<16x32xf32>
    %cst_169 = arith.constant dense<0.000000e+00> : vector<16xf32>
    %581 = vector.multi_reduction <add>, %580, %cst_169 [1] : vector<16x32xf32> to vector<16xf32>
    %582 = vector.shape_cast %581 : vector<16xf32> to vector<16x1xf32>
    %cst_170 = arith.constant 3.200000e+01 : f32
    %583 = vector.broadcast %cst_170 : f32 to vector<16x1xf32>
    %584 = arith.divf %582, %583 : vector<16x1xf32>
    %585 = vector.broadcast %577 : vector<16x1xf32> to vector<16x32xf32>
    %586 = arith.subf %573, %585 : vector<16x32xf32>
    %cst_171 = arith.constant 9.99999974E-6 : f32
    %587 = vector.broadcast %cst_171 : f32 to vector<16x1xf32>
    %588 = arith.addf %584, %587 : vector<16x1xf32>
    %589 = math.rsqrt %588 : vector<16x1xf32>
    %590 = vector.broadcast %589 : vector<16x1xf32> to vector<16x32xf32>
    %591 = arith.mulf %586, %590 : vector<16x32xf32>
    %592 = vector.extract_strided_slice %0 {offsets = [23, 0], sizes = [1, 32], strides = [1, 1]} : vector<27x32xf32> to vector<1x32xf32>
    %593 = vector.broadcast %592 : vector<1x32xf32> to vector<16x32xf32>
    %594 = arith.mulf %591, %593 : vector<16x32xf32>
    %595 = vector.extract_strided_slice %0 {offsets = [24, 0], sizes = [1, 32], strides = [1, 1]} : vector<27x32xf32> to vector<1x32xf32>
    %596 = vector.broadcast %595 : vector<1x32xf32> to vector<16x32xf32>
    %597 = arith.addf %594, %596 : vector<16x32xf32>
    %c4_172 = arith.constant 4 : index
    %c0_173 = arith.constant 0 : index
    %c0_174 = arith.constant 0 : index
    %598 = vector.load %arg4[%c4_172, %c0_173, %c0_174] : memref<5x32x64xf32, #tpu.memory_space<vmem>>, vector<1x32x64xf32>
    %599 = vector.shape_cast %598 : vector<1x32x64xf32> to vector<32x64xf32>
    %cst_175 = arith.constant dense<0.000000e+00> : vector<16x64xf32>
    %600 = tpu.matmul %597, %599, %cst_175 {dimension_numbers = #tpu.dot_dimension_numbers<[1], [0], [0], [1], [0, 0, 1, 1], [], []>} : vector<16x32xf32>, vector<32x64xf32>, vector<16x64xf32> -> vector<16x64xf32>
    %601 = vector.extract_strided_slice %1 {offsets = [1, 0], sizes = [1, 64], strides = [1, 1]} : vector<2x64xf32> to vector<1x64xf32>
    %602 = vector.broadcast %601 : vector<1x64xf32> to vector<16x64xf32>
    %603 = arith.addf %600, %602 : vector<16x64xf32>
    %c0_176 = arith.constant 0 : index
    %c0_177 = arith.constant 0 : index
    %604 = vector.load %arg8[%c0_176, %c0_177] : memref<16x64xf32, #tpu.memory_space<vmem>>, vector<16x64xf32>
    tpu.vector_store %arg8[%c0_176, %c0_177], %603 {strides = array<i32>} : memref<16x64xf32, #tpu.memory_space<vmem>>, vector<16x64xf32>,
    return
  }
  func.func @transform_0(%arg0: i32) -> (i32, i32) {
    %c0_i32 = arith.constant 0 : i32
    %c0_i32_0 = arith.constant 0 : i32
    %c0_i32_1 = arith.constant 0 : i32
    return %c0_i32, %c0_i32_0 : i32, i32
  }
  func.func @transform_1(%arg0: i32) -> (i32, i32) {
    %c0_i32 = arith.constant 0 : i32
    %c0_i32_0 = arith.constant 0 : i32
    %c0_i32_1 = arith.constant 0 : i32
    return %c0_i32, %c0_i32_0 : i32, i32
  }
  func.func @transform_2(%arg0: i32) -> (i32, i32, i32) {
    %c0_i32 = arith.constant 0 : i32
    %c0_i32_0 = arith.constant 0 : i32
    %c0_i32_1 = arith.constant 0 : i32
    %c0_i32_2 = arith.constant 0 : i32
    return %c0_i32, %c0_i32_0, %c0_i32_1 : i32, i32, i32
  }
  func.func @transform_3(%arg0: i32) -> (i32, i32, i32) {
    %c0_i32 = arith.constant 0 : i32
    %c0_i32_0 = arith.constant 0 : i32
    %c0_i32_1 = arith.constant 0 : i32
    %c0_i32_2 = arith.constant 0 : i32
    return %c0_i32, %c0_i32_0, %c0_i32_1 : i32, i32, i32
  }
  func.func @transform_4(%arg0: i32) -> (i32, i32) {
    %c0_i32 = arith.constant 0 : i32
    %c0_i32_0 = arith.constant 0 : i32
    %c0_i32_1 = arith.constant 0 : i32
    return %c0_i32, %c0_i32_0 : i32, i32
  }
  func.func @transform_5(%arg0: i32) -> (i32, i32) {
    %c0_i32 = arith.constant 0 : i32
    %c0_i32_0 = arith.constant 0 : i32
    %c0_i32_1 = arith.constant 0 : i32
    return %c0_i32, %c0_i32_0 : i32, i32
  }
  func.func @transform_6(%arg0: i32) -> (i32, i32) {
    %c0_i32 = arith.constant 0 : i32
    %c0_i32_0 = arith.constant 0 : i32
    %c0_i32_1 = arith.constant 0 : i32
    return %c0_i32, %c0_i32_0 : i32, i32
  }
  func.func @transform_7(%arg0: i32) -> (i32, i32) {
    %c0_i32 = arith.constant 0 : i32
    %c0_i32_0 = arith.constant 0 : i32
    %c0_i32_1 = arith.constant 0 : i32
    return %c0_i32, %c0_i32_0 : i32, i32
  }
}

</mosaic_0001>

<bundles_post_ra>
// kernel: decoder_block_router.1
= control target key start
LH: loop header
LB: loop body
LE: loop exit
PB: predicated region body
PF: predicated region fallthrough
CT: control target
= control target key end

     0   :  { %12 = vsyncpa [#allocation3], 0  ;;  %s7635_s0 = inlined_call_operand.vmem [shape: f32[16,32], index: 0, kind: input, shape index: {}]   ;;  %s7636_s1 = inlined_call_operand.vmem [shape: f32[32,32], index: 1, kind: input, shape index: {}]   ;;  %s7637_s2 = inlined_call_operand.hbm [shape: f32[8,32,32], index: 2, kind: input, shape index: {}]   ;;  %s7638_s3 = inlined_call_operand.hbm [shape: f32[5,32,64], index: 3, kind: input, shape index: {}]   ;;  %s7639_s4 = inlined_call_operand.vmem [shape: f32[64,32], index: 4, kind: input, shape index: {}]   ;;  %s7640_s5 = inlined_call_operand.vmem [shape: f32[27,32], index: 5, kind: input, shape index: {}]   ;;  %s7641_s6 = inlined_call_operand.vmem [shape: f32[2,64], index: 6, kind: input, shape index: {}]   ;;  %s7642_s7 = inlined_call_operand.vmem [shape: f32[16,64], index: 7, kind: output, shape index: {}]  }
   0x1   :  { %13 = vsyncpa [#allocation5], 0  ;;  %s6825_s24 = smov [#allocation2]   ;;  %s6777_s28 = scalar_lea.hbm %s7637_s2, 4096 }
   0x2   :  { %s23_s25 = sshll.u32 %s6825_s24, 4  ;;  %p6778_p0 = scmp.ne.s32.totalorder %s7637_s2, %s6777_s28  ;;  %s24_s25 = int_to_ptr.vmem [resolvable:$true] %s23_s25 }
   0x3   :  { %p6781_p1 = scmp.lt.u32.totalorder %s6777_s28, %s7637_s2 }
   0x5   :  { %p6783_p2 = pnand %p6781_p1, %p6778_p0 }
   0x7   :  { %6786 = shalt.err (!%p6783_p2)
}
   0x8   :  { %s6787_s10 = scalar_lea.vmem %s24_s25, 4096  ;;  %p6792_p4 = scmp.lt.s32.totalorder %s24_s25, %s24_s25 }
   0x9   :  { %p6788_p3 = scmp.ne.s32.totalorder %s24_s25, %s6787_s10  ;;  %p6793_p5 = scmp.lt.s32.totalorder %s6787_s10, %s6787_s10 }
   0xb   :  { %p6794_p6 = por %p6793_p5, %p6792_p4 }
   0xd   :  { %p6795_p7 = pnand %p6794_p6, %p6788_p3 }
   0xf   :  { %6798 = shalt.err (!%p6795_p7)
}
  0x10   :  { %s6826_s11 = smov 128   ;;  %s6827_s12 = smov 8  }
  0x11   :  { %29 = dma.hbm_to_vmem [thread:$0]  %s7637_s2, 4096, %s24_s25, [#allocation3], %s6826_s11, %s6826_s11, %s6827_s12  }
  0x12   :  { %s6828_s15 = smov [#allocation4]   ;;  %s6799_s19 = scalar_lea.hbm %s7638_s3, 2560 }
  0x13   :  { %s35_s16 = sshll.u32 %s6828_s15, 4  ;;  %p6800_p8 = scmp.ne.s32.totalorder %s7638_s3, %s6799_s19  ;;  %s36_s16 = int_to_ptr.vmem [resolvable:$true] %s35_s16 }
  0x14   :  { %p6803_p9 = scmp.lt.u32.totalorder %s6799_s19, %s7638_s3 }
  0x16   :  { %p6805_p10 = pnand %p6803_p9, %p6800_p8 }
  0x18   :  { %6808 = shalt.err (!%p6805_p10)
}
  0x19   :  { %s6809_s24 = scalar_lea.vmem %s36_s16, 2560  ;;  %p6814_p12 = scmp.lt.s32.totalorder %s36_s16, %s36_s16 }
  0x1a   :  { %p6810_p11 = scmp.ne.s32.totalorder %s36_s16, %s6809_s24  ;;  %p6815_p13 = scmp.lt.s32.totalorder %s6809_s24, %s6809_s24 }
  0x1c   :  { %p6816_p0 = por %p6815_p13, %p6814_p12 }
  0x1e   :  { %p6817_p1 = pnand %p6816_p0, %p6810_p11 }
  0x20   :  { %6820 = shalt.err (!%p6817_p1)
}
  0x21   :  { %41 = dma.hbm_to_vmem [thread:$0]  %s7638_s3, 2560, %s36_s16, [#allocation5], %s6826_s11, %s6826_s11, %s6827_s12  }
  0x22   :  { %6821 = dma.done.wait [#allocation3], 4096  }
  0x23   :  { %6822 = vsyncadd [#allocation3], 4294963200 }
  0x24   :  { %6823 = dma.done.wait [#allocation5], 2560  }
  0x25   :  { %6824 = vsyncadd [#allocation5], 4294964736  ;;  %v6829_v0 = vmov 0.0|0.0   ;;  %vm6830_vm0 = vmmov 0   ;;  %v6831_v1 = vmov 0.0   ;;  %v74_v2 = vld [vmem:[#allocation4] sm:$0xff]  ;;  %v78_v17 = vlaneseq }
  0x26   :  { %6395 = vmatprep.subr.bf16.mxu0 %v6829_v0  ;;  %5966 = vmatprep.mubr.msk.f32.mxu0 %vm6830_vm0, %v6831_v1  ;;  %v75_v3 = vld [vmem:[#allocation4 + $0x8] sm:$0xff]  ;;  %v76_v4 = vld [vmem:[#allocation4 + $0x10] sm:$0xff]  ;;  %vm82_vm1 = vcmask 261120   ;;  %v77_v6 = vld [vmem:[#allocation4 + $0x18] sm:$0xff]  ;;  %vm253_vm2 = vcmask 64512   ;;  %s6832_s8 = smov 112  }
  0x27   :  { %v6401_v5 = vpack.c.bf16 %v75_v3, %v74_v2  ;;  %v65_v7 = vld [vmem:[#allocation2] sm:$0xff]  ;;  %v66_v8 = vld [vmem:[#allocation2 + $0x8] sm:$0xff]  ;;  %v6405_v9 = vpack.c.bf16 %v77_v6, %v76_v4  ;;  %v67_v12 = vld [vmem:[#allocation2 + $0x10] sm:$0xff]  ;;  %v6939_v18 = vshrl.u32 %v78_v17, 7  ;;  %s6833_s9 = smov 120   ;;  %s6834_s10 = smov 104  }
  0x28   :  { %v6396_v10 = vpack.c.bf16 %v66_v8, %v65_v7  ;;  %v6914_v11 = vld [vmem:[%s7635_s0] sm:$0xff]  ;;  %v68_v13 = vld [vmem:[#allocation2 + $0x18] sm:$0xff]  ;;  %v6922_v15 = vld [vmem:[%s7635_s0 + $0x8] sm:$0xff]  ;;  %vm330_vm3 = vcmask 60416   ;;  %s6835_s11 = smov 32   ;;  %s6836_s13 = smov 88  }
  0x29   :  { %6402 = vmatprep.subr.bf16.mxu1 %v6401_v5  ;;  %5977 = vmatprep.mubr.msk.f32.mxu1 %vm82_vm1, %v6914_v11  ;;  %v6399_v14 = vpack.c.bf16 %v68_v13, %v67_v12  ;;  %v6927_v16 = vld [vmem:[%s7640_s5] sm:$0xff]  ;;  %v6942_v19 = vsub.s32 5, %v6939_v18  ;;  %v6945_v20 = vsub.s32 4, %v6939_v18  ;;  %v7015_v63 = vsub.s32 6, %v6939_v18  ;;  %s6837_s14 = smov 96   ;;  %s6838_s15 = smov 80   ;;  %vm7387_vm9 = vmpackc.low %vm253_vm2, %vm253_vm2 }
  0x2a   :  { %6404 = vmatpush3.bf16.msra.mxu1 %v6401_v5  ;;  %6397 = vmatpush3.bf16.msra.mxu0 %v6396_v10  ;;  %s6839_s16 = smov 72   ;;  %s6840_s17 = smov 16   ;;  %vm927_vm4 = vcmask 130048   ;;  %vm929_vm5 = vcmask 195584   ;;  %vm1593_vm6 = vcmask 1043456   ;;  %vm1929_vm7 = vcmask 31744  }
  0x2b   :  { %6406 = vmatprep.subr.bf16.mxu1 %v6405_v9  ;;  %6398 = vmatprep.subr.bf16.mxu0 %v6829_v0  ;;  %v240_v21 = vrot.slane %v6927_v16, %v6942_v19  ;;  %v81_v23 = vrot.slane %v6927_v16, %v6945_v20  ;;  %v246_v2 = vrot.slane %v6927_v16, %v7015_v63  ;;  %s6841_s18 = smov 24   ;;  %vm3448_vm8 = vcmask 523264  }
  0x2e   :  { %6408 = vmatpush3.bf16.msra.mxu1 %v6405_v9  ;;  %6400 = vmatpush3.bf16.msra.mxu0 %v6399_v14 }
  0x2f   :  { %5980 = vmatprep.subr.mxu0 %v6831_v1  ;;  %5985 = vmatprep.subr.mxu1 %v6831_v1 }
  0x31   :  { %5978 = vmatmul.mubr.msk.f32.vlgmr.msra.gmra.mrb[0].mxu1 %vm82_vm1, %v6922_v15  ;;  %5967 = vmatmul.mubr.msk.f32.vlgmr.msra.gmra.mrb[0].mxu0 %vm82_vm1, %v6927_v16 }
  0x32   :  { %5982 = vmatprep.mubr.msk.f32.mxu0 %vm6830_vm0, %v6831_v1  ;;  %5987 = vmatprep.mubr.msk.f32.mxu1 %vm6830_vm0, %v6831_v1 }
 0x104   :  { %v6949_v22 = vpop.f32.mrb[0].mxu1  ;;  %v152_v24 = vpop.f32.mrb[0].mxu0 }
 0x105   :  { %v6953_v25 = vpop.f32.mrb[1].mxu1  ;;  %v5968_v26 = vpop.f32.mrb[1].mxu0  ;;  %v153_v28 = vadd.f32 %v152_v24, %v81_v23  ;;  %v242_v29 = vadd.f32 %v6949_v22, %v240_v21 }
 0x106   :  { %v241_v27 = vadd.f32 %v240_v21, %v6953_v25 }
 0x108   :  { %586 = vrot.lane.b32.xlu1 %v241_v27, %s6832_s8  ;;  %421 = vrot.lane.b32.xlu0 %v241_v27, %s6833_s9 }
 0x109   :  { %5981 = vmatpush3.xpose.msk.msra.mxu0 %vm253_vm2, %v241_v27 }
 0x10a   :  { %5990 = vmatprep.subr.mxu0 %v6831_v1 }
 0x10c   :  { %5983 = vmatmul.mubr.msk.f32.vlgmr.msra.gmra.mrb[2].mxu0 %vm253_vm2, %v153_v28  ;;  %584 = vrot.lane.b32.xlu1 %v153_v28, %s6832_s8 }
 0x10d   :  { %419 = vrot.lane.b32.xlu0 %v153_v28, %s6833_s9  ;;  %5992 = vmatprep.mubr.msk.f32.mxu0 %vm6830_vm0, %v6831_v1 }
 0x110   :  { %749 = vrot.lane.b32.xlu1 %v153_v28, %s6834_s10 }
 0x111   :  { %751 = vrot.lane.b32.xlu0 %v241_v27, %s6834_s10 }
 0x114   :  { %1253 = vrot.lane.b32.xlu1 %v242_v29, %s6832_s8 }
 0x115   :  { %1092 = vrot.lane.b32.xlu0 %v242_v29, %s6833_s9 }
 0x119   :  { %1414 = vrot.lane.b32.xlu0 %v242_v29, %s6834_s10 }
 0x17a   :  { %v422_v30 = vpop.permute.xlu0 %421  ;;  %v587_v31 = vpop.permute.xlu1 %586 }
 0x17b   :  { %5991 = vmatpush3.xpose.msk.msra.mxu0 %vm253_vm2, %v422_v30 }
 0x17c   :  { %6000 = vmatprep.subr.mxu0 %v6831_v1 }
 0x17e   :  { %v585_v33 = vpop.permute.xlu1 %584 }
 0x17f   :  { %v420_v32 = vpop.permute.xlu0 %419 }
 0x180   :  { %5993 = vmatmul.mubr.msk.f32.vlgmr.msra.gmra.mrb[4].mxu0 %vm253_vm2, %v420_v32 }
 0x181   :  { %6001 = vmatpush3.xpose.msk.msra.mxu0 %vm253_vm2, %v587_v31  ;;  %6002 = vmatprep.mubr.msk.f32.mxu0 %vm6830_vm0, %v6831_v1 }
 0x182   :  { %6010 = vmatprep.subr.mxu0 %v6831_v1  ;;  %v750_v35 = vpop.permute.xlu1 %749 }
 0x183   :  { %v752_v34 = vpop.permute.xlu0 %751 }
 0x184   :  { %6003 = vmatmul.mubr.msk.f32.vlgmr.msra.gmra.mrb[6].mxu0 %vm253_vm2, %v585_v33 }
 0x185   :  { %6011 = vmatpush3.xpose.msk.msra.mxu0 %vm253_vm2, %v752_v34  ;;  %6012 = vmatprep.mubr.msk.f32.mxu0 %vm6830_vm0, %v6831_v1 }
 0x186   :  { %6020 = vmatprep.subr.mxu0 %v6831_v1  ;;  %v1254_v37 = vpop.permute.xlu1 %1253 }
 0x187   :  { %v1093_v36 = vpop.permute.xlu0 %1092 }
 0x188   :  { %6013 = vmatmul.mubr.msk.f32.vlgmr.msra.gmra.mrb[8].mxu0 %vm253_vm2, %v750_v35 }
 0x189   :  { %6021 = vmatpush3.xpose.msk.msra.mxu0 %vm253_vm2, %v242_v29  ;;  %6022 = vmatprep.mubr.msk.f32.mxu0 %vm6830_vm0, %v6831_v1 }
 0x18a   :  { %6030 = vmatprep.subr.mxu0 %v6831_v1 }
 0x18b   :  { %v1415_v38 = vpop.permute.xlu0 %1414 }
 0x18c   :  { %6023 = vmatmul.mubr.msk.f32.vlgmr.msra.gmra.mrb[10].mxu0 %vm253_vm2, %v153_v28 }
 0x18d   :  { %6031 = vmatpush3.xpose.msk.msra.mxu0 %vm253_vm2, %v1093_v36  ;;  %6032 = vmatprep.mubr.msk.f32.mxu0 %vm6830_vm0, %v6831_v1 }
 0x18e   :  { %6040 = vmatprep.subr.mxu0 %v6831_v1 }
 0x190   :  { %6033 = vmatmul.mubr.msk.f32.vlgmr.msra.gmra.mrb[12].mxu0 %vm253_vm2, %v420_v32 }
 0x191   :  { %6041 = vmatpush3.xpose.msk.msra.mxu0 %vm253_vm2, %v1254_v37  ;;  %6042 = vmatprep.mubr.msk.f32.mxu0 %vm6830_vm0, %v6831_v1 }
 0x192   :  { %6050 = vmatprep.subr.mxu0 %v6831_v1 }
 0x194   :  { %6043 = vmatmul.mubr.msk.f32.vlgmr.msra.gmra.mrb[14].mxu0 %vm253_vm2, %v585_v33 }
 0x195   :  { %6051 = vmatpush3.xpose.msk.msra.mxu0 %vm253_vm2, %v1415_v38  ;;  %6052 = vmatprep.mubr.msk.f32.mxu0 %vm6830_vm0, %v6831_v1 }
 0x196   :  { %6409 = vmatprep.subr.bf16.mxu0 %v6829_v0 }
 0x198   :  { %6053 = vmatmul.mubr.msk.f32.vlgmr.msra.gmra.mrb[16].mxu0 %vm253_vm2, %v750_v35 }
 0x199   :  { %6068 = vmatprep.mubr.msk.f32.mxu0 %vm6830_vm0, %v6831_v1 }
 0x1df   :  { %v326_v39 = vpop.f32.mrb[2].mxu0 }
 0x1e0   :  { %v5984_v40 = vpop.f32.mrb[3].mxu0  ;;  %v331_v41 = vsel %vm330_vm3, %v326_v39, -inf }
 0x1e1   :  { %332 = vmax.xlane.f32.xlu1 %v331_v41 }
 0x253   :  { %v493_v42 = vpop.f32.mrb[4].mxu0 }
 0x254   :  { %v5994_v43 = vpop.f32.mrb[5].mxu0  ;;  %v497_v44 = vsel %vm330_vm3, %v493_v42, -inf }
 0x255   :  { %498 = vmax.xlane.f32.xlu0 %v497_v44 }
 0x257   :  { %v658_v45 = vpop.f32.mrb[6].mxu0 }
 0x258   :  { %v6004_v46 = vpop.f32.mrb[7].mxu0  ;;  %v662_v47 = vsel %vm330_vm3, %v658_v45, -inf }
 0x259   :  { %663 = vmax.xlane.f32.xlu0 %v662_v47 }
 0x25b   :  { %v823_v48 = vpop.f32.mrb[8].mxu0 }
 0x25c   :  { %v6014_v49 = vpop.f32.mrb[9].mxu0  ;;  %v827_v50 = vsel %vm330_vm3, %v823_v48, -inf }
 0x25d   :  { %828 = vmax.xlane.f32.xlu1 %v827_v50 }
 0x25f   :  { %v1000_v51 = vpop.f32.mrb[10].mxu0 }
 0x260   :  { %v6024_v52 = vpop.f32.mrb[11].mxu0  ;;  %v1004_v53 = vsel %vm330_vm3, %v1000_v51, -inf }
 0x261   :  { %1005 = vmax.xlane.f32.xlu0 %v1004_v53 }
 0x263   :  { %v1162_v54 = vpop.f32.mrb[12].mxu0 }
 0x264   :  { %v6034_v55 = vpop.f32.mrb[13].mxu0  ;;  %v1166_v56 = vsel %vm330_vm3, %v1162_v54, -inf }
 0x265   :  { %1167 = vmax.xlane.f32.xlu1 %v1166_v56 }
 0x267   :  { %v1323_v57 = vpop.f32.mrb[14].mxu0 }
 0x268   :  { %v6044_v58 = vpop.f32.mrb[15].mxu0  ;;  %v1327_v59 = vsel %vm330_vm3, %v1323_v57, -inf }
 0x269   :  { %1328 = vmax.xlane.f32.xlu0 %v1327_v59 }
 0x26b   :  { %v1484_v60 = vpop.f32.mrb[16].mxu0 }
 0x26c   :  { %v6054_v61 = vpop.f32.mrb[17].mxu0  ;;  %v1488_v62 = vsel %vm330_vm3, %v1484_v60, -inf }
 0x26d   :  { %1489 = vmax.xlane.f32.xlu1 %v1488_v62 }
 0x26e   :  { %v333_v9 = vpop.xlane.xlu1 %332 }
 0x26f   :  { %v334_v12 = vsub.f32 %v326_v39, %v333_v9 }
 0x271   :  { %v335_v14 = vmul.f32 1.442695, %v334_v12 }
 0x27f   :  { %248 = vrot.lane.b32.xlu0 %v246_v2, %s6835_s11 }
 0x2e2   :  { %v499_v3 = vpop.xlane.xlu0 %498 }
 0x2e3   :  { %v500_v17 = vsub.f32 %v493_v42, %v499_v3 }
 0x2e5   :  { %v501_v21 = vmul.f32 1.442695, %v500_v17 }
 0x2e6   :  { %v664_v4 = vpop.xlane.xlu0 %663 }
 0x2e7   :  { %v665_v23 = vsub.f32 %v658_v45, %v664_v4 }
 0x2ea   :  { %v829_v24 = vpop.xlane.xlu1 %828 }
 0x2eb   :  { %v830_v26 = vsub.f32 %v823_v48, %v829_v24 }
 0x2ed   :  { %v831_v27 = vmul.f32 1.442695, %v830_v26 }
 0x2ee   :  { %v1006_v5 = vpop.xlane.xlu0 %1005 }
 0x2ef   :  { %v1007_v28 = vsub.f32 %v1000_v51, %v1006_v5 }
 0x2f1   :  { %v1008_v32 = vmul.f32 1.442695, %v1007_v28 }
 0x2f2   :  { %v1168_v30 = vpop.xlane.xlu1 %1167 }
 0x2f3   :  { %v1169_v33 = vsub.f32 %v1162_v54, %v1168_v30 }
 0x2f5   :  { %v1170_v38 = vmul.f32 1.442695, %v1169_v33 }
 0x2f6   :  { %v1329_v6 = vpop.xlane.xlu0 %1328 }
 0x2f7   :  { %v1330_v10 = vsub.f32 %v1323_v57, %v1329_v6 }
 0x2f9   :  { %v1331_v13 = vmul.f32 1.442695, %v1330_v10 }
 0x2fa   :  { %v249_v7 = vpop.permute.xlu0 %248  ;;  %v1490_v35 = vpop.xlane.xlu1 %1489 }
 0x2fb   :  { %v7021_v8 = vadd.f32 %v249_v7, %v6953_v25  ;;  %6652 = vpow2.f32 %v1331_v13  ;;  %v666_v25 = vmul.f32 1.442695, %v665_v23  ;;  %v1491_v39 = vsub.f32 %v1484_v60, %v1490_v35 }
 0x2fc   :  { %6654 = vpow2.f32 %v335_v14  ;;  %v252_v49 = vadd.f32 %v6949_v22, %v249_v7 }
 0x2fd   :  { %508 = vrot.lane.b32.xlu0 %v7021_v8, %s6836_s13  ;;  %343 = vrot.lane.b32.xlu1 %v7021_v8, %s6837_s14  ;;  %6656 = vpow2.f32 %v501_v21  ;;  %v1492_v42 = vmul.f32 1.442695, %v1491_v39 }
 0x2fe   :  { %6658 = vpow2.f32 %v666_v25 }
 0x2ff   :  { %6660 = vpow2.f32 %v831_v27 }
 0x300   :  { %6662 = vpow2.f32 %v1008_v32 }
 0x301   :  { %673 = vrot.lane.b32.xlu0 %v7021_v8, %s6838_s15  ;;  %6664 = vpow2.f32 %v1170_v38  ;;  %v71_v38 = vld [vmem:[#allocation2 + $0x28] sm:$0xff] }
 0x302   :  { %6666 = vpow2.f32 %v1492_v42 }
 0x305   :  { %v7029_v29 = vpop.eup %6652 }
 0x306   :  { %v6655_v31 = vpop.eup %6654  ;;  %v1333_v34 = vsel %vm330_vm3, %v7029_v29, 0.0 }
 0x307   :  { %v337_v36 = vsel %vm330_vm3, %v6655_v31, 0.0  ;;  %v6657_v37 = vpop.eup %6656 }
 0x308   :  { %v503_v40 = vsel %vm330_vm3, %v6657_v37, 0.0  ;;  %v6659_v41 = vpop.eup %6658 }
 0x309   :  { %v668_v43 = vsel %vm330_vm3, %v6659_v41, 0.0  ;;  %v6661_v44 = vpop.eup %6660 }
 0x30a   :  { %v833_v45 = vsel %vm330_vm3, %v6661_v44, 0.0  ;;  %v7037_v46 = vpop.eup %6662 }
 0x30b   :  { %v1010_v47 = vsel %vm330_vm3, %v7037_v46, 0.0  ;;  %v7041_v48 = vpop.eup %6664 }
 0x30c   :  { %v1172_v50 = vsel %vm330_vm3, %v7041_v48, 0.0  ;;  %v7046_v51 = vpop.eup %6666 }
 0x30d   :  { %v1494_v52 = vsel %vm330_vm3, %v7046_v51, 0.0 }
 0x320   :  { %1334 = vadd.xlane.f32.xlu0 %v1333_v34 }
 0x321   :  { %338 = vadd.xlane.f32.xlu1 %v337_v36 }
 0x325   :  { %504 = vadd.xlane.f32.xlu1 %v503_v40 }
 0x329   :  { %669 = vadd.xlane.f32.xlu1 %v668_v43  ;;  %v72_v43 = vld [vmem:[#allocation2 + $0x30] sm:$0xff] }
 0x32d   :  { %834 = vadd.xlane.f32.xlu1 %v833_v45 }
 0x331   :  { %1011 = vadd.xlane.f32.xlu1 %v1010_v47  ;;  %v1673_v47 = vld [vmem:[#allocation2 + $0x40] sm:$0xff] }
 0x335   :  { %1173 = vadd.xlane.f32.xlu1 %v1172_v50 }
 0x336   :  { %1016 = vrot.lane.b32.xlu0 %v252_v49, %s6837_s14 }
 0x339   :  { %1495 = vadd.xlane.f32.xlu1 %v1494_v52 }
 0x33a   :  { %1177 = vrot.lane.b32.xlu0 %v252_v49, %s6836_s13 }
 0x33e   :  { %1338 = vrot.lane.b32.xlu0 %v252_v49, %s6838_s15 }
 0x342   :  { %1499 = vrot.lane.b32.xlu0 %v252_v49, %s6839_s16  ;;  %v1675_v49 = vld [vmem:[#allocation2 + $0x50] sm:$0xff] }
 0x34a   :  { %838 = vrot.lane.b32.xlu1 %v7021_v8, %s6839_s16 }
 0x36f   :  { %v344_v22 = vpop.permute.xlu1 %343  ;;  %v509_v55 = vpop.permute.xlu0 %508 }
 0x370   :  { %5986 = vmatpush3.msra.mxu1 %v344_v22 }
 0x371   :  { %5995 = vmatprep.subr.mxu1 %v6831_v1 }
 0x373   :  { %v674_v60 = vpop.permute.xlu0 %673 }
 0x3ad   :  { %v1335_v3 = vpop.xlane.xlu0 %1334 }
 0x3ae   :  { %v339_v53 = vpop.xlane.xlu1 %338 }
 0x3af   :  { %6668 = vrcp.f32 %v339_v53 }
 0x3b1   :  { %v1017_v7 = vpop.permute.xlu0 %1016 }
 0x3b2   :  { %v505_v54 = vpop.xlane.xlu1 %504 }
 0x3b3   :  { %6670 = vrcp.f32 %v505_v54 }
 0x3b5   :  { %v1178_v14 = vpop.permute.xlu0 %1177 }
 0x3b6   :  { %v670_v56 = vpop.xlane.xlu1 %669 }
 0x3b7   :  { %6672 = vrcp.f32 %v670_v56 }
 0x3b9   :  { %v6669_v57 = vpop.eup %6668  ;;  %v1339_v23 = vpop.permute.xlu0 %1338 }
 0x3ba   :  { %v835_v58 = vpop.xlane.xlu1 %834  ;;  %v341_v59 = vmul.f32 %v6669_v57, %v6655_v31 }
 0x3bb   :  { %6674 = vrcp.f32 %v835_v58 }
 0x3bc   :  { %5988 = vmatmul.mubr.msk.f32.vlgmr.msra.gmra.mrb[2].mxu1 %vm253_vm2, %v341_v59 }
 0x3bd   :  { %v6671_v61 = vpop.eup %6670  ;;  %5996 = vmatpush3.msra.mxu1 %v509_v55  ;;  %5997 = vmatprep.mubr.msk.f32.mxu1 %vm6830_vm0, %v6831_v1  ;;  %v1500_v28 = vpop.permute.xlu0 %1499 }
 0x3be   :  { %v1012_v62 = vpop.xlane.xlu1 %1011  ;;  %6005 = vmatprep.subr.mxu1 %v6831_v1  ;;  %v507_v2 = vmul.f32 %v6671_v61, %v6657_v37  ;;  %v70_v37 = vld [vmem:[#allocation2 + $0x20] sm:$0xff] }
 0x3bf   :  { %6676 = vrcp.f32 %v1012_v62  ;;  %v6410_v40 = vpack.c.bf16 %v71_v38, %v70_v37 }
 0x3c0   :  { %5998 = vmatmul.mubr.msk.f32.vlgmr.msra.gmra.mrb[4].mxu1 %vm253_vm2, %v507_v2 }
 0x3c1   :  { %v6673_v4 = vpop.eup %6672  ;;  %6006 = vmatpush3.msra.mxu1 %v674_v60  ;;  %6007 = vmatprep.mubr.msk.f32.mxu1 %vm6830_vm0, %v6831_v1 }
 0x3c2   :  { %v1174_v5 = vpop.xlane.xlu1 %1173  ;;  %v672_v6 = vmul.f32 %v6673_v4, %v6659_v41  ;;  %6015 = vmatprep.subr.mxu1 %v6831_v1  ;;  %6411 = vmatpush3.bf16.msra.mxu0 %v6410_v40  ;;  %v1684_v4 = vld [vmem:[#allocation4 + $0x28] sm:$0xff] }
 0x3c3   :  { %6678 = vrcp.f32 %v1174_v5  ;;  %6412 = vmatprep.subr.bf16.mxu0 %v6829_v0 }
 0x3c4   :  { %6008 = vmatmul.mubr.msk.f32.vlgmr.msra.gmra.mrb[6].mxu1 %vm253_vm2, %v672_v6  ;;  %6680 = vrcp.f32 %v1335_v3  ;;  %v1683_v3 = vld [vmem:[#allocation4 + $0x20] sm:$0xff] }
 0x3c5   :  { %6017 = vmatprep.mubr.msk.f32.mxu1 %vm6830_vm0, %v6831_v1  ;;  %v6675_v9 = vpop.eup %6674 }
 0x3c6   :  { %v1496_v8 = vpop.xlane.xlu1 %1495  ;;  %v837_v12 = vmul.f32 %v6675_v9, %v6661_v44 }
 0x3c7   :  { %6682 = vrcp.f32 %v1496_v8  ;;  %v6424_v8 = vpack.c.bf16 %v1684_v4, %v1683_v3 }
 0x3c9   :  { %v6677_v13 = vpop.eup %6676 }
 0x3ca   :  { %v839_v10 = vpop.permute.xlu1 %838  ;;  %v1014_v17 = vmul.f32 %v6677_v13, %v7037_v46  ;;  %v1686_v13 = vld [vmem:[#allocation4 + $0x38] sm:$0xff] }
 0x3cb   :  { %6016 = vmatpush3.msra.mxu1 %v839_v10 }
 0x3cc   :  { %6018 = vmatmul.mubr.msk.f32.vlgmr.msra.gmra.mrb[8].mxu1 %vm253_vm2, %v837_v12  ;;  %6025 = vmatprep.subr.mxu1 %v6831_v1  ;;  %v1685_v12 = vld [vmem:[#allocation4 + $0x30] sm:$0xff] }
 0x3cd   :  { %6026 = vmatpush3.msra.mxu1 %v1017_v7  ;;  %6027 = vmatprep.mubr.msk.f32.mxu1 %vm6830_vm0, %v6831_v1  ;;  %v6679_v21 = vpop.eup %6678 }
 0x3ce   :  { %6035 = vmatprep.subr.mxu1 %v6831_v1  ;;  %v1176_v24 = vmul.f32 %v6679_v21, %v7041_v48  ;;  %v6681_v25 = vpop.eup %6680  ;;  %v1674_v48 = vld [vmem:[#allocation2 + $0x48] sm:$0xff] }
 0x3cf   :  { %v1337_v26 = vmul.f32 %v6681_v25, %v7029_v29  ;;  %v6415_v50 = vpack.c.bf16 %v1674_v48, %v1673_v47  ;;  %v7122_v21 = vld [vmem:[%s7640_s5 + $0x8] sm:$0xff] }
 0x3d0   :  { %6028 = vmatmul.mubr.msk.f32.vlgmr.msra.gmra.mrb[10].mxu1 %vm253_vm2, %v1014_v17  ;;  %v7117_v17 = vsub.s32 0, %v6939_v18 }
 0x3d1   :  { %6036 = vmatpush3.msra.mxu1 %v1178_v14  ;;  %6037 = vmatprep.mubr.msk.f32.mxu1 %vm6830_vm0, %v6831_v1  ;;  %v6683_v27 = vpop.eup %6682  ;;  %v6427_v14 = vpack.c.bf16 %v1686_v13, %v1685_v12 }
 0x3d2   :  { %6045 = vmatprep.subr.mxu1 %v6831_v1  ;;  %v1498_v30 = vmul.f32 %v6683_v27, %v7046_v51  ;;  %v1676_v51 = vld [vmem:[#allocation2 + $0x58] sm:$0xff] }
 0x3d3   :  { %v6419_v22 = vpack.c.bf16 %v1676_v51, %v1675_v49 }
 0x3d4   :  { %6038 = vmatmul.mubr.msk.f32.vlgmr.msra.gmra.mrb[12].mxu1 %vm253_vm2, %v1176_v24 }
 0x3d5   :  { %6046 = vmatpush3.msra.mxu1 %v1339_v23  ;;  %6047 = vmatprep.mubr.msk.f32.mxu1 %vm6830_vm0, %v6831_v1  ;;  %v1690_v23 = vrot.slane %v7122_v21, %v7117_v17 }
 0x3d6   :  { %6055 = vmatprep.subr.mxu1 %v6831_v1 }
 0x3d8   :  { %6048 = vmatmul.mubr.msk.f32.vlgmr.msra.gmra.mrb[14].mxu1 %vm253_vm2, %v1337_v26 }
 0x3d9   :  { %6056 = vmatpush3.msra.mxu1 %v1500_v28  ;;  %6057 = vmatprep.mubr.msk.f32.mxu1 %vm6830_vm0, %v6831_v1  ;;  %v7133_v28 = vsub.s32 7, %v6939_v18 }
 0x3da   :  { %6416 = vmatprep.subr.bf16.mxu1 %v6415_v50 }
 0x3dc   :  { %6058 = vmatmul.mubr.msk.f32.vlgmr.msra.gmra.mrb[16].mxu1 %vm253_vm2, %v1498_v30  ;;  %v1598_v30 = vrot.slane %v6927_v16, %v7133_v28 }
 0x3dd   :  { %6079 = vmatprep.mubr.msk.f32.mxu1 %vm82_vm1, %v6914_v11  ;;  %v73_v11 = vld [vmem:[#allocation2 + $0x38] sm:$0xff]  ;;  %6418 = vmatpush3.bf16.msra.mxu1 %v6415_v50 }
 0x3de   :  { %v6413_v44 = vpack.c.bf16 %v73_v11, %v72_v43  ;;  %6420 = vmatprep.subr.bf16.mxu1 %v6419_v22 }
 0x3e0   :  { %6414 = vmatpush3.bf16.msra.mxu0 %v6413_v44 }
 0x3e1   :  { %6423 = vmatprep.subr.bf16.mxu0 %v6829_v0  ;;  %6422 = vmatpush3.bf16.msra.mxu1 %v6419_v22 }
 0x3e2   :  { %6093 = vmatprep.subr.mxu1 %v6831_v1 }
 0x3e4   :  { %6080 = vmatmul.mubr.msk.f32.vlgmr.msra.gmra.mrb[18].mxu1 %vm82_vm1, %v6922_v15 }
 0x3e5   :  { %6095 = vmatprep.mubr.msk.f32.mxu1 %vm6830_vm0, %v6831_v1 }
 0x48f   :  { %v415_v31 = vpop.f32.mrb[2].mxu1 }
 0x490   :  { %v5989_v32 = vpop.f32.mrb[3].mxu1 }
 0x493   :  { %v580_v33 = vpop.f32.mrb[4].mxu1 }
 0x494   :  { %915 = vrot.lane.b32.xlu0 %v580_v33, %s6827_s12  ;;  %v5999_v29 = vpop.f32.mrb[5].mxu1 }
 0x495   :  { %v7141_v29 = vsub.s32 1, %v6939_v18 }
 0x497   :  { %v745_v34 = vpop.f32.mrb[6].mxu1 }
 0x498   :  { %v6009_v35 = vpop.f32.mrb[7].mxu1 }
 0x49f   :  { %v910_v36 = vpop.f32.mrb[8].mxu1 }
 0x4a0   :  { %v6019_v39 = vpop.f32.mrb[9].mxu1 }
 0x4a3   :  { %v1088_v41 = vpop.f32.mrb[10].mxu1 }
 0x4a4   :  { %v6029_v42 = vpop.f32.mrb[11].mxu1 }
 0x4a7   :  { %v1249_v45 = vpop.f32.mrb[12].mxu1 }
 0x4a8   :  { %1576 = vrot.lane.b32.xlu0 %v1249_v45, %s6827_s12  ;;  %v6039_v46 = vpop.f32.mrb[13].mxu1 }
 0x4ab   :  { %v1410_v52 = vpop.f32.mrb[14].mxu1 }
 0x4ac   :  { %919 = vrot.lane.b32.xlu0 %v745_v34, %s6840_s17  ;;  %1580 = vrot.lane.b32.xlu1 %v1410_v52, %s6840_s17  ;;  %v6049_v53 = vpop.f32.mrb[15].mxu1  ;;  %v1842_v34 = vrot.slane %v7122_v21, %v7141_v29 }
 0x4af   :  { %v1571_v54 = vpop.f32.mrb[16].mxu1 }
 0x4b0   :  { %1584 = vrot.lane.b32.xlu1 %v1571_v54, %s6841_s18  ;;  %v6059_v55 = vpop.f32.mrb[17].mxu1 }
 0x4b4   :  { %923 = vrot.lane.b32.xlu1 %v910_v36, %s6841_s18 }
 0x4b7   :  { %v6081_v24 = vpop.f32.mrb[18].mxu1 }
 0x4b8   :  { %v1757_v25 = vpop.f32.mrb[19].mxu1  ;;  %v1763_v27 = vadd.f32 %v6081_v24, %v1690_v23 }
 0x4b9   :  { %v1758_v26 = vadd.f32 %v1757_v25, %v1690_v23 }
 0x4bb   :  { %2019 = vrot.lane.b32.xlu1 %v1758_v26, %s6833_s9 }
 0x4bf   :  { %2185 = vrot.lane.b32.xlu1 %v1758_v26, %s6832_s8 }
 0x4c3   :  { %2351 = vrot.lane.b32.xlu1 %v1758_v26, %s6834_s10 }
 0x4c7   :  { %2697 = vrot.lane.b32.xlu1 %v1763_v27, %s6833_s9 }
 0x4cb   :  { %2863 = vrot.lane.b32.xlu1 %v1763_v27, %s6832_s8 }
 0x4cf   :  { %3029 = vrot.lane.b32.xlu1 %v1763_v27, %s6834_s10 }
 0x506   :  { %v916_v56 = vpop.permute.xlu0 %915 }
 0x507   :  { %v926_v15 = vsel %vm253_vm2, %v415_v31, %v916_v56 }
 0x51a   :  { %v1577_v57 = vpop.permute.xlu0 %1576 }
 0x51b   :  { %v1587_v59 = vsel %vm253_vm2, %v1088_v41, %v1577_v57 }
 0x51e   :  { %v1581_v58 = vpop.permute.xlu1 %1580  ;;  %v920_v62 = vpop.permute.xlu0 %919 }
 0x51f   :  { %v1588_v60 = vsel %vm927_vm4, %v1587_v59, %v1581_v58  ;;  %v928_v5 = vsel %vm927_vm4, %v926_v15, %v920_v62 }
 0x522   :  { %v1585_v61 = vpop.permute.xlu1 %1584 }
 0x523   :  { %v1589_v2 = vsel %vm929_vm5, %v1588_v60, %v1585_v61 }
 0x524   :  { %v1591_v6 = vrot.slane %v1589_v2, 4 }
 0x526   :  { %v924_v7 = vpop.permute.xlu1 %923 }
 0x527   :  { %v930_v9 = vsel %vm929_vm5, %v928_v5, %v924_v7 }
 0x528   :  { %v1594_v10 = vsel %vm1593_vm6, %v930_v9, %v1591_v6 }
 0x529   :  { %6069 = vmatmul.mubr.msk.f32.vlgmr.msra.gmra.mrb[18].mxu0 %vm82_vm1, %v1594_v10  ;;  %v7200_v10 = vsub.s32 2, %v6939_v18 }
 0x52a   :  { %6425 = vmatpush3.bf16.msra.mxu0 %v6424_v8  ;;  %6090 = vmatprep.mubr.msk.f32.mxu0 %vm6830_vm0, %v6831_v1 }
 0x52b   :  { %6426 = vmatprep.subr.bf16.mxu0 %v6829_v0  ;;  %v1847_v12 = vrot.slane %v7122_v21, %v7200_v10 }
 0x52d   :  { %v2020_v38 = vpop.permute.xlu1 %2019 }
 0x52e   :  { %6428 = vmatpush3.bf16.msra.mxu0 %v6427_v14 }
 0x52f   :  { %6103 = vmatprep.subr.mxu0 %v6831_v1 }
 0x531   :  { %v2186_v40 = vpop.permute.xlu1 %2185 }
 0x535   :  { %v2352_v43 = vpop.permute.xlu1 %2351 }
 0x539   :  { %v2698_v44 = vpop.permute.xlu1 %2697 }
 0x53d   :  { %v2864_v46 = vpop.permute.xlu1 %2863 }
 0x541   :  { %v3030_v48 = vpop.permute.xlu1 %3029 }
 0x5fc   :  { %v1668_v31 = vpop.f32.mrb[18].mxu0 }
 0x5fd   :  { %v1669_v32 = vadd.f32 %v1668_v31, %v1598_v30  ;;  %v6070_v33 = vpop.f32.mrb[19].mxu0 }
 0x5ff   :  { %6091 = vmatmul.mubr.msk.f32.vlgmr.msra.gmra.mrb[20].mxu0 %vm82_vm1, %v1669_v32 }
 0x600   :  { %6105 = vmatprep.mubr.msk.f32.mxu0 %vm6830_vm0, %v6831_v1 }
 0x6d2   :  { %v7145_v35 = vpop.f32.mrb[20].mxu0 }
 0x6d3   :  { %v1843_v36 = vadd.f32 %v1842_v34, %v7145_v35  ;;  %v6092_v37 = vpop.f32.mrb[21].mxu0 }
 0x6d5   :  { %2021 = vrot.lane.b32.xlu0 %v1843_v36, %s6833_s9  ;;  %6094 = vmatpush3.xpose.msk.msra.mxu1 %vm253_vm2, %v1843_v36  ;;  %v2532_v16 = vrot.slane %v1843_v36, 4 }
 0x6d6   :  { %6098 = vmatprep.subr.mxu1 %v6831_v1 }
 0x6d8   :  { %6096 = vmatmul.mubr.msk.f32.vlgmr.msra.gmra.mrb[20].mxu1 %vm253_vm2, %v1758_v26 }
 0x6d9   :  { %2187 = vrot.lane.b32.xlu0 %v1843_v36, %s6832_s8  ;;  %6100 = vmatprep.mubr.msk.f32.mxu1 %vm6830_vm0, %v6831_v1 }
 0x6dd   :  { %2353 = vrot.lane.b32.xlu0 %v1843_v36, %s6834_s10 }
 0x6e1   :  { %2699 = vrot.lane.b32.xlu0 %v2532_v16, %s6833_s9 }
 0x6e5   :  { %2865 = vrot.lane.b32.xlu0 %v2532_v16, %s6832_s8 }
 0x6e9   :  { %3031 = vrot.lane.b32.xlu0 %v2532_v16, %s6834_s10 }
 0x747   :  { %v2022_v39 = vpop.permute.xlu0 %2021 }
 0x748   :  { %6104 = vmatpush3.xpose.msk.msra.mxu0 %vm253_vm2, %v2022_v39 }
 0x749   :  { %6113 = vmatprep.subr.mxu0 %v6831_v1 }
 0x74b   :  { %6106 = vmatmul.mubr.msk.f32.vlgmr.msra.gmra.mrb[22].mxu0 %vm253_vm2, %v2020_v38  ;;  %v2188_v41 = vpop.permute.xlu0 %2187 }
 0x74c   :  { %6114 = vmatpush3.xpose.msk.msra.mxu0 %vm253_vm2, %v2188_v41  ;;  %6115 = vmatprep.mubr.msk.f32.mxu0 %vm6830_vm0, %v6831_v1 }
 0x74d   :  { %6123 = vmatprep.subr.mxu0 %v6831_v1 }
 0x74f   :  { %6116 = vmatmul.mubr.msk.f32.vlgmr.msra.gmra.mrb[24].mxu0 %vm253_vm2, %v2186_v40  ;;  %v2354_v42 = vpop.permute.xlu0 %2353 }
 0x750   :  { %6124 = vmatpush3.xpose.msk.msra.mxu0 %vm253_vm2, %v2354_v42  ;;  %6125 = vmatprep.mubr.msk.f32.mxu0 %vm6830_vm0, %v6831_v1 }
 0x751   :  { %6133 = vmatprep.subr.mxu0 %v6831_v1 }
 0x753   :  { %6126 = vmatmul.mubr.msk.f32.vlgmr.msra.gmra.mrb[26].mxu0 %vm253_vm2, %v2352_v43  ;;  %v2700_v11 = vpop.permute.xlu0 %2699 }
 0x754   :  { %6134 = vmatpush3.xpose.msk.msra.mxu0 %vm253_vm2, %v2532_v16  ;;  %6135 = vmatprep.mubr.msk.f32.mxu0 %vm6830_vm0, %v6831_v1 }
 0x755   :  { %6143 = vmatprep.subr.mxu0 %v6831_v1 }
 0x757   :  { %6136 = vmatmul.mubr.msk.f32.vlgmr.msra.gmra.mrb[28].mxu0 %vm253_vm2, %v1763_v27  ;;  %v2866_v45 = vpop.permute.xlu0 %2865 }
 0x758   :  { %6144 = vmatpush3.xpose.msk.msra.mxu0 %vm253_vm2, %v2700_v11  ;;  %6145 = vmatprep.mubr.msk.f32.mxu0 %vm6830_vm0, %v6831_v1 }
 0x759   :  { %6153 = vmatprep.subr.mxu0 %v6831_v1 }
 0x75b   :  { %6146 = vmatmul.mubr.msk.f32.vlgmr.msra.gmra.mrb[30].mxu0 %vm253_vm2, %v2698_v44  ;;  %v3032_v47 = vpop.permute.xlu0 %3031 }
 0x75c   :  { %6154 = vmatpush3.xpose.msk.msra.mxu0 %vm253_vm2, %v2866_v45  ;;  %6155 = vmatprep.mubr.msk.f32.mxu0 %vm6830_vm0, %v6831_v1 }
 0x75d   :  { %6163 = vmatprep.subr.mxu0 %v6831_v1 }
 0x75f   :  { %6156 = vmatmul.mubr.msk.f32.vlgmr.msra.gmra.mrb[32].mxu0 %vm253_vm2, %v2864_v46 }
 0x760   :  { %6164 = vmatpush3.xpose.msk.msra.mxu0 %vm253_vm2, %v3032_v47  ;;  %6165 = vmatprep.mubr.msk.f32.mxu0 %vm6830_vm0, %v6831_v1 }
 0x763   :  { %6166 = vmatmul.mubr.msk.f32.vlgmr.msra.gmra.mrb[34].mxu0 %vm253_vm2, %v3030_v48 }
 0x7ab   :  { %v1925_v49 = vpop.f32.mrb[20].mxu1 }
 0x7ac   :  { %v1930_v50 = vsel %vm1929_vm7, %v1925_v49, -inf  ;;  %v6097_v51 = vpop.f32.mrb[21].mxu1 }
 0x7ad   :  { %1931 = vmax.xlane.f32.xlu0 %v1930_v50 }
 0x81e   :  { %v2093_v52 = vpop.f32.mrb[22].mxu0 }
 0x81f   :  { %v2097_v22 = vsel %vm1929_vm7, %v2093_v52, -inf  ;;  %v6107_v53 = vpop.f32.mrb[23].mxu0 }
 0x820   :  { %2098 = vmax.xlane.f32.xlu1 %v2097_v22 }
 0x822   :  { %v2259_v54 = vpop.f32.mrb[24].mxu0 }
 0x823   :  { %v6117_v55 = vpop.f32.mrb[25].mxu0  ;;  %v2263_v56 = vsel %vm1929_vm7, %v2259_v54, -inf }
 0x824   :  { %2264 = vmax.xlane.f32.xlu0 %v2263_v56 }
 0x826   :  { %v2425_v57 = vpop.f32.mrb[26].mxu0 }
 0x827   :  { %v6127_v58 = vpop.f32.mrb[27].mxu0  ;;  %v2429_v59 = vsel %vm1929_vm7, %v2425_v57, -inf }
 0x828   :  { %2430 = vmax.xlane.f32.xlu0 %v2429_v59 }
 0x82a   :  { %v2604_v60 = vpop.f32.mrb[28].mxu0 }
 0x82b   :  { %v6137_v61 = vpop.f32.mrb[29].mxu0  ;;  %v2608_v62 = vsel %vm1929_vm7, %v2604_v60, -inf }
 0x82c   :  { %2609 = vmax.xlane.f32.xlu1 %v2608_v62 }
 0x82e   :  { %v2771_v2 = vpop.f32.mrb[30].mxu0 }
 0x82f   :  { %v6147_v3 = vpop.f32.mrb[31].mxu0  ;;  %v2775_v4 = vsel %vm1929_vm7, %v2771_v2, -inf }
 0x830   :  { %2776 = vmax.xlane.f32.xlu0 %v2775_v4 }
 0x832   :  { %v2937_v15 = vpop.f32.mrb[32].mxu0 }
 0x833   :  { %v6157_v5 = vpop.f32.mrb[33].mxu0  ;;  %v2941_v6 = vsel %vm1929_vm7, %v2937_v15, -inf }
 0x834   :  { %2942 = vmax.xlane.f32.xlu1 %v2941_v6 }
 0x836   :  { %v3103_v7 = vpop.f32.mrb[34].mxu0 }
 0x837   :  { %v6167_v8 = vpop.f32.mrb[35].mxu0  ;;  %v3107_v9 = vsel %vm1929_vm7, %v3103_v7, -inf }
 0x838   :  { %3108 = vmax.xlane.f32.xlu0 %v3107_v9 }
 0x83a   :  { %v1932_v26 = vpop.xlane.xlu0 %1931 }
 0x83b   :  { %v1933_v27 = vsub.f32 %v1925_v49, %v1932_v26 }
 0x83d   :  { %v1934_v32 = vmul.f32 1.442695, %v1933_v27 }
 0x83f   :  { %6684 = vpow2.f32 %v1934_v32 }
 0x845   :  { %1849 = vrot.lane.b32.xlu1 %v1847_v12, %s6835_s11 }
 0x849   :  { %v6685_v42 = vpop.eup %6684 }
 0x84a   :  { %v1936_v46 = vsel %vm1929_vm7, %v6685_v42, 0.0 }
 0x8ad   :  { %v2099_v13 = vpop.xlane.xlu1 %2098 }
 0x8ae   :  { %v2100_v33 = vsub.f32 %v2093_v52, %v2099_v13 }
 0x8b0   :  { %v2101_v34 = vmul.f32 1.442695, %v2100_v33 }
 0x8b1   :  { %v2265_v31 = vpop.xlane.xlu0 %2264 }
 0x8b2   :  { %v2266_v36 = vsub.f32 %v2259_v54, %v2265_v31  ;;  %6686 = vpow2.f32 %v2101_v34 }
 0x8b4   :  { %v2267_v37 = vmul.f32 1.442695, %v2266_v36 }
 0x8b6   :  { %6688 = vpow2.f32 %v2267_v37 }
 0x8b9   :  { %v2610_v14 = vpop.xlane.xlu1 %2609 }
 0x8ba   :  { %v2611_v41 = vsub.f32 %v2604_v60, %v2610_v14 }
 0x8bc   :  { %v2612_v44 = vmul.f32 1.442695, %v2611_v41  ;;  %v6687_v47 = vpop.eup %6686 }
 0x8bd   :  { %v2103_v50 = vsel %vm1929_vm7, %v6687_v47, 0.0 }
 0x8c0   :  { %v6689_v51 = vpop.eup %6688 }
 0x8c1   :  { %v2943_v23 = vpop.xlane.xlu1 %2942  ;;  %v2269_v22 = vsel %vm1929_vm7, %v6689_v51, 0.0 }
 0x8c2   :  { %v2944_v11 = vsub.f32 %v2937_v15, %v2943_v23 }
 0x8c4   :  { %v2945_v48 = vmul.f32 1.442695, %v2944_v11 }
 0x8c5   :  { %v1850_v24 = vpop.permute.xlu1 %1849 }
 0x8c6   :  { %v1852_v25 = vadd.f32 %v1850_v24, %v7145_v35  ;;  %v2431_v35 = vpop.xlane.xlu0 %2430 }
 0x8c7   :  { %v2432_v16 = vsub.f32 %v2425_v57, %v2431_v35 }
 0x8c8   :  { %2108 = vrot.lane.b32.xlu1 %v1852_v25, %s6836_s13  ;;  %1942 = vrot.lane.b32.xlu0 %v1852_v25, %s6837_s14  ;;  %v2619_v30 = vrot.slane %v1852_v25, 4 }
 0x8c9   :  { %v2433_v39 = vmul.f32 1.442695, %v2432_v16 }
 0x8ca   :  { %v2777_v38 = vpop.xlane.xlu0 %2776 }
 0x8cb   :  { %v2778_v40 = vsub.f32 %v2771_v2, %v2777_v38  ;;  %6690 = vpow2.f32 %v2433_v39 }
 0x8cc   :  { %2274 = vrot.lane.b32.xlu1 %v1852_v25, %s6838_s15 }
 0x8cd   :  { %v2779_v43 = vmul.f32 1.442695, %v2778_v40 }
 0x8ce   :  { %v3109_v45 = vpop.xlane.xlu0 %3108 }
 0x8cf   :  { %6692 = vpow2.f32 %v2779_v43  ;;  %v3110_v49 = vsub.f32 %v3103_v7, %v3109_v45 }
 0x8d0   :  { %2440 = vrot.lane.b32.xlu1 %v1852_v25, %s6839_s16  ;;  %6694 = vpow2.f32 %v2612_v44 }
 0x8d1   :  { %6696 = vpow2.f32 %v2945_v48  ;;  %v3111_v52 = vmul.f32 1.442695, %v3110_v49  ;;  %v1678_v48 = vld [vmem:[#allocation2 + $0x60] sm:$0xff]  ;;  %v1679_v49 = vld [vmem:[#allocation2 + $0x68] sm:$0xff] }
 0x8d3   :  { %6698 = vpow2.f32 %v3111_v52 }
 0x8d4   :  { %2620 = vrot.lane.b32.xlu1 %v2619_v30, %s6837_s14 }
 0x8d5   :  { %v6691_v53 = vpop.eup %6690 }
 0x8d6   :  { %v2435_v54 = vsel %vm1929_vm7, %v6691_v53, 0.0 }
 0x8d9   :  { %v7215_v55 = vpop.eup %6692 }
 0x8da   :  { %v6695_v56 = vpop.eup %6694  ;;  %v2781_v57 = vsel %vm1929_vm7, %v7215_v55, 0.0 }
 0x8db   :  { %v7219_v58 = vpop.eup %6696  ;;  %v2614_v59 = vsel %vm1929_vm7, %v6695_v56, 0.0 }
 0x8dc   :  { %v2947_v60 = vsel %vm1929_vm7, %v7219_v58, 0.0 }
 0x8dd   :  { %v7224_v61 = vpop.eup %6698 }
 0x8de   :  { %v3113_v62 = vsel %vm1929_vm7, %v7224_v61, 0.0 }
 0x8e7   :  { %1937 = vadd.xlane.f32.xlu0 %v1936_v46 }
 0x8eb   :  { %2104 = vadd.xlane.f32.xlu0 %v2103_v50 }
 0x8ef   :  { %2270 = vadd.xlane.f32.xlu0 %v2269_v22  ;;  %v1680_v22 = vld [vmem:[#allocation2 + $0x70] sm:$0xff] }
 0x8f3   :  { %2436 = vadd.xlane.f32.xlu0 %v2435_v54 }
 0x8f7   :  { %2782 = vadd.xlane.f32.xlu0 %v2781_v57 }
 0x8f8   :  { %2615 = vadd.xlane.f32.xlu1 %v2614_v59 }
 0x8fb   :  { %2948 = vadd.xlane.f32.xlu0 %v2947_v60 }
 0x8ff   :  { %3114 = vadd.xlane.f32.xlu0 %v3113_v62 }
 0x909   :  { %2952 = vrot.lane.b32.xlu1 %v2619_v30, %s6838_s15 }
 0x90d   :  { %3118 = vrot.lane.b32.xlu1 %v2619_v30, %s6839_s16 }
 0x915   :  { %2786 = vrot.lane.b32.xlu0 %v2619_v30, %s6836_s13 }
 0x93a   :  { %v1943_v2 = vpop.permute.xlu0 %1942  ;;  %v2109_v3 = vpop.permute.xlu1 %2108 }
 0x93b   :  { %6099 = vmatpush3.msk.msra.mxu1 %vm1593_vm6, %v1943_v2 }
 0x93c   :  { %6108 = vmatprep.subr.mxu1 %v6831_v1 }
 0x93e   :  { %v2275_v15 = vpop.permute.xlu1 %2274 }
 0x942   :  { %v2441_v6 = vpop.permute.xlu1 %2440 }
 0x946   :  { %v2621_v13 = vpop.permute.xlu1 %2620 }
 0x974   :  { %v1938_v4 = vpop.xlane.xlu0 %1937 }
 0x975   :  { %6700 = vrcp.f32 %v1938_v4 }
 0x978   :  { %v2105_v5 = vpop.xlane.xlu0 %2104 }
 0x979   :  { %6702 = vrcp.f32 %v2105_v5 }
 0x97c   :  { %v2271_v7 = vpop.xlane.xlu0 %2270 }
 0x97d   :  { %6704 = vrcp.f32 %v2271_v7 }
 0x97f   :  { %v6701_v8 = vpop.eup %6700 }
 0x980   :  { %v1940_v9 = vmul.f32 %v6701_v8, %v6685_v42  ;;  %v2437_v12 = vpop.xlane.xlu0 %2436 }
 0x981   :  { %6706 = vrcp.f32 %v2437_v12 }
 0x982   :  { %6101 = vmatmul.mubr.msk.f32.vlgmr.msra.gmra.mrb[22].mxu1 %vm1929_vm7, %v1940_v9 }
 0x983   :  { %v6703_v14 = vpop.eup %6702  ;;  %6109 = vmatpush3.msk.msra.mxu1 %vm1593_vm6, %v2109_v3  ;;  %6110 = vmatprep.mubr.msk.f32.mxu1 %vm6830_vm0, %v6831_v1 }
 0x984   :  { %v2107_v23 = vmul.f32 %v6703_v14, %v6687_v47  ;;  %v2783_v24 = vpop.xlane.xlu0 %2782  ;;  %6118 = vmatprep.subr.mxu1 %v6831_v1 }
 0x985   :  { %v2616_v25 = vpop.xlane.xlu1 %2615 }
 0x986   :  { %6708 = vrcp.f32 %v2616_v25  ;;  %6111 = vmatmul.mubr.msk.f32.vlgmr.msra.gmra.mrb[24].mxu1 %vm1929_vm7, %v2107_v23 }
 0x987   :  { %v6705_v26 = vpop.eup %6704  ;;  %6119 = vmatpush3.msk.msra.mxu1 %vm1593_vm6, %v2275_v15  ;;  %6120 = vmatprep.mubr.msk.f32.mxu1 %vm6830_vm0, %v6831_v1  ;;  %6710 = vrcp.f32 %v2783_v24  ;;  %v3212_v24 = vsub.s32 3, %v6939_v18  ;;  %v62_v18 = vld [vmem:[%s7636_s1 + $0x8] sm:$0xff] }
 0x988   :  { %v2273_v27 = vmul.f32 %v6705_v26, %v6689_v51  ;;  %v2949_v30 = vpop.xlane.xlu0 %2948  ;;  %6128 = vmatprep.subr.mxu1 %v6831_v1  ;;  %v6429_v51 = vpack.c.bf16 %v1679_v49, %v1678_v48  ;;  %v3339_v49 = vld [vmem:[#allocation4 + $0x70] sm:$0xff] }
 0x989   :  { %6712 = vrcp.f32 %v2949_v30  ;;  %v2953_v38 = vpop.permute.xlu1 %2952  ;;  %v3213_v25 = vrot.slane %v7122_v21, %v3212_v24 }
 0x98a   :  { %6121 = vmatmul.mubr.msk.f32.vlgmr.msra.gmra.mrb[26].mxu1 %vm1929_vm7, %v2273_v27  ;;  %6430 = vmatprep.subr.bf16.mxu0 %v6429_v51 }
 0x98b   :  { %v6707_v31 = vpop.eup %6706  ;;  %6129 = vmatpush3.msk.msra.mxu1 %vm1593_vm6, %v2441_v6  ;;  %6130 = vmatprep.mubr.msk.f32.mxu1 %vm6830_vm0, %v6831_v1 }
 0x98c   :  { %v2439_v32 = vmul.f32 %v6707_v31, %v6691_v53  ;;  %6138 = vmatprep.subr.mxu1 %v6831_v1  ;;  %v3115_v33 = vpop.xlane.xlu0 %3114  ;;  %6432 = vmatpush3.bf16.msra.mxu0 %v6429_v51  ;;  %v1681_v53 = vld [vmem:[#allocation2 + $0x78] sm:$0xff] }
 0x98d   :  { %6714 = vrcp.f32 %v3115_v33  ;;  %v3119_v42 = vpop.permute.xlu1 %3118 }
 0x98e   :  { %6131 = vmatmul.mubr.msk.f32.vlgmr.msra.gmra.mrb[28].mxu1 %vm1929_vm7, %v2439_v32  ;;  %v6772_v32 = vld [vmem:[%s7635_s0 + $0x8] sm:$0xff] }
 0x98f   :  { %6139 = vmatpush3.msk.msra.mxu1 %vm1593_vm6, %v2621_v13  ;;  %6140 = vmatprep.mubr.msk.f32.mxu1 %vm6830_vm0, %v6831_v1 }
 0x990   :  { %v6709_v34 = vpop.eup %6708  ;;  %6148 = vmatprep.subr.mxu1 %v6831_v1  ;;  %v2787_v37 = vpop.permute.xlu0 %2786 }
 0x991   :  { %v2618_v36 = vmul.f32 %v6709_v34, %v6695_v56  ;;  %v6711_v35 = vpop.eup %6710  ;;  %v6773_v34 = vld [vmem:[%s7635_s0] sm:$0xff] }
 0x992   :  { %v2785_v16 = vmul.f32 %v6711_v35, %v7215_v55  ;;  %v6433_v55 = vpack.c.bf16 %v1681_v53, %v1680_v22 }
 0x993   :  { %6141 = vmatmul.mubr.msk.f32.vlgmr.msra.gmra.mrb[30].mxu1 %vm1929_vm7, %v2618_v36  ;;  %v6713_v39 = vpop.eup %6712 }
 0x994   :  { %6149 = vmatpush3.msk.msra.mxu1 %vm1593_vm6, %v2787_v37  ;;  %6150 = vmatprep.mubr.msk.f32.mxu1 %vm6830_vm0, %v6831_v1  ;;  %v2951_v40 = vmul.f32 %v6713_v39, %v7219_v58 }
 0x995   :  { %6158 = vmatprep.subr.mxu1 %v6831_v1  ;;  %6434 = vmatprep.subr.bf16.mxu0 %v6433_v55 }
 0x996   :  { %6436 = vmatpush3.bf16.msra.mxu0 %v6433_v55 }
 0x997   :  { %6151 = vmatmul.mubr.msk.f32.vlgmr.msra.gmra.mrb[32].mxu1 %vm1929_vm7, %v2785_v16  ;;  %v6715_v41 = vpop.eup %6714 }
 0x998   :  { %6159 = vmatpush3.msk.msra.mxu1 %vm1593_vm6, %v2953_v38  ;;  %6160 = vmatprep.mubr.msk.f32.mxu1 %vm6830_vm0, %v6831_v1  ;;  %v3117_v43 = vmul.f32 %v6715_v41, %v7224_v61 }
 0x999   :  { %6168 = vmatprep.subr.mxu1 %v6831_v1 }
 0x99b   :  { %6161 = vmatmul.mubr.msk.f32.vlgmr.msra.gmra.mrb[34].mxu1 %vm1929_vm7, %v2951_v40 }
 0x99c   :  { %6169 = vmatpush3.msk.msra.mxu1 %vm1593_vm6, %v3119_v42  ;;  %6170 = vmatprep.mubr.msk.f32.mxu1 %vm6830_vm0, %v6831_v1 }
 0x99f   :  { %6171 = vmatmul.mubr.msk.f32.vlgmr.msra.gmra.mrb[36].mxu1 %vm1929_vm7, %v3117_v43 }
 0xa55   :  { %v2015_v11 = vpop.f32.mrb[22].mxu1 }
 0xa56   :  { %v6102_v44 = vpop.f32.mrb[23].mxu1 }
 0xa59   :  { %v2181_v45 = vpop.f32.mrb[24].mxu1 }
 0xa5a   :  { %2518 = vrot.lane.b32.xlu1 %v2181_v45, %s6827_s12  ;;  %v6112_v46 = vpop.f32.mrb[25].mxu1 }
 0xa5b   :  { %v3337_v46 = vld [vmem:[#allocation4 + $0x60] sm:$0xff] }
 0xa5d   :  { %v2347_v47 = vpop.f32.mrb[26].mxu1 }
 0xa5e   :  { %2522 = vrot.lane.b32.xlu1 %v2347_v47, %s6840_s17  ;;  %v6122_v50 = vpop.f32.mrb[27].mxu1  ;;  %v3338_v47 = vld [vmem:[#allocation4 + $0x68] sm:$0xff] }
 0xa5f   :  { %v6437_v48 = vpack.c.bf16 %v3338_v47, %v3337_v46  ;;  %v3340_v50 = vld [vmem:[#allocation4 + $0x78] sm:$0xff] }
 0xa60   :  { %v6441_v51 = vpack.c.bf16 %v3340_v50, %v3339_v49 }
 0xa61   :  { %v2513_v52 = vpop.f32.mrb[28].mxu1  ;;  %6438 = vmatprep.subr.bf16.mxu1 %v6437_v48 }
 0xa62   :  { %2526 = vrot.lane.b32.xlu0 %v2513_v52, %s6841_s18  ;;  %v6132_v54 = vpop.f32.mrb[29].mxu1  ;;  %6440 = vmatpush3.bf16.msra.mxu1 %v6437_v48 }
 0xa63   :  { %6442 = vmatprep.subr.bf16.mxu1 %v6441_v51 }
 0xa66   :  { %v2693_v56 = vpop.f32.mrb[30].mxu1  ;;  %6444 = vmatpush3.bf16.msra.mxu1 %v6441_v51 }
 0xa67   :  { %v6142_v57 = vpop.f32.mrb[31].mxu1 }
 0xa68   :  { %v7302_v57 = vld [vmem:[%s7640_s5 + $0x10] sm:$0xff] }
 0xa6a   :  { %v2859_v58 = vpop.f32.mrb[32].mxu1 }
 0xa6b   :  { %3196 = vrot.lane.b32.xlu1 %v2859_v58, %s6827_s12  ;;  %v6152_v59 = vpop.f32.mrb[33].mxu1  ;;  %v3327_v58 = vrot.slane %v7302_v57, %v7117_v17 }
 0xa6e   :  { %v3025_v60 = vpop.f32.mrb[34].mxu1 }
 0xa6f   :  { %3200 = vrot.lane.b32.xlu1 %v3025_v60, %s6840_s17  ;;  %v6162_v61 = vpop.f32.mrb[35].mxu1 }
 0xa72   :  { %v3191_v62 = vpop.f32.mrb[36].mxu1 }
 0xa73   :  { %3204 = vrot.lane.b32.xlu0 %v3191_v62, %s6841_s18  ;;  %v6172_v2 = vpop.f32.mrb[37].mxu1 }
 0xa74   :  { %v3333_v2 = vrot.slane %v7302_v57, %v7141_v29 }
 0xacc   :  { %v2519_v3 = vpop.permute.xlu1 %2518 }
 0xacd   :  { %v2529_v15 = vsel %vm253_vm2, %v2015_v11, %v2519_v3 }
 0xad0   :  { %v2523_v4 = vpop.permute.xlu1 %2522 }
 0xad1   :  { %v2530_v5 = vsel %vm927_vm4, %v2529_v15, %v2523_v4 }
 0xad4   :  { %v2527_v6 = vpop.permute.xlu0 %2526 }
 0xad5   :  { %v2531_v7 = vsel %vm929_vm5, %v2530_v5, %v2527_v6  ;;  %v3436_v6 = vld [vmem:[%s7639_s4] sm:$0xff] }
 0xad6   :  { %6181 = vmatprep.mubr.msk.f32.mxu0 %vm82_vm1, %v2531_v7  ;;  %v3437_v7 = vld [vmem:[%s7639_s4 + $0x8] sm:$0xff] }
 0xadd   :  { %v3197_v8 = vpop.permute.xlu1 %3196 }
 0xade   :  { %v3207_v12 = vsel %vm253_vm2, %v2693_v56, %v3197_v8  ;;  %v6445_v8 = vpack.c.bf16 %v3437_v7, %v3436_v6  ;;  %v3574_v6 = vld [vmem:[#allocation2 + $0x98] sm:$0xff] }
 0xae0   :  { %6446 = vmatprep.subr.bf16.mxu0 %v6445_v8 }
 0xae1   :  { %v3201_v9 = vpop.permute.xlu1 %3200 }
 0xae2   :  { %v3208_v13 = vsel %vm927_vm4, %v3207_v12, %v3201_v9  ;;  %v3438_v9 = vld [vmem:[%s7639_s4 + $0x10] sm:$0xff]  ;;  %v3439_v12 = vld [vmem:[%s7639_s4 + $0x18] sm:$0xff] }
 0xae5   :  { %v3205_v14 = vpop.permute.xlu0 %3204 }
 0xae6   :  { %v3209_v23 = vsel %vm929_vm5, %v3208_v13, %v3205_v14  ;;  %v6449_v13 = vpack.c.bf16 %v3439_v12, %v3438_v9  ;;  %v3440_v14 = vld [vmem:[%s7639_s4 + $0x20] sm:$0xff]  ;;  %v3582_v9 = vld [vmem:[#allocation4 + $0x48] sm:$0xff] }
 0xae7   :  { %6182 = vmatmul.mubr.msk.f32.vlgmr.msra.gmra.mrb[36].mxu0 %vm82_vm1, %v3209_v23  ;;  %v3441_v23 = vld [vmem:[%s7639_s4 + $0x28] sm:$0xff] }
 0xae8   :  { %6448 = vmatpush3.bf16.msra.mxu0 %v6445_v8  ;;  %v3581_v8 = vld [vmem:[#allocation4 + $0x40] sm:$0xff] }
 0xae9   :  { %6450 = vmatprep.subr.bf16.mxu0 %v6449_v13  ;;  %v6469_v12 = vpack.c.bf16 %v3582_v9, %v3581_v8 }
 0xaec   :  { %6452 = vmatpush3.bf16.msra.mxu0 %v6449_v13 }
 0xbba   :  { %v6183_v26 = vpop.f32.mrb[36].mxu0 }
 0xbbb   :  { %v3292_v27 = vadd.f32 %v6183_v26, %v3213_v25  ;;  %v3286_v30 = vpop.f32.mrb[37].mxu0  ;;  %v3442_v26 = vld [vmem:[%s7639_s4 + $0x30] sm:$0xff] }
 0xbbc   :  { %v3287_v31 = vadd.f32 %v3286_v30, %v3213_v25  ;;  %v6453_v25 = vpack.c.bf16 %v3441_v23, %v3440_v14 }
 0xbbd   :  { %v3296_v33 = vadd.f32 %v6772_v32, %v3292_v27  ;;  %v3443_v27 = vld [vmem:[%s7639_s4 + $0x38] sm:$0xff] }
 0xbbe   :  { %v3295_v36 = vadd.f32 %v6773_v34, %v3287_v31  ;;  %6454 = vmatprep.subr.bf16.mxu0 %v6453_v25  ;;  %v6457_v30 = vpack.c.bf16 %v3443_v27, %v3442_v26  ;;  %v58_v31 = vld [vmem:[%s7641_s6] sm:$0x3] }
 0xbbf   :  { %v3300_v35 = vsel %vm82_vm1, %v3296_v33, 0.0  ;;  %6456 = vmatpush3.bf16.msra.mxu0 %v6453_v25  ;;  %v3344_v32 = vrot.slane %v58_v31, %v7117_v17 }
 0xbc0   :  { %3301 = vadd.xlane.f32.xlu0 %v3300_v35  ;;  %v3297_v37 = vsel %vm82_vm1, %v3295_v36, 0.0  ;;  %6458 = vmatprep.subr.bf16.mxu0 %v6457_v30 }
 0xbc1   :  { %3298 = vadd.xlane.f32.xlu1 %v3297_v37 }
 0xbc3   :  { %6460 = vmatpush3.bf16.msra.mxu0 %v6457_v30  ;;  %v3561_v30 = vrot.slane %v7302_v57, %v7200_v10 }
 0xbc4   :  { %6477 = vmatprep.subr.bf16.mxu0 %v6829_v0 }
 0xc4d   :  { %v3302_v16 = vpop.xlane.xlu0 %3301 }
 0xc4e   :  { %v3305_v38 = vmul.f32 0.03125, %v3302_v16  ;;  %v3299_v39 = vpop.xlane.xlu1 %3298 }
 0xc4f   :  { %v3304_v40 = vmul.f32 0.03125, %v3299_v39 }
 0xc50   :  { %v3307_v41 = vsub.f32 %v3296_v33, %v3305_v38 }
 0xc51   :  { %v3306_v42 = vsub.f32 %v3295_v36, %v3304_v40 }
 0xc52   :  { %v3309_v43 = vmul.f32 %v3307_v41, %v3307_v41 }
 0xc53   :  { %v3308_v11 = vmul.f32 %v3306_v42, %v3306_v42 }
 0xc54   :  { %v3313_v44 = vsel %vm82_vm1, %v3309_v43, 0.0 }
 0xc55   :  { %3314 = vadd.xlane.f32.xlu1 %v3313_v44  ;;  %v3310_v45 = vsel %vm82_vm1, %v3308_v11, 0.0 }
 0xc56   :  { %3311 = vadd.xlane.f32.xlu0 %v3310_v45  ;;  %v3447_v45 = vrot.slane %v7302_v57, %v6945_v20 }
 0xce2   :  { %v3315_v52 = vpop.xlane.xlu1 %3314 }
 0xce3   :  { %v3317_v22 = vmul.f32 0.03125, %v3315_v52  ;;  %v3312_v53 = vpop.xlane.xlu0 %3311 }
 0xce4   :  { %v3316_v54 = vmul.f32 0.03125, %v3312_v53 }
 0xce5   :  { %v3319_v55 = vadd.f32 1e-05, %v3317_v22 }
 0xce6   :  { %v3318_v56 = vadd.f32 1e-05, %v3316_v54 }
 0xce7   :  { %6716 = vrsqrt.f32 %v3319_v55 }
 0xce8   :  { %6718 = vrsqrt.f32 %v3318_v56 }
 0xcf1   :  { %v6717_v59 = vpop.eup %6716 }
 0xcf2   :  { %v6719_v60 = vpop.eup %6718  ;;  %v3323_v61 = vmul.f32 %v6717_v59, %v3307_v41 }
 0xcf3   :  { %v3322_v62 = vmul.f32 %v6719_v60, %v3306_v42 }
 0xcf4   :  { %v3329_v3 = vmul.f32 %v3327_v58, %v3323_v61 }
 0xcf5   :  { %v3328_v4 = vmul.f32 %v3327_v58, %v3322_v62 }
 0xcf6   :  { %v3335_v5 = vadd.f32 %v3333_v2, %v3329_v3  ;;  %v3571_v3 = vld [vmem:[#allocation2 + $0x80] sm:$0xff] }
 0xcf7   :  { %v3334_v15 = vadd.f32 %v3333_v2, %v3328_v4  ;;  %v3572_v4 = vld [vmem:[#allocation2 + $0x88] sm:$0xff] }
 0xcf9   :  { %6192 = vmatprep.mubr.msk.f32.mxu1 %vm82_vm1, %v3334_v15 }
 0xcfa   :  { %6193 = vmatmul.mubr.msk.f32.vlgmr.msra.gmra.mrb[38].mxu1 %vm82_vm1, %v3335_v5 }
 0xdcd   :  { %v6194_v33 = vpop.f32.mrb[38].mxu1 }
 0xdce   :  { %v3423_v34 = vadd.f32 %v6194_v33, %v3344_v32  ;;  %v3417_v36 = vpop.f32.mrb[39].mxu1 }
 0xdcf   :  { %v3418_v35 = vadd.f32 %v3417_v36, %v3344_v32 }
 0xdd0   :  { %v3429_v37 = vmul.f32 0.70710677, %v3423_v34  ;;  %v3427_v43 = vmul.f32 0.5, %v3423_v34  ;;  %v3567_v34 = vrot.slane %v7302_v57, %v3212_v24  ;;  %v3588_v24 = vrot.slane %v7122_v21, %v6945_v20 }
 0xdd1   :  { %v3428_v16 = vmul.f32 0.70710677, %v3418_v35  ;;  %v3426_v41 = vmul.f32 0.5, %v3418_v35 }
 0xdd2   :  { %6720 = verf.f32 %v3429_v37 }
 0xdd3   :  { %6722 = verf.f32 %v3428_v16  ;;  %v3583_v16 = vld [vmem:[#allocation4 + $0x50] sm:$0xff] }
 0xddc   :  { %v6721_v38 = vpop.eup %6720 }
 0xddd   :  { %v6723_v39 = vpop.eup %6722  ;;  %v3433_v40 = vadd.f32 1.0, %v6721_v38  ;;  %v3584_v38 = vld [vmem:[#allocation4 + $0x58] sm:$0xff] }
 0xdde   :  { %v3432_v42 = vadd.f32 1.0, %v6723_v39 }
 0xddf   :  { %v3435_v44 = vmul.f32 %v3433_v40, %v3427_v43 }
 0xde0   :  { %v3434_v11 = vmul.f32 %v3432_v42, %v3426_v41  ;;  %v6473_v41 = vpack.c.bf16 %v3584_v38, %v3583_v16  ;;  %v61_v42 = vld [vmem:[%s7636_s1] sm:$0xff] }
 0xde2   :  { %6211 = vmatprep.mubr.msk.f32.mxu0 %vm3448_vm8, %v3434_v11 }
 0xde3   :  { %6212 = vmatmul.mubr.msk.f32.vlgmr.msra.gmra.mrb[38].mxu0 %vm3448_vm8, %v3435_v44 }
 0xde4   :  { %6243 = vmatprep.mubr.msk.f32.mxu0 %vm6830_vm0, %v6831_v1 }
 0xeb6   :  { %v6213_v46 = vpop.f32.mrb[38].mxu0 }
 0xeb7   :  { %v3527_v47 = vadd.f32 %v6213_v46, %v3447_v45  ;;  %v3521_v48 = vpop.f32.mrb[39].mxu0 }
 0xeb8   :  { %v3522_v49 = vadd.f32 %v3521_v48, %v3447_v45  ;;  %v7381_v45 = vrot.slane %v7122_v21, %v6942_v19 }
 0xeb9   :  { %v3531_v50 = vadd.f32 %v3527_v47, %v3335_v5  ;;  %v3573_v5 = vld [vmem:[#allocation2 + $0x90] sm:$0xff] }
 0xeba   :  { %v3530_v51 = vadd.f32 %v3522_v49, %v3334_v15  ;;  %v6461_v15 = vpack.c.bf16 %v3572_v4, %v3571_v3  ;;  %v6465_v7 = vpack.c.bf16 %v3574_v6, %v3573_v5  ;;  %v3778_v5 = vrot.slane %v7122_v21, %v7015_v63 }
 0xebb   :  { %v3535_v52 = vsel %vm82_vm1, %v3531_v50, 0.0 }
 0xebc   :  { %3536 = vadd.xlane.f32.xlu1 %v3535_v52  ;;  %v3532_v22 = vsel %vm82_vm1, %v3530_v51, 0.0  ;;  %6462 = vmatprep.subr.bf16.mxu1 %v6461_v15  ;;  %v63_v52 = vld [vmem:[%s7636_s1 + $0x10] sm:$0xff] }
 0xebd   :  { %3533 = vadd.xlane.f32.xlu0 %v3532_v22  ;;  %6464 = vmatpush3.bf16.msra.mxu1 %v6461_v15  ;;  %v64_v22 = vld [vmem:[%s7636_s1 + $0x18] sm:$0xff] }
 0xebe   :  { %6466 = vmatprep.subr.bf16.mxu1 %v6465_v7 }
 0xec1   :  { %6468 = vmatpush3.bf16.msra.mxu1 %v6465_v7 }
 0xec2   :  { %6470 = vmatprep.subr.bf16.mxu1 %v6469_v12 }
 0xf49   :  { %v3537_v53 = vpop.xlane.xlu1 %3536 }
 0xf4a   :  { %v3539_v54 = vmul.f32 0.03125, %v3537_v53  ;;  %v3534_v55 = vpop.xlane.xlu0 %3533 }
 0xf4b   :  { %v3538_v56 = vmul.f32 0.03125, %v3534_v55 }
 0xf4c   :  { %v3541_v58 = vsub.f32 %v3531_v50, %v3539_v54 }
 0xf4d   :  { %v3540_v59 = vsub.f32 %v3530_v51, %v3538_v56 }
 0xf4e   :  { %v3543_v60 = vmul.f32 %v3541_v58, %v3541_v58 }
 0xf4f   :  { %v3542_v61 = vmul.f32 %v3540_v59, %v3540_v59 }
 0xf50   :  { %v3547_v62 = vsel %vm82_vm1, %v3543_v60, 0.0 }
 0xf51   :  { %3548 = vadd.xlane.f32.xlu1 %v3547_v62  ;;  %v3544_v2 = vsel %vm82_vm1, %v3542_v61, 0.0 }
 0xf52   :  { %3545 = vadd.xlane.f32.xlu0 %v3544_v2 }
 0xfde   :  { %v3549_v13 = vpop.xlane.xlu1 %3548 }
 0xfdf   :  { %v3551_v14 = vmul.f32 0.03125, %v3549_v13  ;;  %v3546_v23 = vpop.xlane.xlu0 %3545 }
 0xfe0   :  { %v3550_v25 = vmul.f32 0.03125, %v3546_v23 }
 0xfe1   :  { %v3553_v26 = vadd.f32 1e-05, %v3551_v14 }
 0xfe2   :  { %v3552_v27 = vadd.f32 1e-05, %v3550_v25 }
 0xfe3   :  { %6724 = vrsqrt.f32 %v3553_v26 }
 0xfe4   :  { %6726 = vrsqrt.f32 %v3552_v27 }
 0xfed   :  { %v6725_v31 = vpop.eup %6724 }
 0xfee   :  { %v6727_v32 = vpop.eup %6726  ;;  %v3557_v33 = vmul.f32 %v6725_v31, %v3541_v58 }
 0xfef   :  { %v3556_v36 = vmul.f32 %v6727_v32, %v3540_v59 }
 0xff0   :  { %v3563_v35 = vmul.f32 %v3561_v30, %v3557_v33 }
 0xff1   :  { %v3562_v37 = vmul.f32 %v3561_v30, %v3556_v36 }
 0xff2   :  { %v7356_v40 = vadd.f32 %v3567_v34, %v3563_v35 }
 0xff3   :  { %v7354_v39 = vadd.f32 %v3567_v34, %v3562_v37 }
 0xff5   :  { %6222 = vmatprep.mubr.msk.f32.mxu1 %vm82_vm1, %v7354_v39 }
 0xff6   :  { %6223 = vmatmul.mubr.msk.f32.vlgmr.msra.gmra.mrb[40].mxu1 %vm82_vm1, %v7356_v40 }
 0xff7   :  { %6472 = vmatpush3.bf16.msra.mxu1 %v6469_v12  ;;  %6233 = vmatprep.mubr.msk.f32.mxu1 %vm82_vm1, %v61_v42 }
 0xff8   :  { %6474 = vmatprep.subr.bf16.mxu1 %v6473_v41 }
 0xffb   :  { %6476 = vmatpush3.bf16.msra.mxu1 %v6473_v41 }
 0xffc   :  { %6481 = vmatprep.subr.bf16.mxu1 %v6829_v0 }
 0xffe   :  { %6234 = vmatmul.mubr.msk.f32.vlgmr.msra.gmra.mrb[42].mxu1 %vm82_vm1, %v62_v18 }
 0xfff   :  { %6236 = vmatprep.mubr.msk.f32.mxu1 %vm82_vm1, %v63_v52 }
0x1002   :  { %6237 = vmatmul.mubr.msk.f32.gmra.mrb[44].mxu1 %vm82_vm1, %v64_v22 }
0x1003   :  { %6250 = vmatprep.mubr.msk.f32.mxu1 %vm6830_vm0, %v6831_v1 }
0x10c9   :  { %v6224_v57 = vpop.f32.mrb[40].mxu1 }
0x10ca   :  { %v7373_v43 = vadd.f32 %v6224_v57, %v3588_v24  ;;  %v3661_v11 = vpop.f32.mrb[41].mxu1 }
0x10cb   :  { %v7375_v44 = vadd.f32 %v3661_v11, %v3588_v24 }
0x10cd   :  { %3958 = vrot.lane.b32.xlu1 %v7375_v44, %s6833_s9 }
0x10d1   :  { %v6235_v46 = vpop.f32.mrb[42].mxu1 }
0x10d2   :  { %v3772_v47 = vadd.f32 %v6235_v46, %v7381_v45  ;;  %v3748_v48 = vpop.f32.mrb[43].mxu1 }
0x10d3   :  { %v3771_v49 = vadd.f32 %v7381_v45, %v3748_v48 }
0x10d5   :  { %v6478_v50 = vpack.c.bf16 %v3772_v47, %v3771_v49  ;;  %v7391_v51 = vpack.i.bf16 %v3772_v47, %v3771_v49  ;;  %v7420_v4 = vpop.f32.mrb[44].mxu1 }
0x10d6   :  { %v7422_v15 = vpop.f32.mrb[45].mxu1 }
0x10d7   :  { %6583 = vrot.lane.b32.xlu0 %v7391_v51, %s6833_s9  ;;  %6480 = vmatpush3.bf16.xpose.msk.msra.mxu0 %vm7387_vm9, %v6478_v50 }
0x10d8   :  { %6484 = vmatprep.subr.bf16.mxu0 %v6829_v0 }
0x10de   :  { %6244 = vmatmul.mubr.msk.f32.vlgmr.msra.gmra.mrb[40].mxu0 %vm253_vm2, %v7375_v44 }
0x10df   :  { %6257 = vmatprep.mubr.msk.f32.mxu0 %vm6830_vm0, %v6831_v1 }
0x113f   :  { %v3959_v58 = vpop.permute.xlu1 %3958 }
0x1149   :  { %v6584_v53 = vpop.permute.xlu0 %6583 }
0x114a   :  { %v6586_v54 = vunpack.i.h.bf16 %v6584_v53  ;;  %v6585_v55 = vunpack.i.l.bf16 %v6584_v53 }
0x114c   :  { %v6485_v56 = vpack.c.bf16 %v6586_v54, %v6585_v55 }
0x114e   :  { %6487 = vmatpush3.bf16.xpose.msk.msra.mxu0 %vm7387_vm9, %v6485_v56 }
0x114f   :  { %6495 = vmatprep.subr.bf16.mxu0 %v6829_v0 }
0x1155   :  { %6258 = vmatmul.mubr.msk.f32.vlgmr.msra.gmra.mrb[42].mxu0 %vm253_vm2, %v3959_v58 }
0x1156   :  { %6278 = vmatprep.mubr.msk.f32.mxu0 %vm6830_vm0, %v6831_v1 }
0x11b1   :  { %v3862_v59 = vpop.f32.mrb[40].mxu0 }
0x11b2   :  { %v6245_v60 = vpop.f32.mrb[41].mxu0  ;;  %v3866_v61 = vsel %vm927_vm4, %v3862_v59, -inf }
0x11b3   :  { %3867 = vmax.xlane.f32.xlu1 %v3866_v61 }
0x1228   :  { %v4036_v62 = vpop.f32.mrb[42].mxu0 }
0x1229   :  { %v6259_v2 = vpop.f32.mrb[43].mxu0  ;;  %v4040_v3 = vsel %vm927_vm4, %v4036_v62, -inf }
0x122a   :  { %4041 = vmax.xlane.f32.xlu0 %v4040_v3 }
0x1240   :  { %v3868_v6 = vpop.xlane.xlu1 %3867  ;;  %3780 = vrot.lane.b32.xlu0 %v3778_v5, %s6835_s11 }
0x1241   :  { %v3869_v7 = vsub.f32 %v3862_v59, %v3868_v6 }
0x1243   :  { %v3870_v8 = vmul.f32 1.442695, %v3869_v7 }
0x1245   :  { %6728 = vpow2.f32 %v3870_v8 }
0x124f   :  { %v6729_v9 = vpop.eup %6728 }
0x1250   :  { %v3872_v12 = vsel %vm927_vm4, %v6729_v9, 0.0 }
0x1251   :  { %3873 = vadd.xlane.f32.xlu1 %v3872_v12 }
0x12b7   :  { %v4042_v13 = vpop.xlane.xlu0 %4041 }
0x12b8   :  { %v4043_v31 = vsub.f32 %v4036_v62, %v4042_v13 }
0x12ba   :  { %v4044_v32 = vmul.f32 1.442695, %v4043_v31 }
0x12bb   :  { %v3781_v14 = vpop.permute.xlu0 %3780 }
0x12bc   :  { %v3783_v23 = vadd.f32 %v3781_v14, %v3748_v48  ;;  %v3784_v25 = vadd.f32 %v6235_v46, %v3781_v14  ;;  %v3786_v26 = vadd.f32 %v7420_v4, %v3781_v14  ;;  %v3785_v27 = vadd.f32 %v3781_v14, %v7422_v15 }
0x12bd   :  { %6730 = vpow2.f32 %v4044_v32 }
0x12be   :  { %v7430_v30 = vpack.i.bf16 %v3784_v25, %v3783_v23  ;;  %v7432_v21 = vpack.i.bf16 %v3786_v26, %v3785_v27 }
0x12c0   :  { %6593 = vrot.lane.b32.xlu0 %v7430_v30, %s6836_s13  ;;  %6588 = vrot.lane.b32.xlu1 %v7430_v30, %s6837_s14 }
0x12c4   :  { %6598 = vrot.lane.b32.xlu0 %v7391_v51, %s6832_s8 }
0x12c7   :  { %v6731_v33 = vpop.eup %6730 }
0x12c8   :  { %v4046_v34 = vsel %vm927_vm4, %v6731_v33, 0.0 }
0x12de   :  { %v3874_v36 = vpop.xlane.xlu1 %3873 }
0x12df   :  { %6732 = vrcp.f32 %v3874_v36 }
0x12e4   :  { %4047 = vadd.xlane.f32.xlu1 %v4046_v34 }
0x12e9   :  { %v6733_v41 = vpop.eup %6732 }
0x12ea   :  { %v3876_v57 = vmul.f32 %v6733_v41, %v6729_v9 }
0x12f5   :  { %4130 = vrot.lane.b32.xlu1 %v7375_v44, %s6832_s8 }
0x1332   :  { %v6594_v35 = vpop.permute.xlu0 %6593  ;;  %v6589_v37 = vpop.permute.xlu1 %6588 }
0x1333   :  { %v6591_v16 = vunpack.i.h.bf16 %v6589_v37  ;;  %v6590_v38 = vunpack.i.l.bf16 %v6589_v37  ;;  %v6596_v42 = vunpack.i.h.bf16 %v6594_v35  ;;  %v6595_v18 = vunpack.i.l.bf16 %v6594_v35 }
0x1335   :  { %v6482_v24 = vpack.c.bf16 %v6591_v16, %v6590_v38  ;;  %v6489_v11 = vpack.c.bf16 %v6596_v42, %v6595_v18  ;;  %v3774_v42 = vadd.f32 %v7420_v4, %v7381_v45  ;;  %v3773_v18 = vadd.f32 %v7381_v45, %v7422_v15 }
0x1336   :  { %v6599_v47 = vpop.permute.xlu0 %6598 }
0x1337   :  { %6483 = vmatpush3.bf16.msra.mxu1 %v6482_v24  ;;  %v6601_v48 = vunpack.i.h.bf16 %v6599_v47  ;;  %v6600_v49 = vunpack.i.l.bf16 %v6599_v47  ;;  %v7489_v24 = vpack.i.bf16 %v3774_v42, %v3773_v18 }
0x1338   :  { %6488 = vmatprep.subr.bf16.mxu1 %v6829_v0 }
0x1339   :  { %v6492_v22 = vpack.c.bf16 %v6601_v48, %v6600_v49 }
0x133a   :  { %6251 = vmatmul.mubr.msk.f32.vlgmr.msra.gmra.mrb[46].mxu1 %vm927_vm4, %v3876_v57 }
0x133b   :  { %6490 = vmatpush3.bf16.msra.mxu1 %v6489_v11  ;;  %6264 = vmatprep.mubr.msk.f32.mxu1 %vm6830_vm0, %v6831_v1 }
0x133c   :  { %6491 = vmatprep.subr.bf16.mxu1 %v6829_v0 }
0x1371   :  { %v4048_v46 = vpop.xlane.xlu1 %4047 }
0x1372   :  { %6734 = vrcp.f32 %v4048_v46 }
0x1375   :  { %v4131_v53 = vpop.permute.xlu1 %4130 }
0x137c   :  { %v6735_v50 = vpop.eup %6734 }
0x137d   :  { %v4050_v52 = vmul.f32 %v6735_v50, %v6731_v33 }
0x137f   :  { %6265 = vmatmul.mubr.msk.f32.vlgmr.msra.gmra.mrb[48].mxu1 %vm927_vm4, %v4050_v52 }
0x1380   :  { %6494 = vmatpush3.bf16.xpose.msk.msra.mxu1 %vm7387_vm9, %v6492_v22  ;;  %6271 = vmatprep.mubr.msk.f32.mxu1 %vm6830_vm0, %v6831_v1 }
0x1381   :  { %6502 = vmatprep.subr.bf16.mxu1 %v6829_v0 }
0x1387   :  { %6272 = vmatmul.mubr.msk.f32.vlgmr.msra.gmra.mrb[50].mxu1 %vm253_vm2, %v4131_v53 }
0x1388   :  { %6292 = vmatprep.mubr.msk.f32.mxu1 %vm6830_vm0, %v6831_v1 }
0x140d   :  { %v7457_v54 = vpop.f32.mrb[46].mxu1 }
0x140e   :  { %v6252_v55 = vpop.f32.mrb[47].mxu1 }
0x1452   :  { %v7459_v56 = vpop.f32.mrb[48].mxu1 }
0x1453   :  { %v6266_v58 = vpop.f32.mrb[49].mxu1 }
0x145a   :  { %v4208_v59 = vpop.f32.mrb[50].mxu1 }
0x145b   :  { %v6273_v60 = vpop.f32.mrb[51].mxu1  ;;  %v4212_v61 = vsel %vm927_vm4, %v4208_v59, -inf }
0x145c   :  { %4213 = vmax.xlane.f32.xlu0 %v4212_v61 }
0x1472   :  { %6603 = vrot.lane.b32.xlu0 %v7430_v30, %s6838_s15 }
0x1476   :  { %4302 = vrot.lane.b32.xlu0 %v7375_v44, %s6834_s10 }
0x14e9   :  { %v4214_v62 = vpop.xlane.xlu0 %4213 }
0x14ea   :  { %v4215_v2 = vsub.f32 %v4208_v59, %v4214_v62 }
0x14ec   :  { %v4216_v3 = vmul.f32 1.442695, %v4215_v2 }
0x14ed   :  { %v6604_v5 = vpop.permute.xlu0 %6603 }
0x14ee   :  { %6736 = vpow2.f32 %v4216_v3  ;;  %v6606_v6 = vunpack.i.h.bf16 %v6604_v5  ;;  %v6605_v7 = vunpack.i.l.bf16 %v6604_v5 }
0x14f0   :  { %v6496_v8 = vpack.c.bf16 %v6606_v6, %v6605_v7 }
0x14f1   :  { %v4303_v31 = vpop.permute.xlu0 %4302 }
0x14f2   :  { %6497 = vmatpush3.bf16.msra.mxu0 %v6496_v8 }
0x14f3   :  { %6498 = vmatprep.subr.bf16.mxu0 %v6829_v0 }
0x14f8   :  { %v6737_v9 = vpop.eup %6736 }
0x14f9   :  { %v4218_v12 = vsel %vm927_vm4, %v6737_v9, 0.0 }
0x14fa   :  { %4219 = vadd.xlane.f32.xlu1 %v4218_v12 }
0x150b   :  { %6608 = vrot.lane.b32.xlu1 %v7391_v51, %s6834_s10 }
0x1587   :  { %v4220_v13 = vpop.xlane.xlu1 %4219 }
0x1588   :  { %6738 = vrcp.f32 %v4220_v13 }
0x158b   :  { %v6609_v44 = vpop.permute.xlu1 %6608 }
0x158c   :  { %v6611_v14 = vunpack.i.h.bf16 %v6609_v44  ;;  %v6610_v23 = vunpack.i.l.bf16 %v6609_v44 }
0x158e   :  { %v6499_v27 = vpack.c.bf16 %v6611_v14, %v6610_v23 }
0x1592   :  { %v6739_v25 = vpop.eup %6738 }
0x1593   :  { %v4222_v26 = vmul.f32 %v6739_v25, %v6737_v9 }
0x1595   :  { %6279 = vmatmul.mubr.msk.f32.vlgmr.msra.gmra.mrb[44].mxu0 %vm927_vm4, %v4222_v26 }
0x1596   :  { %6501 = vmatpush3.bf16.xpose.msk.msra.mxu0 %vm7387_vm9, %v6499_v27  ;;  %6285 = vmatprep.mubr.msk.f32.mxu0 %vm6830_vm0, %v6831_v1 }
0x1597   :  { %6509 = vmatprep.subr.bf16.mxu0 %v6829_v0 }
0x159d   :  { %6286 = vmatmul.mubr.msk.f32.vlgmr.msra.gmra.mrb[46].mxu0 %vm253_vm2, %v4303_v31 }
0x159e   :  { %6306 = vmatprep.mubr.msk.f32.mxu0 %vm6830_vm0, %v6831_v1 }
0x1668   :  { %v7479_v51 = vpop.f32.mrb[44].mxu0 }
0x1669   :  { %v6280_v32 = vpop.f32.mrb[45].mxu0 }
0x1670   :  { %v4380_v33 = vpop.f32.mrb[46].mxu0 }
0x1671   :  { %v6287_v34 = vpop.f32.mrb[47].mxu0  ;;  %v4384_v36 = vsel %vm927_vm4, %v4380_v33, -inf }
0x1672   :  { %4385 = vmax.xlane.f32.xlu1 %v4384_v36 }
0x16ff   :  { %v4386_v35 = vpop.xlane.xlu1 %4385 }
0x1700   :  { %v4387_v37 = vsub.f32 %v4380_v33, %v4386_v35 }
0x1702   :  { %v4388_v16 = vmul.f32 1.442695, %v4387_v37 }
0x1704   :  { %6740 = vpow2.f32 %v4388_v16 }
0x170e   :  { %v6741_v38 = vpop.eup %6740 }
0x170f   :  { %v4390_v41 = vsel %vm927_vm4, %v6741_v38, 0.0 }
0x1710   :  { %4391 = vadd.xlane.f32.xlu0 %v4390_v41 }
0x1726   :  { %6613 = vrot.lane.b32.xlu0 %v7430_v30, %s6839_s16  ;;  %v6506_v30 = vpack.c.bf16 %v3774_v42, %v3773_v18 }
0x172a   :  { %6623 = vrot.lane.b32.xlu0 %v7489_v24, %s6833_s9 }
0x172e   :  { %4660 = vrot.lane.b32.xlu0 %v7373_v43, %s6833_s9 }
0x179d   :  { %v4392_v57 = vpop.xlane.xlu0 %4391 }
0x179e   :  { %6742 = vrcp.f32 %v4392_v57 }
0x17a1   :  { %v6614_v11 = vpop.permute.xlu0 %6613 }
0x17a2   :  { %v6616_v46 = vunpack.i.h.bf16 %v6614_v11  ;;  %v6615_v47 = vunpack.i.l.bf16 %v6614_v11 }
0x17a4   :  { %v6503_v4 = vpack.c.bf16 %v6616_v46, %v6615_v47 }
0x17a5   :  { %v6624_v6 = vpop.permute.xlu0 %6623 }
0x17a6   :  { %6504 = vmatpush3.bf16.msra.mxu1 %v6503_v4  ;;  %v6626_v8 = vunpack.i.h.bf16 %v6624_v6  ;;  %v6625_v9 = vunpack.i.l.bf16 %v6624_v6 }
0x17a7   :  { %6505 = vmatprep.subr.bf16.mxu1 %v6829_v0 }
0x17a8   :  { %v6743_v45 = vpop.eup %6742  ;;  %v6513_v13 = vpack.c.bf16 %v6626_v8, %v6625_v9 }
0x17a9   :  { %v4394_v15 = vmul.f32 %v6743_v45, %v6741_v38  ;;  %v4661_v44 = vpop.permute.xlu0 %4660 }
0x17ab   :  { %6293 = vmatmul.mubr.msk.f32.vlgmr.msra.gmra.mrb[52].mxu1 %vm927_vm4, %v4394_v15 }
0x17ac   :  { %6299 = vmatprep.mubr.msk.f32.mxu1 %vm6830_vm0, %v6831_v1 }
0x17af   :  { %6508 = vmatpush3.bf16.xpose.msk.msra.mxu1 %vm7387_vm9, %v6506_v30 }
0x17b0   :  { %6516 = vmatprep.subr.bf16.mxu1 %v6829_v0 }
0x17b6   :  { %6300 = vmatmul.mubr.msk.f32.vlgmr.msra.gmra.mrb[54].mxu1 %vm253_vm2, %v7373_v43 }
0x17b7   :  { %6320 = vmatprep.mubr.msk.f32.mxu1 %vm6830_vm0, %v6831_v1 }
0x187e   :  { %v7506_v48 = vpop.f32.mrb[52].mxu1 }
0x187f   :  { %v6294_v49 = vpop.f32.mrb[53].mxu1 }
0x1889   :  { %v4564_v50 = vpop.f32.mrb[54].mxu1 }
0x188a   :  { %v6301_v52 = vpop.f32.mrb[55].mxu1  ;;  %v4568_v22 = vsel %vm927_vm4, %v4564_v50, -inf }
0x188b   :  { %4569 = vmax.xlane.f32.xlu1 %v4568_v22 }
0x1918   :  { %v4570_v53 = vpop.xlane.xlu1 %4569 }
0x1919   :  { %v4571_v55 = vsub.f32 %v4564_v50, %v4570_v53 }
0x191b   :  { %v4572_v58 = vmul.f32 1.442695, %v4571_v55 }
0x191d   :  { %6744 = vpow2.f32 %v4572_v58 }
0x1927   :  { %v6745_v59 = vpop.eup %6744 }
0x1928   :  { %v4574_v60 = vsel %vm927_vm4, %v6745_v59, 0.0 }
0x1929   :  { %4575 = vadd.xlane.f32.xlu1 %v4574_v60 }
0x193a   :  { %6618 = vrot.lane.b32.xlu1 %v7432_v21, %s6837_s14 }
0x19b6   :  { %v4576_v61 = vpop.xlane.xlu1 %4575 }
0x19b7   :  { %6746 = vrcp.f32 %v4576_v61 }
0x19ba   :  { %v6619_v62 = vpop.permute.xlu1 %6618 }
0x19bb   :  { %v6621_v2 = vunpack.i.h.bf16 %v6619_v62  ;;  %v6620_v3 = vunpack.i.l.bf16 %v6619_v62 }
0x19bd   :  { %v6510_v5 = vpack.c.bf16 %v6621_v2, %v6620_v3 }
0x19bf   :  { %6511 = vmatpush3.bf16.msra.mxu0 %v6510_v5 }
0x19c0   :  { %6512 = vmatprep.subr.bf16.mxu0 %v6829_v0 }
0x19c1   :  { %v6747_v7 = vpop.eup %6746 }
0x19c2   :  { %v4578_v12 = vmul.f32 %v6747_v7, %v6745_v59 }
0x19c4   :  { %6307 = vmatmul.mubr.msk.f32.vlgmr.msra.gmra.mrb[48].mxu0 %vm927_vm4, %v4578_v12 }
0x19c5   :  { %6313 = vmatprep.mubr.msk.f32.mxu0 %vm6830_vm0, %v6831_v1 }
0x19c8   :  { %6515 = vmatpush3.bf16.xpose.msk.msra.mxu0 %vm7387_vm9, %v6513_v13 }
0x19c9   :  { %6523 = vmatprep.subr.bf16.mxu0 %v6829_v0 }
0x19cf   :  { %6314 = vmatmul.mubr.msk.f32.vlgmr.msra.gmra.mrb[50].mxu0 %vm253_vm2, %v4661_v44 }
0x19d0   :  { %6334 = vmatprep.mubr.msk.f32.mxu0 %vm6830_vm0, %v6831_v1 }
0x1a97   :  { %v7522_v14 = vpop.f32.mrb[48].mxu0 }
0x1a98   :  { %v6308_v23 = vpop.f32.mrb[49].mxu0 }
0x1aa2   :  { %v4738_v25 = vpop.f32.mrb[50].mxu0 }
0x1aa3   :  { %v6315_v26 = vpop.f32.mrb[51].mxu0  ;;  %v4742_v27 = vsel %vm927_vm4, %v4738_v25, -inf }
0x1aa4   :  { %4743 = vmax.xlane.f32.xlu1 %v4742_v27 }
0x1ab5   :  { %6633 = vrot.lane.b32.xlu1 %v7489_v24, %s6832_s8 }
0x1ab9   :  { %4832 = vrot.lane.b32.xlu1 %v7373_v43, %s6832_s8 }
0x1b31   :  { %v4744_v31 = vpop.xlane.xlu1 %4743 }
0x1b32   :  { %v4745_v32 = vsub.f32 %v4738_v25, %v4744_v31 }
0x1b34   :  { %v4746_v33 = vmul.f32 1.442695, %v4745_v32 }
0x1b35   :  { %v6634_v42 = vpop.permute.xlu1 %6633 }
0x1b36   :  { %6748 = vpow2.f32 %v4746_v33  ;;  %v6636_v57 = vunpack.i.h.bf16 %v6634_v42  ;;  %v6635_v11 = vunpack.i.l.bf16 %v6634_v42  ;;  %v3578_v42 = vld [vmem:[#allocation2 + $0xb0] sm:$0xff] }
0x1b38   :  { %v6520_v47 = vpack.c.bf16 %v6636_v57, %v6635_v11  ;;  %v3579_v57 = vld [vmem:[#allocation2 + $0xb8] sm:$0xff] }
0x1b39   :  { %v4833_v4 = vpop.permute.xlu1 %4832  ;;  %v6537_v11 = vpack.c.bf16 %v3579_v57, %v3578_v42  ;;  %v5420_v42 = vld [vmem:[#allocation2 + $0xf8] sm:$0xff] }
0x1b40   :  { %v6749_v34 = vpop.eup %6748 }
0x1b41   :  { %v4748_v36 = vsel %vm927_vm4, %v6749_v34, 0.0 }
0x1b42   :  { %4749 = vadd.xlane.f32.xlu0 %v4748_v36 }
0x1b58   :  { %6628 = vrot.lane.b32.xlu0 %v7432_v21, %s6836_s13 }
0x1bcf   :  { %v4750_v35 = vpop.xlane.xlu0 %4749 }
0x1bd0   :  { %6750 = vrcp.f32 %v4750_v35 }
0x1bd3   :  { %v6629_v37 = vpop.permute.xlu0 %6628 }
0x1bd4   :  { %v6631_v16 = vunpack.i.h.bf16 %v6629_v37  ;;  %v6630_v38 = vunpack.i.l.bf16 %v6629_v37 }
0x1bd6   :  { %v6517_v41 = vpack.c.bf16 %v6631_v16, %v6630_v38  ;;  %v3576_v38 = vld [vmem:[#allocation2 + $0xa0] sm:$0xff] }
0x1bd8   :  { %6518 = vmatpush3.bf16.msra.mxu1 %v6517_v41  ;;  %v3577_v41 = vld [vmem:[#allocation2 + $0xa8] sm:$0xff] }
0x1bd9   :  { %6519 = vmatprep.subr.bf16.mxu1 %v6829_v0 }
0x1bda   :  { %v6751_v18 = vpop.eup %6750 }
0x1bdb   :  { %v4752_v46 = vmul.f32 %v6751_v18, %v6749_v34  ;;  %v6533_v18 = vpack.c.bf16 %v3577_v41, %v3576_v38  ;;  %v5418_v38 = vld [vmem:[#allocation2 + $0xe8] sm:$0xff] }
0x1bdd   :  { %6321 = vmatmul.mubr.msk.f32.vlgmr.msra.gmra.mrb[56].mxu1 %vm927_vm4, %v4752_v46 }
0x1bde   :  { %6327 = vmatprep.mubr.msk.f32.mxu1 %vm6830_vm0, %v6831_v1 }
0x1be1   :  { %6522 = vmatpush3.bf16.xpose.msk.msra.mxu1 %vm7387_vm9, %v6520_v47 }
0x1be2   :  { %6530 = vmatprep.subr.bf16.mxu1 %v6829_v0 }
0x1be8   :  { %6328 = vmatmul.mubr.msk.f32.vlgmr.msra.gmra.mrb[58].mxu1 %vm253_vm2, %v4833_v4 }
0x1be9   :  { %6348 = vmatprep.mubr.msk.f32.mxu1 %vm6830_vm0, %v6831_v1 }
0x1cb0   :  { %v4828_v45 = vpop.f32.mrb[56].mxu1 }
0x1cb1   :  { %v6322_v15 = vpop.f32.mrb[57].mxu1 }
0x1cbb   :  { %v4910_v30 = vpop.f32.mrb[58].mxu1 }
0x1cbc   :  { %v6329_v49 = vpop.f32.mrb[59].mxu1  ;;  %v4914_v50 = vsel %vm927_vm4, %v4910_v30, -inf }
0x1cbd   :  { %4915 = vmax.xlane.f32.xlu0 %v4914_v50  ;;  %v6774_v50 = vld [vmem:[%s7640_s5 + $0x8] sm:$0xff] }
0x1cd3   :  { %6638 = vrot.lane.b32.xlu0 %v7432_v21, %s6838_s15 }
0x1cd7   :  { %5004 = vrot.lane.b32.xlu0 %v7373_v43, %s6834_s10 }
0x1d4a   :  { %v4916_v52 = vpop.xlane.xlu0 %4915 }
0x1d4b   :  { %v4917_v22 = vsub.f32 %v4910_v30, %v4916_v52  ;;  %v5194_v52 = vrot.slane %v6774_v50, %v7133_v28 }
0x1d4d   :  { %v4918_v53 = vmul.f32 1.442695, %v4917_v22 }
0x1d4e   :  { %v6639_v55 = vpop.permute.xlu0 %6638 }
0x1d4f   :  { %6752 = vpow2.f32 %v4918_v53  ;;  %v6641_v58 = vunpack.i.h.bf16 %v6639_v55  ;;  %v6640_v59 = vunpack.i.l.bf16 %v6639_v55 }
0x1d51   :  { %v6524_v60 = vpack.c.bf16 %v6641_v58, %v6640_v59 }
0x1d53   :  { %6525 = vmatpush3.bf16.msra.mxu0 %v6524_v60 }
0x1d54   :  { %6526 = vmatprep.subr.bf16.mxu0 %v6829_v0  ;;  %v5005_v0 = vpop.permute.xlu0 %5004 }
0x1d59   :  { %v6753_v61 = vpop.eup %6752 }
0x1d5a   :  { %v4920_v62 = vsel %vm927_vm4, %v6753_v61, 0.0 }
0x1d5b   :  { %4921 = vadd.xlane.f32.xlu1 %v4920_v62 }
0x1d6c   :  { %6643 = vrot.lane.b32.xlu1 %v7489_v24, %s6834_s10 }
0x1de8   :  { %v4922_v2 = vpop.xlane.xlu1 %4921 }
0x1de9   :  { %6754 = vrcp.f32 %v4922_v2 }
0x1dec   :  { %v6644_v43 = vpop.permute.xlu1 %6643 }
0x1ded   :  { %v6646_v3 = vunpack.i.h.bf16 %v6644_v43  ;;  %v6645_v5 = vunpack.i.l.bf16 %v6644_v43 }
0x1def   :  { %v6527_v8 = vpack.c.bf16 %v6646_v3, %v6645_v5 }
0x1df3   :  { %v6755_v6 = vpop.eup %6754 }
0x1df4   :  { %v4924_v7 = vmul.f32 %v6755_v6, %v6753_v61 }
0x1df6   :  { %6335 = vmatmul.mubr.msk.f32.vlgmr.msra.gmra.mrb[52].mxu0 %vm927_vm4, %v4924_v7 }
0x1df7   :  { %6529 = vmatpush3.bf16.xpose.msk.msra.mxu0 %vm7387_vm9, %v6527_v8  ;;  %6341 = vmatprep.mubr.msk.f32.mxu0 %vm6830_vm0, %v6831_v1 }
0x1dfe   :  { %6342 = vmatmul.mubr.msk.f32.vlgmr.msra.gmra.mrb[54].mxu0 %vm253_vm2, %v5005_v0 }
0x1ec9   :  { %v5000_v24 = vpop.f32.mrb[52].mxu0 }
0x1eca   :  { %v6336_v9 = vpop.f32.mrb[53].mxu0 }
0x1ed1   :  { %v5082_v12 = vpop.f32.mrb[54].mxu0 }
0x1ed2   :  { %v6343_v13 = vpop.f32.mrb[55].mxu0  ;;  %v5086_v44 = vsel %vm927_vm4, %v5082_v12, -inf }
0x1ed3   :  { %5087 = vmax.xlane.f32.xlu1 %v5086_v44  ;;  %v5320_v13 = vld [vmem:[#allocation2 + $0xd8] sm:$0xff] }
0x1ee4   :  { %4475 = vrot.lane.b32.xlu1 %v7459_v56, %s6827_s12 }
0x1ee8   :  { %4479 = vrot.lane.b32.xlu1 %v7479_v51, %s6840_s17 }
0x1eec   :  { %4483 = vrot.lane.b32.xlu1 %v7506_v48, %s6841_s18 }
0x1f60   :  { %v5088_v1 = vpop.xlane.xlu1 %5087 }
0x1f61   :  { %v5089_v20 = vsub.f32 %v5082_v12, %v5088_v1  ;;  %v5319_v12 = vld [vmem:[#allocation2 + $0xd0] sm:$0xff] }
0x1f62   :  { %v6545_v44 = vpack.c.bf16 %v5320_v13, %v5319_v12  ;;  %v5547_v12 = vld [vmem:[#allocation4 + $0x80] sm:$0xff]  ;;  %v5548_v13 = vld [vmem:[#allocation4 + $0x88] sm:$0xff] }
0x1f63   :  { %v5090_v23 = vmul.f32 1.442695, %v5089_v20 }
0x1f64   :  { %v4476_v56 = vpop.permute.xlu1 %4475 }
0x1f65   :  { %6756 = vpow2.f32 %v5090_v23  ;;  %v4486_v35 = vsel %vm253_vm2, %v7457_v54, %v4476_v56 }
0x1f68   :  { %v4480_v48 = vpop.permute.xlu1 %4479 }
0x1f6c   :  { %v4484_v36 = vpop.permute.xlu1 %4483 }
0x1f6f   :  { %v6757_v25 = vpop.eup %6756 }
0x1f70   :  { %v5092_v26 = vsel %vm927_vm4, %v6757_v25, 0.0 }
0x1f71   :  { %5093 = vadd.xlane.f32.xlu0 %v5092_v26 }
0x1f87   :  { %6648 = vrot.lane.b32.xlu0 %v7432_v21, %s6839_s16  ;;  %v4487_v21 = vsel %vm927_vm4, %v4486_v35, %v4480_v48 }
0x1f88   :  { %v4488_v16 = vsel %vm929_vm5, %v4487_v21, %v4484_v36 }
0x1f8b   :  { %5177 = vrot.lane.b32.xlu0 %v4828_v45, %s6827_s12 }
0x1f8f   :  { %5181 = vrot.lane.b32.xlu0 %v5000_v24, %s6840_s17  ;;  %v5318_v24 = vld [vmem:[#allocation2 + $0xc8] sm:$0xff] }
0x1ffe   :  { %v5094_v51 = vpop.xlane.xlu0 %5093 }
0x1fff   :  { %6758 = vrcp.f32 %v5094_v51  ;;  %v7594_v51 = vld [vmem:[%s7640_s5 + $0x10] sm:$0xff] }
0x2002   :  { %v6649_v27 = vpop.permute.xlu0 %6648 }
0x2003   :  { %v6651_v31 = vunpack.i.h.bf16 %v6649_v27  ;;  %v6650_v32 = vunpack.i.l.bf16 %v6649_v27  ;;  %v5307_v27 = vrot.slane %v7594_v51, %v6942_v19  ;;  %v5419_v19 = vld [vmem:[#allocation2 + $0xf0] sm:$0xff] }
0x2005   :  { %v6531_v33 = vpack.c.bf16 %v6651_v31, %v6650_v32  ;;  %v5313_v32 = vrot.slane %v7594_v51, %v7015_v63  ;;  %v7605_v63 = vld [vmem:[%s7640_s5 + $0x18] sm:$0x7] }
0x2006   :  { %v5178_v47 = vpop.permute.xlu0 %5177  ;;  %v5324_v57 = vrot.slane %v7605_v63, %v7141_v29 }
0x2007   :  { %6532 = vmatpush3.bf16.msra.mxu1 %v6531_v33  ;;  %v5188_v45 = vsel %vm253_vm2, %v7522_v14, %v5178_v47 }
0x2008   :  { %6534 = vmatprep.subr.bf16.mxu1 %v6533_v18 }
0x2009   :  { %v6759_v34 = vpop.eup %6758 }
0x200a   :  { %v5096_v37 = vmul.f32 %v6759_v34, %v6757_v25  ;;  %v5182_v4 = vpop.permute.xlu0 %5181 }
0x200b   :  { %v5189_v15 = vsel %vm927_vm4, %v5188_v45, %v5182_v4 }
0x200c   :  { %6349 = vmatmul.mubr.msk.f32.vlgmr.msra.gmra.mrb[60].mxu1 %vm927_vm4, %v5096_v37 }
0x200d   :  { %6359 = vmatprep.mubr.msk.f32.mxu1 %vm82_vm1, %v4488_v16  ;;  %6536 = vmatpush3.bf16.msra.mxu1 %v6533_v18  ;;  %v5417_v16 = vld [vmem:[#allocation2 + $0xe0] sm:$0xff]  ;;  %v6553_v18 = vpack.c.bf16 %v5420_v42, %v5419_v19 }
0x200e   :  { %6538 = vmatprep.subr.bf16.mxu1 %v6537_v11  ;;  %v6549_v41 = vpack.c.bf16 %v5418_v38, %v5417_v16  ;;  %v6776_v19 = vld [vmem:[%s7641_s6] sm:$0x3] }
0x2011   :  { %6540 = vmatpush3.bf16.msra.mxu1 %v6537_v11 }
0x2012   :  { %6550 = vmatprep.subr.bf16.mxu1 %v6549_v41 }
0x20df   :  { %v5172_v54 = vpop.f32.mrb[60].mxu1 }
0x20e0   :  { %5185 = vrot.lane.b32.xlu1 %v5172_v54, %s6841_s18  ;;  %v6350_v46 = vpop.f32.mrb[61].mxu1 }
0x2152   :  { %v5186_v30 = vpop.permute.xlu1 %5185 }
0x2153   :  { %v5190_v49 = vsel %vm929_vm5, %v5189_v15, %v5186_v30 }
0x2154   :  { %6360 = vmatmul.mubr.msk.f32.vlgmr.msra.gmra.mrb[62].mxu1 %vm82_vm1, %v5190_v49 }
0x2155   :  { %6552 = vmatpush3.bf16.msra.mxu1 %v6549_v41 }
0x2156   :  { %6554 = vmatprep.subr.bf16.mxu1 %v6553_v18 }
0x2159   :  { %6556 = vmatpush3.bf16.msra.mxu1 %v6553_v18 }
0x2227   :  { %v6361_v22 = vpop.f32.mrb[62].mxu1 }
0x2228   :  { %v5273_v53 = vadd.f32 %v6361_v22, %v5194_v52  ;;  %v5267_v55 = vpop.f32.mrb[63].mxu1 }
0x2229   :  { %v5268_v58 = vadd.f32 %v5267_v55, %v5194_v52 }
0x222a   :  { %v5277_v59 = vadd.f32 %v5273_v53, %v7356_v40 }
0x222b   :  { %v5276_v14 = vadd.f32 %v5268_v58, %v7354_v39  ;;  %v5317_v39 = vld [vmem:[#allocation2 + $0xc0] sm:$0xff]  ;;  %v5424_v58 = vrot.slane %v7605_v63, %v7200_v10 }
0x222c   :  { %v5281_v60 = vsel %vm82_vm1, %v5277_v59, 0.0  ;;  %v6541_v9 = vpack.c.bf16 %v5318_v24, %v5317_v39 }
0x222d   :  { %5282 = vadd.xlane.f32.xlu1 %v5281_v60  ;;  %v5278_v61 = vsel %vm82_vm1, %v5276_v14, 0.0 }
0x222e   :  { %5279 = vadd.xlane.f32.xlu0 %v5278_v61  ;;  %6542 = vmatprep.subr.bf16.mxu0 %v6541_v9 }
0x222f   :  { %6544 = vmatpush3.bf16.msra.mxu0 %v6541_v9 }
0x2230   :  { %6546 = vmatprep.subr.bf16.mxu0 %v6545_v44 }
0x2233   :  { %6548 = vmatpush3.bf16.msra.mxu0 %v6545_v44  ;;  %v6557_v44 = vpack.c.bf16 %v5548_v13, %v5547_v12 }
0x2235   :  { %6558 = vmatprep.subr.bf16.mxu0 %v6557_v44 }
0x22ba   :  { %v5283_v62 = vpop.xlane.xlu1 %5282 }
0x22bb   :  { %v5285_v2 = vmul.f32 0.03125, %v5283_v62  ;;  %v5280_v43 = vpop.xlane.xlu0 %5279 }
0x22bc   :  { %v5284_v3 = vmul.f32 0.03125, %v5280_v43 }
0x22bd   :  { %v5287_v5 = vsub.f32 %v5277_v59, %v5285_v2 }
0x22be   :  { %v5286_v6 = vsub.f32 %v5276_v14, %v5284_v3 }
0x22bf   :  { %v5289_v0 = vmul.f32 %v5287_v5, %v5287_v5 }
0x22c0   :  { %v5288_v7 = vmul.f32 %v5286_v6, %v5286_v6 }
0x22c1   :  { %v5293_v40 = vsel %vm82_vm1, %v5289_v0, 0.0 }
0x22c2   :  { %v5290_v8 = vsel %vm82_vm1, %v5288_v7, 0.0 }
0x22c3   :  { %5291 = vadd.xlane.f32.xlu0 %v5290_v8 }
0x22c7   :  { %5294 = vadd.xlane.f32.xlu0 %v5293_v40 }
0x2350   :  { %v5292_v1 = vpop.xlane.xlu0 %5291 }
0x2351   :  { %v5296_v20 = vmul.f32 0.03125, %v5292_v1  ;;  %v5549_v1 = vld [vmem:[#allocation4 + $0x90] sm:$0xff] }
0x2353   :  { %v5298_v23 = vadd.f32 1e-05, %v5296_v20  ;;  %v5550_v20 = vld [vmem:[#allocation4 + $0x98] sm:$0xff] }
0x2354   :  { %v5295_v25 = vpop.xlane.xlu0 %5294 }
0x2355   :  { %6760 = vrsqrt.f32 %v5298_v23  ;;  %v5297_v26 = vmul.f32 0.03125, %v5295_v25  ;;  %v6561_v23 = vpack.c.bf16 %v5550_v20, %v5549_v1 }
0x2357   :  { %v5299_v56 = vadd.f32 1e-05, %v5297_v26 }
0x2359   :  { %6762 = vrsqrt.f32 %v5299_v56 }
0x235f   :  { %v6761_v48 = vpop.eup %6760 }
0x2360   :  { %v5302_v31 = vmul.f32 %v6761_v48, %v5286_v6 }
0x2362   :  { %v5308_v33 = vmul.f32 %v5307_v27, %v5302_v31 }
0x2363   :  { %v6763_v34 = vpop.eup %6762 }
0x2364   :  { %v5303_v36 = vmul.f32 %v6763_v34, %v5287_v5  ;;  %v5314_v35 = vadd.f32 %v5313_v32, %v5308_v33 }
0x2366   :  { %v5309_v37 = vmul.f32 %v5307_v27, %v5303_v36  ;;  %6370 = vmatprep.mubr.msk.f32.mxu0 %vm82_vm1, %v5314_v35 }
0x2368   :  { %v5315_v21 = vadd.f32 %v5313_v32, %v5309_v37  ;;  %v5537_v32 = vrot.slane %v7594_v51, %v7133_v28  ;;  %v5554_v28 = vrot.slane %v6776_v19, %v7141_v29 }
0x236a   :  { %6371 = vmatmul.mubr.msk.f32.vlgmr.msra.gmra.mrb[56].mxu0 %vm82_vm1, %v5315_v21 }
0x236b   :  { %6560 = vmatpush3.bf16.msra.mxu0 %v6557_v44 }
0x236c   :  { %6562 = vmatprep.subr.bf16.mxu0 %v6561_v23 }
0x236f   :  { %6564 = vmatpush3.bf16.msra.mxu0 %v6561_v23 }
0x243d   :  { %v6372_v11 = vpop.f32.mrb[56].mxu0 }
0x243e   :  { %v5403_v54 = vadd.f32 %v6372_v11, %v5324_v57  ;;  %v5397_v46 = vpop.f32.mrb[57].mxu0 }
0x243f   :  { %v5398_v47 = vadd.f32 %v5397_v46, %v5324_v57 }
0x2440   :  { %v5409_v4 = vmul.f32 0.70710677, %v5403_v54  ;;  %v5407_v22 = vmul.f32 0.5, %v5403_v54 }
0x2441   :  { %v5408_v45 = vmul.f32 0.70710677, %v5398_v47  ;;  %v5406_v50 = vmul.f32 0.5, %v5398_v47 }
0x2442   :  { %6764 = verf.f32 %v5409_v4 }
0x2443   :  { %6766 = verf.f32 %v5408_v45 }
0x244c   :  { %v6765_v15 = vpop.eup %6764 }
0x244d   :  { %v6767_v30 = vpop.eup %6766  ;;  %v5413_v49 = vadd.f32 1.0, %v6765_v15 }
0x244e   :  { %v5412_v52 = vadd.f32 1.0, %v6767_v30 }
0x244f   :  { %v5415_v55 = vmul.f32 %v5413_v49, %v5407_v22 }
0x2450   :  { %v5414_v53 = vmul.f32 %v5412_v52, %v5406_v50 }
0x2452   :  { %6381 = vmatprep.mubr.msk.f32.mxu1 %vm82_vm1, %v5414_v53 }
0x2453   :  { %6382 = vmatmul.mubr.msk.f32.vlgmr.msra.gmra.mrb[64].mxu1 %vm82_vm1, %v5415_v55 }
0x2526   :  { %v6383_v59 = vpop.f32.mrb[64].mxu1 }
0x2527   :  { %v5503_v14 = vadd.f32 %v6383_v59, %v5424_v58  ;;  %v5497_v60 = vpop.f32.mrb[65].mxu1 }
0x2528   :  { %v5498_v61 = vadd.f32 %v5497_v60, %v5424_v58 }
0x2529   :  { %v5507_v62 = vadd.f32 %v5503_v14, %v5315_v21 }
0x252a   :  { %v5506_v2 = vadd.f32 %v5498_v61, %v5314_v35  ;;  %v5543_v35 = vrot.slane %v7605_v63, %v7117_v17 }
0x252b   :  { %v5511_v43 = vsel %vm82_vm1, %v5507_v62, 0.0 }
0x252c   :  { %5512 = vadd.xlane.f32.xlu0 %v5511_v43  ;;  %v5508_v3 = vsel %vm82_vm1, %v5506_v2, 0.0 }
0x252d   :  { %5509 = vadd.xlane.f32.xlu1 %v5508_v3 }
0x25b9   :  { %v5513_v5 = vpop.xlane.xlu0 %5512 }
0x25ba   :  { %v5515_v6 = vmul.f32 0.03125, %v5513_v5  ;;  %v5510_v7 = vpop.xlane.xlu1 %5509 }
0x25bb   :  { %v5514_v8 = vmul.f32 0.03125, %v5510_v7 }
0x25bc   :  { %v5517_v0 = vsub.f32 %v5507_v62, %v5515_v6 }
0x25bd   :  { %v5516_v40 = vsub.f32 %v5506_v2, %v5514_v8 }
0x25be   :  { %v5519_v39 = vmul.f32 %v5517_v0, %v5517_v0 }
0x25bf   :  { %v5518_v10 = vmul.f32 %v5516_v40, %v5516_v40 }
0x25c0   :  { %v5523_v24 = vsel %vm82_vm1, %v5519_v39, 0.0 }
0x25c1   :  { %5524 = vadd.xlane.f32.xlu0 %v5523_v24  ;;  %v5520_v9 = vsel %vm82_vm1, %v5518_v10, 0.0 }
0x25c2   :  { %5521 = vadd.xlane.f32.xlu1 %v5520_v9 }
0x264e   :  { %v5525_v25 = vpop.xlane.xlu0 %5524 }
0x264f   :  { %v5527_v26 = vmul.f32 0.03125, %v5525_v25  ;;  %v5522_v56 = vpop.xlane.xlu1 %5521 }
0x2650   :  { %v5526_v27 = vmul.f32 0.03125, %v5522_v56 }
0x2651   :  { %v5529_v48 = vadd.f32 1e-05, %v5527_v26 }
0x2652   :  { %v5528_v31 = vadd.f32 1e-05, %v5526_v27 }
0x2653   :  { %6768 = vrsqrt.f32 %v5529_v48 }
0x2654   :  { %6770 = vrsqrt.f32 %v5528_v31 }
0x265d   :  { %v6769_v33 = vpop.eup %6768 }
0x265e   :  { %v6771_v34 = vpop.eup %6770  ;;  %v5533_v36 = vmul.f32 %v6769_v33, %v5517_v0 }
0x265f   :  { %v5532_v37 = vmul.f32 %v6771_v34, %v5516_v40 }
0x2660   :  { %v5539_v21 = vmul.f32 %v5537_v32, %v5533_v36 }
0x2661   :  { %v5538_v16 = vmul.f32 %v5537_v32, %v5532_v37 }
0x2662   :  { %v5545_v41 = vadd.f32 %v5543_v35, %v5539_v21 }
0x2663   :  { %v5544_v38 = vadd.f32 %v5543_v35, %v5538_v16 }
0x2665   :  { %6392 = vmatprep.mubr.msk.f32.mxu0 %vm82_vm1, %v5544_v38 }
0x2666   :  { %6393 = vmatmul.mubr.msk.f32.vlgmr.msra.gmra.mrb[58].mxu0 %vm82_vm1, %v5545_v41 }
0x2739   :  { %v6394_v51 = vpop.f32.mrb[58].mxu0 }
0x273a   :  { %v5633_v42 = vadd.f32 %v6394_v51, %v5554_v28  ;;  %v5627_v18 = vpop.f32.mrb[59].mxu0 }
0x273b   :  { %v5628_v57 = vadd.f32 %v5627_v18, %v5554_v28 }
0x273c   :  { %5637 = vst.msk [vmem:[%s7642_s7 + $0x8] sm:$0xff] %vm3448_vm8, %v5633_v42 }
0x273d   :  { %5636 = vst.msk [vmem:[%s7642_s7] sm:$0xff] %vm3448_vm8, %v5628_v57 }
0x273e   :  { %5642 = vsyncpa [#allocation3], 1 }
0x273f   :  { %5643 = vsyncpa [#allocation5], 1 }

</bundles_post_ra>
